<compile_context>
chip_gen: v5e
topology: v5e:2x2
jax: 0.10.0
libtpu: 0.0.40
codegen_flags: <defaults>
</compile_context>

<pallas_src>
import math

import jax
import jax.numpy as jnp
from jax.experimental import pallas as pl
from jax.experimental.pallas import tpu as pltpu

# ----------------------------- model config (small but module-consistent) ---
PAD_IDX = 0
VOCAB_SIZE = 32
VOCAB_PAD = 128        # lane-dense padded vocab for the final FC output
D_MODEL = 128          # 128 -> lane aligned
NHEAD = 8              # head_dim = 16
NUM_LAYERS = 2         # module default is 6; reduced for a small test
DIM_FF = 256           # module default is 2048; reduced for a small test
MAX_LENGTH = 16
LN_EPS = 1e-5
NEG_INF = -1e9         # finite large-negative mask value (avoids NaN vs -inf)

NT_DIMS = (((1,), (1,)), ((), ()))   # contract lhs dim 1 with rhs dim 1 (x @ y.T)


# ----------------------------- fused Pallas kernel ---------------------------
def fused_decoder_kernel(x_ref, mem_ref, mself_ref, mcross_ref,
                         bds_ref, bdc_ref,
                         sa_w_ref, sa_b_ref, sa_wo_ref, sa_bo_ref,
                         ca_qw_ref, ca_qb_ref, ca_kvw_ref, ca_kvb_ref,
                         ca_wo_ref, ca_bo_ref,
                         ff_w1_ref, ff_b1_ref, ff_w2_ref, ff_b2_ref,
                         ln_g_ref, ln_b_ref, fc_w_ref, fc_b_ref,
                         out_ref):
    """All TransformerDecoderLayers + final FC, batch folded into rows."""
    f32 = jnp.float32
    bf16 = jnp.bfloat16
    H = NHEAD
    D = D_MODEL

    x = x_ref[...]                       # (B*T, D) f32 residual stream
    mask_self = mself_ref[...]           # (B*T, H*B*T) f32 additive
    mask_cross = mcross_ref[...]         # (B*T, H*B*S) f32 additive
    bd_self = bds_ref[...]               # (H*B*T, D) bf16 0/1 head-select
    bd_cross = bdc_ref[...]              # (H*B*S, D) bf16 0/1 head-select

    def layer_norm(v, g, b):
        mu = jnp.mean(v, axis=-1, keepdims=True)
        d = v - mu
        var = jnp.mean(d * d, axis=-1, keepdims=True)
        return d * jax.lax.rsqrt(var + LN_EPS) * g + b

    def attention(q, k, v, bd, add_mask):
        # q: (BT, D) bf16 (scale pre-folded into weights); k, v: (Sk, D) bf16.
        # Lane-dense block-diagonal layout: score column = h*Sk + s'.
        k_rep = jnp.concatenate([k] * H, axis=0) * bd        # (H*Sk, D) bf16
        v_rep = jnp.concatenate([v] * H, axis=0) * bd        # (H*Sk, D) bf16
        # NT matmul (contract dim 1 vs dim 1) -> no transpose materialized.
        s = jax.lax.dot_general(q, k_rep, NT_DIMS,
                                preferred_element_type=f32)  # (BT, H*Sk)
        s = s + add_mask
        # Shared per-row max across heads (per-head softmax is shift-invariant);
        # masked lanes are -1e9 -> exp == 0.
        m = jnp.max(s, axis=-1, keepdims=True)
        p = jnp.exp(s - m).astype(bf16)                      # unnormalized probs
        ctx = jnp.dot(p, v_rep, preferred_element_type=f32)  # (BT, D) unnormalized
        denom = jnp.dot(p, bd, preferred_element_type=f32)   # per-head softmax sums
        denom = jnp.maximum(denom, 1e-30)                    # NaN guard
        return ctx * pl.reciprocal(denom, approx=True)       # deferred normalization

    # Layer-invariant cross-attention K/V projection of memory (hoisted out of loop).
    memb = mem_ref[...].astype(bf16)                                   # (B*S, D)
    kv_all = (jnp.dot(memb, ca_kvw_ref[...], preferred_element_type=f32)
              + ca_kvb_ref[...]).astype(bf16)                          # (B*S, L*2D)

    for li in range(NUM_LAYERS):                                       # static unroll
        g = ln_g_ref[li]
        be = ln_b_ref[li]

        # --- self attention (post-norm), single fused QKV matmul ---
        xb = x.astype(bf16)
        qkv = (jnp.dot(xb, sa_w_ref[li], preferred_element_type=f32)
               + sa_b_ref[li]).astype(bf16)                            # (BT, 3D)
        sa_ctx = attention(qkv[:, 0:D], qkv[:, D:2 * D], qkv[:, 2 * D:3 * D],
                           bd_self, mask_self)
        sa = (jnp.dot(sa_ctx.astype(bf16), sa_wo_ref[li],
                      preferred_element_type=f32) + sa_bo_ref[li])
        x = layer_norm(x + sa, g[0:1, :], be[0:1, :])

        # --- cross attention over memory (cross-batch lanes masked) ---
        xb = x.astype(bf16)
        q = (jnp.dot(xb, ca_qw_ref[li], preferred_element_type=f32)
             + ca_qb_ref[li]).astype(bf16)                             # (BT, D)
        k = kv_all[:, li * 2 * D: li * 2 * D + D]                      # (B*S, D)
        v = kv_all[:, li * 2 * D + D: (li + 1) * 2 * D]                # (B*S, D)
        ca_ctx = attention(q, k, v, bd_cross, mask_cross)
        ca = (jnp.dot(ca_ctx.astype(bf16), ca_wo_ref[li],
                      preferred_element_type=f32) + ca_bo_ref[li])
        x = layer_norm(x + ca, g[1:2, :], be[1:2, :])

        # --- feed-forward (ReLU) ---
        xb = x.astype(bf16)
        h = jnp.maximum(
            jnp.dot(xb, ff_w1_ref[li], preferred_element_type=f32) + ff_b1_ref[li],
            0.0)
        ff = (jnp.dot(h.astype(bf16), ff_w2_ref[li],
                      preferred_element_type=f32) + ff_b2_ref[li])
        x = layer_norm(x + ff, g[2:3, :], be[2:3, :])

    # --- final FC, lane-dense (vocab padded to 128, unmasked stores) ---
    out_ref[...] = (jnp.dot(x.astype(bf16), fc_w_ref[...],
                            preferred_element_type=f32) + fc_b_ref[...])


# ----------------------------- wrappers ---------------------------------------
WEIGHT_NAMES = ('sa_w', 'sa_b', 'sa_wo', 'sa_bo',
                'ca_qw', 'ca_qb', 'ca_kvw', 'ca_kvb', 'ca_wo', 'ca_bo',
                'ff_w1', 'ff_b1', 'ff_w2', 'ff_b2',
                'ln_g', 'ln_b', 'fc_w', 'fc_b')


def fused_text_decoder(x_flat, mem_flat, mask_self, mask_cross,
                       bd_self, bd_cross, params):
    BT = x_flat.shape[0]
    weights = [params[n] for n in WEIGHT_NAMES]
    # Single invocation, no grid: every operand is a whole-array VMEM block, so the
    # stacked weights are single-buffered and activations never touch HBM mid-network.
    # TODO(synk): on v7x (2 TCs) a B>=2 split via core_map/CORE_PARALLEL could halve
    # wall clock; at this latency-bound size a single invocation is kept for v5e/v6e.
    return pl.pallas_call(
        fused_decoder_kernel,
        out_shape=jax.ShapeDtypeStruct((BT, VOCAB_PAD), jnp.float32),
    )(x_flat, mem_flat, mask_self, mask_cross, bd_self, bd_cross, *weights)


def make_positional_encoding(d_model, max_length):
    pos = jnp.arange(max_length, dtype=jnp.float32)[:, None]
    div = jnp.exp(jnp.arange(0, d_model, 2, dtype=jnp.float32)
                  * (-math.log(10000.0) / d_model))
    pe = jnp.zeros((max_length, d_model), dtype=jnp.float32)
    pe = pe.at[:, 0::2].set(jnp.sin(pos * div))
    pe = pe.at[:, 1::2].set(jnp.cos(pos * div))
    return pe


def init_params(key):
    def nrm(k, shape, scale=0.02):
        return scale * jax.random.normal(k, shape, dtype=jnp.float32)

    bf16 = jnp.bfloat16
    D, H, L, F = D_MODEL, NHEAD, NUM_LAYERS, DIM_FF
    dh = D // H
    qscale = 1.0 / math.sqrt(dh)        # folded into q-projection weights below

    keys = jax.random.split(key, 2 + L)
    emb = nrm(keys[0], (VOCAB_SIZE, D))
    emb = emb.at[PAD_IDX].set(0.0)      # padding_idx row = 0

    fc_w = jnp.zeros((D, VOCAB_PAD), jnp.float32)
    fc_w = fc_w.at[:, :VOCAB_SIZE].set(nrm(keys[1], (D, VOCAB_SIZE)))

    sa_w, sa_wo, ca_qw, ca_kvw, ca_wo, ff_w1, ff_w2 = [], [], [], [], [], [], []
    for li in range(L):
        lk = jax.random.split(keys[2 + li], 6)
        w = nrm(lk[0], (D, 3 * D))
        w = w.at[:, :D].multiply(qscale)              # fold 1/sqrt(dh) into q cols
        sa_w.append(w)
        sa_wo.append(nrm(lk[1], (D, D)))
        cw = nrm(lk[2], (D, 3 * D))
        ca_qw.append(cw[:, :D] * qscale)              # fold 1/sqrt(dh) into q cols
        ca_kvw.append(cw[:, D:3 * D])                 # (D, 2D) layer-invariant K/V
        ca_wo.append(nrm(lk[3], (D, D)))
        ff_w1.append(nrm(lk[4], (D, F)))
        ff_w2.append(nrm(lk[5], (F, D)))

    return {
        'embedding': emb,
        'pe': make_positional_encoding(D, MAX_LENGTH),
        # matmul weights in bf16 (native MXU dtype); biases/LN in f32.
        # Projection biases are zero; if nonzero, the q-bias slice must also be
        # multiplied by qscale (scale is folded into the q projection).
        'sa_w': jnp.stack(sa_w).astype(bf16),
        'sa_b': jnp.zeros((L, 1, 3 * D), jnp.float32),
        'sa_wo': jnp.stack(sa_wo).astype(bf16),
        'sa_bo': jnp.zeros((L, 1, D), jnp.float32),
        'ca_qw': jnp.stack(ca_qw).astype(bf16),
        'ca_qb': jnp.zeros((L, 1, D), jnp.float32),
        'ca_kvw': jnp.concatenate(ca_kvw, axis=1).astype(bf16),   # (D, L*2D)
        'ca_kvb': jnp.zeros((1, L * 2 * D), jnp.float32),
        'ca_wo': jnp.stack(ca_wo).astype(bf16),
        'ca_bo': jnp.zeros((L, 1, D), jnp.float32),
        'ff_w1': jnp.stack(ff_w1).astype(bf16),
        'ff_b1': jnp.zeros((L, 1, F), jnp.float32),
        'ff_w2': jnp.stack(ff_w2).astype(bf16),
        'ff_b2': jnp.zeros((L, 1, D), jnp.float32),
        'ln_g': jnp.ones((L, 3, D), jnp.float32),
        'ln_b': jnp.zeros((L, 3, D), jnp.float32),
        'fc_w': fc_w.astype(bf16),
        'fc_b': jnp.zeros((1, VOCAB_PAD), jnp.float32),
    }


@jax.jit
def text_decoder_forward(memory, tgt, params):
    B, T = tgt.shape
    S = memory.shape[1]
    D, H = D_MODEL, NHEAD
    dh = D // H
    BT, BS = B * T, B * S

    # TODO(synk): embedding gather + positional add stay as XLA glue (no efficient
    # single-row Pallas gather at this scale).
    x = params['embedding'][tgt] + params['pe'][:T][None]          # (B, T, D) f32
    x_flat = x.reshape(BT, D).astype(jnp.float32)
    mem_flat = memory.reshape(BS, D).astype(jnp.float32)

    # Hoisted mask construction (causal + key-padding + cross-batch kill), finite
    # -1e9, pre-tiled along the lane axis to the (BT, H*keys) lane-dense layout:
    # score column index = h*num_keys + (b'*T_or_S + pos).
    qb = jnp.arange(BT) // T
    qt = jnp.arange(BT) % T
    key_pad = (tgt.reshape(-1) == PAD_IDX)
    valid_self = ((qb[:, None] == qb[None, :])
                  & (qt[:, None] >= qt[None, :])
                  & (~key_pad)[None, :])
    mask_self = jnp.tile(jnp.where(valid_self, 0.0, NEG_INF).astype(jnp.float32),
                         (1, H))                                    # (BT, H*BT)
    mb = jnp.arange(BS) // S
    valid_cross = qb[:, None] == mb[None, :]
    mask_cross = jnp.tile(jnp.where(valid_cross, 0.0, NEG_INF).astype(jnp.float32),
                          (1, H))                                   # (BT, H*BS)

    # Hoisted block-diagonal head-selection matrices (constant-folded under jit).
    col_head = jnp.arange(D) // dh
    bd_self = ((jnp.arange(H * BT)[:, None] // BT) == col_head[None, :]
               ).astype(jnp.bfloat16)                               # (H*BT, D)
    bd_cross = ((jnp.arange(H * BS)[:, None] // BS) == col_head[None, :]
                ).astype(jnp.bfloat16)                              # (H*BS, D)

    logits_pad = fused_text_decoder(x_flat, mem_flat, mask_self, mask_cross,
                                    bd_self, bd_cross, params)      # (BT, 128)
    return logits_pad.reshape(B, T, VOCAB_PAD)[..., :VOCAB_SIZE]


# ----------------------------- main -------------------------------------------
if __name__ == "__main__":
    key = jax.random.PRNGKey(0)
    k_param, k_mem, k_tgt = jax.random.split(key, 3)

    B, T_TGT, S_MEM = 2, 8, 16
    params = init_params(k_param)

    memory = jax.random.normal(k_mem, (B, S_MEM, D_MODEL), dtype=jnp.float32)
    # target token ids in [1, VOCAB) so position 0 is never pad, then pad the tail
    tgt = jax.random.randint(k_tgt, (B, T_TGT), 1, VOCAB_SIZE, dtype=jnp.int32)
    tgt = tgt.at[:, -2:].set(PAD_IDX)

    logits = jax.block_until_ready(text_decoder_forward(memory, tgt, params))

    assert logits.shape == (B, T_TGT, VOCAB_SIZE)
    assert bool(jnp.all(jnp.isfinite(logits)))
    print("KERNEL_OK")
</pallas_src>

<mosaic_0001>
module attributes {stable_mosaic.version = 11 : i64} {
  func.func @fused_decoder_kernel(%arg0: memref<16x128xf32, #tpu.memory_space<vmem>>, %arg1: memref<32x128xf32, #tpu.memory_space<vmem>>, %arg2: memref<16x128xf32, #tpu.memory_space<vmem>>, %arg3: memref<16x256xf32, #tpu.memory_space<vmem>>, %arg4: memref<128x128xbf16, #tpu.memory_space<vmem>>, %arg5: memref<256x128xbf16, #tpu.memory_space<vmem>>, %arg6: memref<2x128x384xbf16, #tpu.memory_space<vmem>>, %arg7: memref<2x1x384xf32, #tpu.memory_space<vmem>>, %arg8: memref<2x128x128xbf16, #tpu.memory_space<vmem>>, %arg9: memref<2x1x128xf32, #tpu.memory_space<vmem>>, %arg10: memref<2x128x128xbf16, #tpu.memory_space<vmem>>, %arg11: memref<2x1x128xf32, #tpu.memory_space<vmem>>, %arg12: memref<128x512xbf16, #tpu.memory_space<vmem>>, %arg13: memref<1x512xf32, #tpu.memory_space<vmem>>, %arg14: memref<2x128x128xbf16, #tpu.memory_space<vmem>>, %arg15: memref<2x1x128xf32, #tpu.memory_space<vmem>>, %arg16: memref<2x128x256xbf16, #tpu.memory_space<vmem>>, %arg17: memref<2x1x256xf32, #tpu.memory_space<vmem>>, %arg18: memref<2x256x128xbf16, #tpu.memory_space<vmem>>, %arg19: memref<2x1x128xf32, #tpu.memory_space<vmem>>, %arg20: memref<2x3x128xf32, #tpu.memory_space<vmem>>, %arg21: memref<2x3x128xf32, #tpu.memory_space<vmem>>, %arg22: memref<128x128xbf16, #tpu.memory_space<vmem>>, %arg23: memref<1x128xf32, #tpu.memory_space<vmem>>, %arg24: memref<16x128xf32, #tpu.memory_space<vmem>>) attributes {dimension_semantics = [], scalar_prefetch = 0 : i64, scratch_operands = 0 : i64, tpu.core_type = #tpu.core_type<tc>} {
    %c0 = arith.constant 0 : index
    %c0_0 = arith.constant 0 : index
    %0 = vector.load %arg0[%c0, %c0_0] : memref<16x128xf32, #tpu.memory_space<vmem>>, vector<16x128xf32>
    %c0_1 = arith.constant 0 : index
    %c0_2 = arith.constant 0 : index
    %1 = vector.load %arg2[%c0_1, %c0_2] : memref<16x128xf32, #tpu.memory_space<vmem>>, vector<16x128xf32>
    %c0_3 = arith.constant 0 : index
    %c0_4 = arith.constant 0 : index
    %2 = vector.load %arg3[%c0_3, %c0_4] : memref<16x256xf32, #tpu.memory_space<vmem>>, vector<16x256xf32>
    %c0_5 = arith.constant 0 : index
    %c0_6 = arith.constant 0 : index
    %3 = vector.load %arg4[%c0_5, %c0_6] : memref<128x128xbf16, #tpu.memory_space<vmem>>, vector<128x128xbf16>
    %c0_7 = arith.constant 0 : index
    %c0_8 = arith.constant 0 : index
    %4 = vector.load %arg5[%c0_7, %c0_8] : memref<256x128xbf16, #tpu.memory_space<vmem>>, vector<256x128xbf16>
    %c0_9 = arith.constant 0 : index
    %c0_10 = arith.constant 0 : index
    %5 = vector.load %arg1[%c0_9, %c0_10] : memref<32x128xf32, #tpu.memory_space<vmem>>, vector<32x128xf32>
    %6 = arith.truncf %5 : vector<32x128xf32> to vector<32x128xbf16>
    %c0_11 = arith.constant 0 : index
    %c0_12 = arith.constant 0 : index
    %7 = vector.load %arg12[%c0_11, %c0_12] : memref<128x512xbf16, #tpu.memory_space<vmem>>, vector<128x512xbf16>
    %cst = arith.constant dense<0.000000e+00> : vector<32x512xf32>
    %8 = tpu.matmul %6, %7, %cst {dimension_numbers = #tpu.dot_dimension_numbers<[1], [0], [0], [1], [0, 0, 1, 1], [], []>} : vector<32x128xbf16>, vector<128x512xbf16>, vector<32x512xf32> -> vector<32x512xf32>
    %c0_13 = arith.constant 0 : index
    %c0_14 = arith.constant 0 : index
    %9 = vector.load %arg13[%c0_13, %c0_14] : memref<1x512xf32, #tpu.memory_space<vmem>>, vector<1x512xf32>
    %10 = vector.broadcast %9 : vector<1x512xf32> to vector<32x512xf32>
    %11 = arith.addf %8, %10 : vector<32x512xf32>
    %12 = arith.truncf %11 : vector<32x512xf32> to vector<32x512xbf16>
    %c0_15 = arith.constant 0 : index
    %c0_16 = arith.constant 0 : index
    %c0_17 = arith.constant 0 : index
    %13 = vector.load %arg20[%c0_15, %c0_16, %c0_17] : memref<2x3x128xf32, #tpu.memory_space<vmem>>, vector<1x3x128xf32>
    %14 = vector.shape_cast %13 : vector<1x3x128xf32> to vector<3x128xf32>
    %c0_18 = arith.constant 0 : index
    %c0_19 = arith.constant 0 : index
    %c0_20 = arith.constant 0 : index
    %15 = vector.load %arg21[%c0_18, %c0_19, %c0_20] : memref<2x3x128xf32, #tpu.memory_space<vmem>>, vector<1x3x128xf32>
    %16 = vector.shape_cast %15 : vector<1x3x128xf32> to vector<3x128xf32>
    %17 = arith.truncf %0 : vector<16x128xf32> to vector<16x128xbf16>
    %c0_21 = arith.constant 0 : index
    %c0_22 = arith.constant 0 : index
    %c0_23 = arith.constant 0 : index
    %18 = vector.load %arg6[%c0_21, %c0_22, %c0_23] : memref<2x128x384xbf16, #tpu.memory_space<vmem>>, vector<1x128x384xbf16>
    %19 = vector.shape_cast %18 : vector<1x128x384xbf16> to vector<128x384xbf16>
    %cst_24 = arith.constant dense<0.000000e+00> : vector<16x384xf32>
    %20 = tpu.matmul %17, %19, %cst_24 {dimension_numbers = #tpu.dot_dimension_numbers<[1], [0], [0], [1], [0, 0, 1, 1], [], []>} : vector<16x128xbf16>, vector<128x384xbf16>, vector<16x384xf32> -> vector<16x384xf32>
    %c0_25 = arith.constant 0 : index
    %c0_26 = arith.constant 0 : index
    %c0_27 = arith.constant 0 : index
    %21 = vector.load %arg7[%c0_25, %c0_26, %c0_27] : memref<2x1x384xf32, #tpu.memory_space<vmem>>, vector<1x1x384xf32>
    %22 = vector.shape_cast %21 : vector<1x1x384xf32> to vector<1x384xf32>
    %23 = vector.broadcast %22 : vector<1x384xf32> to vector<16x384xf32>
    %24 = arith.addf %20, %23 : vector<16x384xf32>
    %25 = arith.truncf %24 : vector<16x384xf32> to vector<16x384xbf16>
    %26 = vector.extract_strided_slice %25 {offsets = [0, 0], sizes = [16, 128], strides = [1, 1]} : vector<16x384xbf16> to vector<16x128xbf16>
    %27 = vector.extract_strided_slice %25 {offsets = [0, 128], sizes = [16, 128], strides = [1, 1]} : vector<16x384xbf16> to vector<16x128xbf16>
    %28 = vector.extract_strided_slice %25 {offsets = [0, 256], sizes = [16, 128], strides = [1, 1]} : vector<16x384xbf16> to vector<16x128xbf16>
    %29 = tpu.concatenate %27, %27, %27, %27, %27, %27, %27, %27 in 0 : vector<16x128xbf16>, vector<16x128xbf16>, vector<16x128xbf16>, vector<16x128xbf16>, vector<16x128xbf16>, vector<16x128xbf16>, vector<16x128xbf16>, vector<16x128xbf16> -> vector<128x128xbf16>
    %30 = arith.mulf %29, %3 : vector<128x128xbf16>
    %31 = tpu.concatenate %28, %28, %28, %28, %28, %28, %28, %28 in 0 : vector<16x128xbf16>, vector<16x128xbf16>, vector<16x128xbf16>, vector<16x128xbf16>, vector<16x128xbf16>, vector<16x128xbf16>, vector<16x128xbf16>, vector<16x128xbf16> -> vector<128x128xbf16>
    %32 = arith.mulf %31, %3 : vector<128x128xbf16>
    %cst_28 = arith.constant dense<0.000000e+00> : vector<16x128xf32>
    %33 = tpu.matmul %26, %30, %cst_28 {dimension_numbers = #tpu.dot_dimension_numbers<[1], [1], [0], [0], [0, 0, 1, 0], [], []>} : vector<16x128xbf16>, vector<128x128xbf16>, vector<16x128xf32> -> vector<16x128xf32>
    %34 = arith.addf %33, %1 : vector<16x128xf32>
    %cst_29 = arith.constant dense<0xFF800000> : vector<16xf32>
    %35 = vector.multi_reduction <maximumf>, %34, %cst_29 [1] : vector<16x128xf32> to vector<16xf32>
    %36 = vector.shape_cast %35 : vector<16xf32> to vector<16x1xf32>
    %37 = vector.broadcast %36 : vector<16x1xf32> to vector<16x128xf32>
    %38 = arith.subf %34, %37 : vector<16x128xf32>
    %39 = math.exp %38 : vector<16x128xf32>
    %40 = arith.truncf %39 : vector<16x128xf32> to vector<16x128xbf16>
    %cst_30 = arith.constant dense<0.000000e+00> : vector<16x128xf32>
    %41 = tpu.matmul %40, %32, %cst_30 {dimension_numbers = #tpu.dot_dimension_numbers<[1], [0], [0], [1], [0, 0, 1, 1], [], []>} : vector<16x128xbf16>, vector<128x128xbf16>, vector<16x128xf32> -> vector<16x128xf32>
    %cst_31 = arith.constant dense<0.000000e+00> : vector<16x128xf32>
    %42 = tpu.matmul %40, %3, %cst_31 {dimension_numbers = #tpu.dot_dimension_numbers<[1], [0], [0], [1], [0, 0, 1, 1], [], []>} : vector<16x128xbf16>, vector<128x128xbf16>, vector<16x128xf32> -> vector<16x128xf32>
    %cst_32 = arith.constant 1.000000e-30 : f32
    %43 = vector.broadcast %cst_32 : f32 to vector<16x128xf32>
    %44 = arith.maximumf %42, %43 : vector<16x128xf32>
    %45 = tpu.reciprocal %44 {approx = true} : vector<16x128xf32> -> vector<16x128xf32>
    %46 = arith.mulf %41, %45 : vector<16x128xf32>
    %47 = arith.truncf %46 : vector<16x128xf32> to vector<16x128xbf16>
    %c0_33 = arith.constant 0 : index
    %c0_34 = arith.constant 0 : index
    %c0_35 = arith.constant 0 : index
    %48 = vector.load %arg8[%c0_33, %c0_34, %c0_35] : memref<2x128x128xbf16, #tpu.memory_space<vmem>>, vector<1x128x128xbf16>
    %49 = vector.shape_cast %48 : vector<1x128x128xbf16> to vector<128x128xbf16>
    %cst_36 = arith.constant dense<0.000000e+00> : vector<16x128xf32>
    %50 = tpu.matmul %47, %49, %cst_36 {dimension_numbers = #tpu.dot_dimension_numbers<[1], [0], [0], [1], [0, 0, 1, 1], [], []>} : vector<16x128xbf16>, vector<128x128xbf16>, vector<16x128xf32> -> vector<16x128xf32>
    %c0_37 = arith.constant 0 : index
    %c0_38 = arith.constant 0 : index
    %c0_39 = arith.constant 0 : index
    %51 = vector.load %arg9[%c0_37, %c0_38, %c0_39] : memref<2x1x128xf32, #tpu.memory_space<vmem>>, vector<1x1x128xf32>
    %52 = vector.shape_cast %51 : vector<1x1x128xf32> to vector<1x128xf32>
    %53 = vector.broadcast %52 : vector<1x128xf32> to vector<16x128xf32>
    %54 = arith.addf %50, %53 : vector<16x128xf32>
    %55 = arith.addf %0, %54 : vector<16x128xf32>
    %56 = vector.extract_strided_slice %14 {offsets = [0, 0], sizes = [1, 128], strides = [1, 1]} : vector<3x128xf32> to vector<1x128xf32>
    %57 = vector.extract_strided_slice %16 {offsets = [0, 0], sizes = [1, 128], strides = [1, 1]} : vector<3x128xf32> to vector<1x128xf32>
    %cst_40 = arith.constant dense<0.000000e+00> : vector<16xf32>
    %58 = vector.multi_reduction <add>, %55, %cst_40 [1] : vector<16x128xf32> to vector<16xf32>
    %59 = vector.shape_cast %58 : vector<16xf32> to vector<16x1xf32>
    %cst_41 = arith.constant 1.280000e+02 : f32
    %60 = vector.broadcast %cst_41 : f32 to vector<16x1xf32>
    %61 = arith.divf %59, %60 : vector<16x1xf32>
    %62 = vector.broadcast %61 : vector<16x1xf32> to vector<16x128xf32>
    %63 = arith.subf %55, %62 : vector<16x128xf32>
    %64 = arith.mulf %63, %63 : vector<16x128xf32>
    %cst_42 = arith.constant dense<0.000000e+00> : vector<16xf32>
    %65 = vector.multi_reduction <add>, %64, %cst_42 [1] : vector<16x128xf32> to vector<16xf32>
    %66 = vector.shape_cast %65 : vector<16xf32> to vector<16x1xf32>
    %cst_43 = arith.constant 1.280000e+02 : f32
    %67 = vector.broadcast %cst_43 : f32 to vector<16x1xf32>
    %68 = arith.divf %66, %67 : vector<16x1xf32>
    %cst_44 = arith.constant 9.99999974E-6 : f32
    %69 = vector.broadcast %cst_44 : f32 to vector<16x1xf32>
    %70 = arith.addf %68, %69 : vector<16x1xf32>
    %71 = math.rsqrt %70 : vector<16x1xf32>
    %72 = vector.broadcast %71 : vector<16x1xf32> to vector<16x128xf32>
    %73 = arith.mulf %63, %72 : vector<16x128xf32>
    %74 = vector.broadcast %56 : vector<1x128xf32> to vector<16x128xf32>
    %75 = arith.mulf %73, %74 : vector<16x128xf32>
    %76 = vector.broadcast %57 : vector<1x128xf32> to vector<16x128xf32>
    %77 = arith.addf %75, %76 : vector<16x128xf32>
    %78 = arith.truncf %77 : vector<16x128xf32> to vector<16x128xbf16>
    %c0_45 = arith.constant 0 : index
    %c0_46 = arith.constant 0 : index
    %c0_47 = arith.constant 0 : index
    %79 = vector.load %arg10[%c0_45, %c0_46, %c0_47] : memref<2x128x128xbf16, #tpu.memory_space<vmem>>, vector<1x128x128xbf16>
    %80 = vector.shape_cast %79 : vector<1x128x128xbf16> to vector<128x128xbf16>
    %cst_48 = arith.constant dense<0.000000e+00> : vector<16x128xf32>
    %81 = tpu.matmul %78, %80, %cst_48 {dimension_numbers = #tpu.dot_dimension_numbers<[1], [0], [0], [1], [0, 0, 1, 1], [], []>} : vector<16x128xbf16>, vector<128x128xbf16>, vector<16x128xf32> -> vector<16x128xf32>
    %c0_49 = arith.constant 0 : index
    %c0_50 = arith.constant 0 : index
    %c0_51 = arith.constant 0 : index
    %82 = vector.load %arg11[%c0_49, %c0_50, %c0_51] : memref<2x1x128xf32, #tpu.memory_space<vmem>>, vector<1x1x128xf32>
    %83 = vector.shape_cast %82 : vector<1x1x128xf32> to vector<1x128xf32>
    %84 = vector.broadcast %83 : vector<1x128xf32> to vector<16x128xf32>
    %85 = arith.addf %81, %84 : vector<16x128xf32>
    %86 = arith.truncf %85 : vector<16x128xf32> to vector<16x128xbf16>
    %87 = vector.extract_strided_slice %12 {offsets = [0, 0], sizes = [32, 128], strides = [1, 1]} : vector<32x512xbf16> to vector<32x128xbf16>
    %88 = vector.extract_strided_slice %12 {offsets = [0, 128], sizes = [32, 128], strides = [1, 1]} : vector<32x512xbf16> to vector<32x128xbf16>
    %89 = tpu.concatenate %87, %87, %87, %87, %87, %87, %87, %87 in 0 : vector<32x128xbf16>, vector<32x128xbf16>, vector<32x128xbf16>, vector<32x128xbf16>, vector<32x128xbf16>, vector<32x128xbf16>, vector<32x128xbf16>, vector<32x128xbf16> -> vector<256x128xbf16>
    %90 = arith.mulf %89, %4 : vector<256x128xbf16>
    %91 = tpu.concatenate %88, %88, %88, %88, %88, %88, %88, %88 in 0 : vector<32x128xbf16>, vector<32x128xbf16>, vector<32x128xbf16>, vector<32x128xbf16>, vector<32x128xbf16>, vector<32x128xbf16>, vector<32x128xbf16>, vector<32x128xbf16> -> vector<256x128xbf16>
    %92 = arith.mulf %91, %4 : vector<256x128xbf16>
    %cst_52 = arith.constant dense<0.000000e+00> : vector<16x256xf32>
    %93 = tpu.matmul %86, %90, %cst_52 {dimension_numbers = #tpu.dot_dimension_numbers<[1], [1], [0], [0], [0, 0, 1, 0], [], []>} : vector<16x128xbf16>, vector<256x128xbf16>, vector<16x256xf32> -> vector<16x256xf32>
    %94 = arith.addf %93, %2 : vector<16x256xf32>
    %cst_53 = arith.constant dense<0xFF800000> : vector<16xf32>
    %95 = vector.multi_reduction <maximumf>, %94, %cst_53 [1] : vector<16x256xf32> to vector<16xf32>
    %96 = vector.shape_cast %95 : vector<16xf32> to vector<16x1xf32>
    %97 = vector.broadcast %96 : vector<16x1xf32> to vector<16x256xf32>
    %98 = arith.subf %94, %97 : vector<16x256xf32>
    %99 = math.exp %98 : vector<16x256xf32>
    %100 = arith.truncf %99 : vector<16x256xf32> to vector<16x256xbf16>
    %cst_54 = arith.constant dense<0.000000e+00> : vector<16x128xf32>
    %101 = tpu.matmul %100, %92, %cst_54 {dimension_numbers = #tpu.dot_dimension_numbers<[1], [0], [0], [1], [0, 0, 1, 1], [], []>} : vector<16x256xbf16>, vector<256x128xbf16>, vector<16x128xf32> -> vector<16x128xf32>
    %cst_55 = arith.constant dense<0.000000e+00> : vector<16x128xf32>
    %102 = tpu.matmul %100, %4, %cst_55 {dimension_numbers = #tpu.dot_dimension_numbers<[1], [0], [0], [1], [0, 0, 1, 1], [], []>} : vector<16x256xbf16>, vector<256x128xbf16>, vector<16x128xf32> -> vector<16x128xf32>
    %cst_56 = arith.constant 1.000000e-30 : f32
    %103 = vector.broadcast %cst_56 : f32 to vector<16x128xf32>
    %104 = arith.maximumf %102, %103 : vector<16x128xf32>
    %105 = tpu.reciprocal %104 {approx = true} : vector<16x128xf32> -> vector<16x128xf32>
    %106 = arith.mulf %101, %105 : vector<16x128xf32>
    %107 = arith.truncf %106 : vector<16x128xf32> to vector<16x128xbf16>
    %c0_57 = arith.constant 0 : index
    %c0_58 = arith.constant 0 : index
    %c0_59 = arith.constant 0 : index
    %108 = vector.load %arg14[%c0_57, %c0_58, %c0_59] : memref<2x128x128xbf16, #tpu.memory_space<vmem>>, vector<1x128x128xbf16>
    %109 = vector.shape_cast %108 : vector<1x128x128xbf16> to vector<128x128xbf16>
    %cst_60 = arith.constant dense<0.000000e+00> : vector<16x128xf32>
    %110 = tpu.matmul %107, %109, %cst_60 {dimension_numbers = #tpu.dot_dimension_numbers<[1], [0], [0], [1], [0, 0, 1, 1], [], []>} : vector<16x128xbf16>, vector<128x128xbf16>, vector<16x128xf32> -> vector<16x128xf32>
    %c0_61 = arith.constant 0 : index
    %c0_62 = arith.constant 0 : index
    %c0_63 = arith.constant 0 : index
    %111 = vector.load %arg15[%c0_61, %c0_62, %c0_63] : memref<2x1x128xf32, #tpu.memory_space<vmem>>, vector<1x1x128xf32>
    %112 = vector.shape_cast %111 : vector<1x1x128xf32> to vector<1x128xf32>
    %113 = vector.broadcast %112 : vector<1x128xf32> to vector<16x128xf32>
    %114 = arith.addf %110, %113 : vector<16x128xf32>
    %115 = arith.addf %77, %114 : vector<16x128xf32>
    %116 = vector.extract_strided_slice %14 {offsets = [1, 0], sizes = [1, 128], strides = [1, 1]} : vector<3x128xf32> to vector<1x128xf32>
    %117 = vector.extract_strided_slice %16 {offsets = [1, 0], sizes = [1, 128], strides = [1, 1]} : vector<3x128xf32> to vector<1x128xf32>
    %cst_64 = arith.constant dense<0.000000e+00> : vector<16xf32>
    %118 = vector.multi_reduction <add>, %115, %cst_64 [1] : vector<16x128xf32> to vector<16xf32>
    %119 = vector.shape_cast %118 : vector<16xf32> to vector<16x1xf32>
    %cst_65 = arith.constant 1.280000e+02 : f32
    %120 = vector.broadcast %cst_65 : f32 to vector<16x1xf32>
    %121 = arith.divf %119, %120 : vector<16x1xf32>
    %122 = vector.broadcast %121 : vector<16x1xf32> to vector<16x128xf32>
    %123 = arith.subf %115, %122 : vector<16x128xf32>
    %124 = arith.mulf %123, %123 : vector<16x128xf32>
    %cst_66 = arith.constant dense<0.000000e+00> : vector<16xf32>
    %125 = vector.multi_reduction <add>, %124, %cst_66 [1] : vector<16x128xf32> to vector<16xf32>
    %126 = vector.shape_cast %125 : vector<16xf32> to vector<16x1xf32>
    %cst_67 = arith.constant 1.280000e+02 : f32
    %127 = vector.broadcast %cst_67 : f32 to vector<16x1xf32>
    %128 = arith.divf %126, %127 : vector<16x1xf32>
    %cst_68 = arith.constant 9.99999974E-6 : f32
    %129 = vector.broadcast %cst_68 : f32 to vector<16x1xf32>
    %130 = arith.addf %128, %129 : vector<16x1xf32>
    %131 = math.rsqrt %130 : vector<16x1xf32>
    %132 = vector.broadcast %131 : vector<16x1xf32> to vector<16x128xf32>
    %133 = arith.mulf %123, %132 : vector<16x128xf32>
    %134 = vector.broadcast %116 : vector<1x128xf32> to vector<16x128xf32>
    %135 = arith.mulf %133, %134 : vector<16x128xf32>
    %136 = vector.broadcast %117 : vector<1x128xf32> to vector<16x128xf32>
    %137 = arith.addf %135, %136 : vector<16x128xf32>
    %138 = arith.truncf %137 : vector<16x128xf32> to vector<16x128xbf16>
    %c0_69 = arith.constant 0 : index
    %c0_70 = arith.constant 0 : index
    %c0_71 = arith.constant 0 : index
    %139 = vector.load %arg16[%c0_69, %c0_70, %c0_71] : memref<2x128x256xbf16, #tpu.memory_space<vmem>>, vector<1x128x256xbf16>
    %140 = vector.shape_cast %139 : vector<1x128x256xbf16> to vector<128x256xbf16>
    %cst_72 = arith.constant dense<0.000000e+00> : vector<16x256xf32>
    %141 = tpu.matmul %138, %140, %cst_72 {dimension_numbers = #tpu.dot_dimension_numbers<[1], [0], [0], [1], [0, 0, 1, 1], [], []>} : vector<16x128xbf16>, vector<128x256xbf16>, vector<16x256xf32> -> vector<16x256xf32>
    %c0_73 = arith.constant 0 : index
    %c0_74 = arith.constant 0 : index
    %c0_75 = arith.constant 0 : index
    %142 = vector.load %arg17[%c0_73, %c0_74, %c0_75] : memref<2x1x256xf32, #tpu.memory_space<vmem>>, vector<1x1x256xf32>
    %143 = vector.shape_cast %142 : vector<1x1x256xf32> to vector<1x256xf32>
    %144 = vector.broadcast %143 : vector<1x256xf32> to vector<16x256xf32>
    %145 = arith.addf %141, %144 : vector<16x256xf32>
    %cst_76 = arith.constant 0.000000e+00 : f32
    %146 = vector.broadcast %cst_76 : f32 to vector<16x256xf32>
    %147 = arith.maximumf %145, %146 : vector<16x256xf32>
    %148 = arith.truncf %147 : vector<16x256xf32> to vector<16x256xbf16>
    %c0_77 = arith.constant 0 : index
    %c0_78 = arith.constant 0 : index
    %c0_79 = arith.constant 0 : index
    %149 = vector.load %arg18[%c0_77, %c0_78, %c0_79] : memref<2x256x128xbf16, #tpu.memory_space<vmem>>, vector<1x256x128xbf16>
    %150 = vector.shape_cast %149 : vector<1x256x128xbf16> to vector<256x128xbf16>
    %cst_80 = arith.constant dense<0.000000e+00> : vector<16x128xf32>
    %151 = tpu.matmul %148, %150, %cst_80 {dimension_numbers = #tpu.dot_dimension_numbers<[1], [0], [0], [1], [0, 0, 1, 1], [], []>} : vector<16x256xbf16>, vector<256x128xbf16>, vector<16x128xf32> -> vector<16x128xf32>
    %c0_81 = arith.constant 0 : index
    %c0_82 = arith.constant 0 : index
    %c0_83 = arith.constant 0 : index
    %152 = vector.load %arg19[%c0_81, %c0_82, %c0_83] : memref<2x1x128xf32, #tpu.memory_space<vmem>>, vector<1x1x128xf32>
    %153 = vector.shape_cast %152 : vector<1x1x128xf32> to vector<1x128xf32>
    %154 = vector.broadcast %153 : vector<1x128xf32> to vector<16x128xf32>
    %155 = arith.addf %151, %154 : vector<16x128xf32>
    %156 = arith.addf %137, %155 : vector<16x128xf32>
    %157 = vector.extract_strided_slice %14 {offsets = [2, 0], sizes = [1, 128], strides = [1, 1]} : vector<3x128xf32> to vector<1x128xf32>
    %158 = vector.extract_strided_slice %16 {offsets = [2, 0], sizes = [1, 128], strides = [1, 1]} : vector<3x128xf32> to vector<1x128xf32>
    %cst_84 = arith.constant dense<0.000000e+00> : vector<16xf32>
    %159 = vector.multi_reduction <add>, %156, %cst_84 [1] : vector<16x128xf32> to vector<16xf32>
    %160 = vector.shape_cast %159 : vector<16xf32> to vector<16x1xf32>
    %cst_85 = arith.constant 1.280000e+02 : f32
    %161 = vector.broadcast %cst_85 : f32 to vector<16x1xf32>
    %162 = arith.divf %160, %161 : vector<16x1xf32>
    %163 = vector.broadcast %162 : vector<16x1xf32> to vector<16x128xf32>
    %164 = arith.subf %156, %163 : vector<16x128xf32>
    %165 = arith.mulf %164, %164 : vector<16x128xf32>
    %cst_86 = arith.constant dense<0.000000e+00> : vector<16xf32>
    %166 = vector.multi_reduction <add>, %165, %cst_86 [1] : vector<16x128xf32> to vector<16xf32>
    %167 = vector.shape_cast %166 : vector<16xf32> to vector<16x1xf32>
    %cst_87 = arith.constant 1.280000e+02 : f32
    %168 = vector.broadcast %cst_87 : f32 to vector<16x1xf32>
    %169 = arith.divf %167, %168 : vector<16x1xf32>
    %cst_88 = arith.constant 9.99999974E-6 : f32
    %170 = vector.broadcast %cst_88 : f32 to vector<16x1xf32>
    %171 = arith.addf %169, %170 : vector<16x1xf32>
    %172 = math.rsqrt %171 : vector<16x1xf32>
    %173 = vector.broadcast %172 : vector<16x1xf32> to vector<16x128xf32>
    %174 = arith.mulf %164, %173 : vector<16x128xf32>
    %175 = vector.broadcast %157 : vector<1x128xf32> to vector<16x128xf32>
    %176 = arith.mulf %174, %175 : vector<16x128xf32>
    %177 = vector.broadcast %158 : vector<1x128xf32> to vector<16x128xf32>
    %178 = arith.addf %176, %177 : vector<16x128xf32>
    %c1 = arith.constant 1 : index
    %c0_89 = arith.constant 0 : index
    %c0_90 = arith.constant 0 : index
    %179 = vector.load %arg20[%c1, %c0_89, %c0_90] : memref<2x3x128xf32, #tpu.memory_space<vmem>>, vector<1x3x128xf32>
    %180 = vector.shape_cast %179 : vector<1x3x128xf32> to vector<3x128xf32>
    %c1_91 = arith.constant 1 : index
    %c0_92 = arith.constant 0 : index
    %c0_93 = arith.constant 0 : index
    %181 = vector.load %arg21[%c1_91, %c0_92, %c0_93] : memref<2x3x128xf32, #tpu.memory_space<vmem>>, vector<1x3x128xf32>
    %182 = vector.shape_cast %181 : vector<1x3x128xf32> to vector<3x128xf32>
    %183 = arith.truncf %178 : vector<16x128xf32> to vector<16x128xbf16>
    %c1_94 = arith.constant 1 : index
    %c0_95 = arith.constant 0 : index
    %c0_96 = arith.constant 0 : index
    %184 = vector.load %arg6[%c1_94, %c0_95, %c0_96] : memref<2x128x384xbf16, #tpu.memory_space<vmem>>, vector<1x128x384xbf16>
    %185 = vector.shape_cast %184 : vector<1x128x384xbf16> to vector<128x384xbf16>
    %cst_97 = arith.constant dense<0.000000e+00> : vector<16x384xf32>
    %186 = tpu.matmul %183, %185, %cst_97 {dimension_numbers = #tpu.dot_dimension_numbers<[1], [0], [0], [1], [0, 0, 1, 1], [], []>} : vector<16x128xbf16>, vector<128x384xbf16>, vector<16x384xf32> -> vector<16x384xf32>
    %c1_98 = arith.constant 1 : index
    %c0_99 = arith.constant 0 : index
    %c0_100 = arith.constant 0 : index
    %187 = vector.load %arg7[%c1_98, %c0_99, %c0_100] : memref<2x1x384xf32, #tpu.memory_space<vmem>>, vector<1x1x384xf32>
    %188 = vector.shape_cast %187 : vector<1x1x384xf32> to vector<1x384xf32>
    %189 = vector.broadcast %188 : vector<1x384xf32> to vector<16x384xf32>
    %190 = arith.addf %186, %189 : vector<16x384xf32>
    %191 = arith.truncf %190 : vector<16x384xf32> to vector<16x384xbf16>
    %192 = vector.extract_strided_slice %191 {offsets = [0, 0], sizes = [16, 128], strides = [1, 1]} : vector<16x384xbf16> to vector<16x128xbf16>
    %193 = vector.extract_strided_slice %191 {offsets = [0, 128], sizes = [16, 128], strides = [1, 1]} : vector<16x384xbf16> to vector<16x128xbf16>
    %194 = vector.extract_strided_slice %191 {offsets = [0, 256], sizes = [16, 128], strides = [1, 1]} : vector<16x384xbf16> to vector<16x128xbf16>
    %195 = tpu.concatenate %193, %193, %193, %193, %193, %193, %193, %193 in 0 : vector<16x128xbf16>, vector<16x128xbf16>, vector<16x128xbf16>, vector<16x128xbf16>, vector<16x128xbf16>, vector<16x128xbf16>, vector<16x128xbf16>, vector<16x128xbf16> -> vector<128x128xbf16>
    %196 = arith.mulf %195, %3 : vector<128x128xbf16>
    %197 = tpu.concatenate %194, %194, %194, %194, %194, %194, %194, %194 in 0 : vector<16x128xbf16>, vector<16x128xbf16>, vector<16x128xbf16>, vector<16x128xbf16>, vector<16x128xbf16>, vector<16x128xbf16>, vector<16x128xbf16>, vector<16x128xbf16> -> vector<128x128xbf16>
    %198 = arith.mulf %197, %3 : vector<128x128xbf16>
    %cst_101 = arith.constant dense<0.000000e+00> : vector<16x128xf32>
    %199 = tpu.matmul %192, %196, %cst_101 {dimension_numbers = #tpu.dot_dimension_numbers<[1], [1], [0], [0], [0, 0, 1, 0], [], []>} : vector<16x128xbf16>, vector<128x128xbf16>, vector<16x128xf32> -> vector<16x128xf32>
    %200 = arith.addf %199, %1 : vector<16x128xf32>
    %cst_102 = arith.constant dense<0xFF800000> : vector<16xf32>
    %201 = vector.multi_reduction <maximumf>, %200, %cst_102 [1] : vector<16x128xf32> to vector<16xf32>
    %202 = vector.shape_cast %201 : vector<16xf32> to vector<16x1xf32>
    %203 = vector.broadcast %202 : vector<16x1xf32> to vector<16x128xf32>
    %204 = arith.subf %200, %203 : vector<16x128xf32>
    %205 = math.exp %204 : vector<16x128xf32>
    %206 = arith.truncf %205 : vector<16x128xf32> to vector<16x128xbf16>
    %cst_103 = arith.constant dense<0.000000e+00> : vector<16x128xf32>
    %207 = tpu.matmul %206, %198, %cst_103 {dimension_numbers = #tpu.dot_dimension_numbers<[1], [0], [0], [1], [0, 0, 1, 1], [], []>} : vector<16x128xbf16>, vector<128x128xbf16>, vector<16x128xf32> -> vector<16x128xf32>
    %cst_104 = arith.constant dense<0.000000e+00> : vector<16x128xf32>
    %208 = tpu.matmul %206, %3, %cst_104 {dimension_numbers = #tpu.dot_dimension_numbers<[1], [0], [0], [1], [0, 0, 1, 1], [], []>} : vector<16x128xbf16>, vector<128x128xbf16>, vector<16x128xf32> -> vector<16x128xf32>
    %cst_105 = arith.constant 1.000000e-30 : f32
    %209 = vector.broadcast %cst_105 : f32 to vector<16x128xf32>
    %210 = arith.maximumf %208, %209 : vector<16x128xf32>
    %211 = tpu.reciprocal %210 {approx = true} : vector<16x128xf32> -> vector<16x128xf32>
    %212 = arith.mulf %207, %211 : vector<16x128xf32>
    %213 = arith.truncf %212 : vector<16x128xf32> to vector<16x128xbf16>
    %c1_106 = arith.constant 1 : index
    %c0_107 = arith.constant 0 : index
    %c0_108 = arith.constant 0 : index
    %214 = vector.load %arg8[%c1_106, %c0_107, %c0_108] : memref<2x128x128xbf16, #tpu.memory_space<vmem>>, vector<1x128x128xbf16>
    %215 = vector.shape_cast %214 : vector<1x128x128xbf16> to vector<128x128xbf16>
    %cst_109 = arith.constant dense<0.000000e+00> : vector<16x128xf32>
    %216 = tpu.matmul %213, %215, %cst_109 {dimension_numbers = #tpu.dot_dimension_numbers<[1], [0], [0], [1], [0, 0, 1, 1], [], []>} : vector<16x128xbf16>, vector<128x128xbf16>, vector<16x128xf32> -> vector<16x128xf32>
    %c1_110 = arith.constant 1 : index
    %c0_111 = arith.constant 0 : index
    %c0_112 = arith.constant 0 : index
    %217 = vector.load %arg9[%c1_110, %c0_111, %c0_112] : memref<2x1x128xf32, #tpu.memory_space<vmem>>, vector<1x1x128xf32>
    %218 = vector.shape_cast %217 : vector<1x1x128xf32> to vector<1x128xf32>
    %219 = vector.broadcast %218 : vector<1x128xf32> to vector<16x128xf32>
    %220 = arith.addf %216, %219 : vector<16x128xf32>
    %221 = arith.addf %178, %220 : vector<16x128xf32>
    %222 = vector.extract_strided_slice %180 {offsets = [0, 0], sizes = [1, 128], strides = [1, 1]} : vector<3x128xf32> to vector<1x128xf32>
    %223 = vector.extract_strided_slice %182 {offsets = [0, 0], sizes = [1, 128], strides = [1, 1]} : vector<3x128xf32> to vector<1x128xf32>
    %cst_113 = arith.constant dense<0.000000e+00> : vector<16xf32>
    %224 = vector.multi_reduction <add>, %221, %cst_113 [1] : vector<16x128xf32> to vector<16xf32>
    %225 = vector.shape_cast %224 : vector<16xf32> to vector<16x1xf32>
    %cst_114 = arith.constant 1.280000e+02 : f32
    %226 = vector.broadcast %cst_114 : f32 to vector<16x1xf32>
    %227 = arith.divf %225, %226 : vector<16x1xf32>
    %228 = vector.broadcast %227 : vector<16x1xf32> to vector<16x128xf32>
    %229 = arith.subf %221, %228 : vector<16x128xf32>
    %230 = arith.mulf %229, %229 : vector<16x128xf32>
    %cst_115 = arith.constant dense<0.000000e+00> : vector<16xf32>
    %231 = vector.multi_reduction <add>, %230, %cst_115 [1] : vector<16x128xf32> to vector<16xf32>
    %232 = vector.shape_cast %231 : vector<16xf32> to vector<16x1xf32>
    %cst_116 = arith.constant 1.280000e+02 : f32
    %233 = vector.broadcast %cst_116 : f32 to vector<16x1xf32>
    %234 = arith.divf %232, %233 : vector<16x1xf32>
    %cst_117 = arith.constant 9.99999974E-6 : f32
    %235 = vector.broadcast %cst_117 : f32 to vector<16x1xf32>
    %236 = arith.addf %234, %235 : vector<16x1xf32>
    %237 = math.rsqrt %236 : vector<16x1xf32>
    %238 = vector.broadcast %237 : vector<16x1xf32> to vector<16x128xf32>
    %239 = arith.mulf %229, %238 : vector<16x128xf32>
    %240 = vector.broadcast %222 : vector<1x128xf32> to vector<16x128xf32>
    %241 = arith.mulf %239, %240 : vector<16x128xf32>
    %242 = vector.broadcast %223 : vector<1x128xf32> to vector<16x128xf32>
    %243 = arith.addf %241, %242 : vector<16x128xf32>
    %244 = arith.truncf %243 : vector<16x128xf32> to vector<16x128xbf16>
    %c1_118 = arith.constant 1 : index
    %c0_119 = arith.constant 0 : index
    %c0_120 = arith.constant 0 : index
    %245 = vector.load %arg10[%c1_118, %c0_119, %c0_120] : memref<2x128x128xbf16, #tpu.memory_space<vmem>>, vector<1x128x128xbf16>
    %246 = vector.shape_cast %245 : vector<1x128x128xbf16> to vector<128x128xbf16>
    %cst_121 = arith.constant dense<0.000000e+00> : vector<16x128xf32>
    %247 = tpu.matmul %244, %246, %cst_121 {dimension_numbers = #tpu.dot_dimension_numbers<[1], [0], [0], [1], [0, 0, 1, 1], [], []>} : vector<16x128xbf16>, vector<128x128xbf16>, vector<16x128xf32> -> vector<16x128xf32>
    %c1_122 = arith.constant 1 : index
    %c0_123 = arith.constant 0 : index
    %c0_124 = arith.constant 0 : index
    %248 = vector.load %arg11[%c1_122, %c0_123, %c0_124] : memref<2x1x128xf32, #tpu.memory_space<vmem>>, vector<1x1x128xf32>
    %249 = vector.shape_cast %248 : vector<1x1x128xf32> to vector<1x128xf32>
    %250 = vector.broadcast %249 : vector<1x128xf32> to vector<16x128xf32>
    %251 = arith.addf %247, %250 : vector<16x128xf32>
    %252 = arith.truncf %251 : vector<16x128xf32> to vector<16x128xbf16>
    %253 = vector.extract_strided_slice %12 {offsets = [0, 256], sizes = [32, 128], strides = [1, 1]} : vector<32x512xbf16> to vector<32x128xbf16>
    %254 = vector.extract_strided_slice %12 {offsets = [0, 384], sizes = [32, 128], strides = [1, 1]} : vector<32x512xbf16> to vector<32x128xbf16>
    %255 = tpu.concatenate %253, %253, %253, %253, %253, %253, %253, %253 in 0 : vector<32x128xbf16>, vector<32x128xbf16>, vector<32x128xbf16>, vector<32x128xbf16>, vector<32x128xbf16>, vector<32x128xbf16>, vector<32x128xbf16>, vector<32x128xbf16> -> vector<256x128xbf16>
    %256 = arith.mulf %255, %4 : vector<256x128xbf16>
    %257 = tpu.concatenate %254, %254, %254, %254, %254, %254, %254, %254 in 0 : vector<32x128xbf16>, vector<32x128xbf16>, vector<32x128xbf16>, vector<32x128xbf16>, vector<32x128xbf16>, vector<32x128xbf16>, vector<32x128xbf16>, vector<32x128xbf16> -> vector<256x128xbf16>
    %258 = arith.mulf %257, %4 : vector<256x128xbf16>
    %cst_125 = arith.constant dense<0.000000e+00> : vector<16x256xf32>
    %259 = tpu.matmul %252, %256, %cst_125 {dimension_numbers = #tpu.dot_dimension_numbers<[1], [1], [0], [0], [0, 0, 1, 0], [], []>} : vector<16x128xbf16>, vector<256x128xbf16>, vector<16x256xf32> -> vector<16x256xf32>
    %260 = arith.addf %259, %2 : vector<16x256xf32>
    %cst_126 = arith.constant dense<0xFF800000> : vector<16xf32>
    %261 = vector.multi_reduction <maximumf>, %260, %cst_126 [1] : vector<16x256xf32> to vector<16xf32>
    %262 = vector.shape_cast %261 : vector<16xf32> to vector<16x1xf32>
    %263 = vector.broadcast %262 : vector<16x1xf32> to vector<16x256xf32>
    %264 = arith.subf %260, %263 : vector<16x256xf32>
    %265 = math.exp %264 : vector<16x256xf32>
    %266 = arith.truncf %265 : vector<16x256xf32> to vector<16x256xbf16>
    %cst_127 = arith.constant dense<0.000000e+00> : vector<16x128xf32>
    %267 = tpu.matmul %266, %258, %cst_127 {dimension_numbers = #tpu.dot_dimension_numbers<[1], [0], [0], [1], [0, 0, 1, 1], [], []>} : vector<16x256xbf16>, vector<256x128xbf16>, vector<16x128xf32> -> vector<16x128xf32>
    %cst_128 = arith.constant dense<0.000000e+00> : vector<16x128xf32>
    %268 = tpu.matmul %266, %4, %cst_128 {dimension_numbers = #tpu.dot_dimension_numbers<[1], [0], [0], [1], [0, 0, 1, 1], [], []>} : vector<16x256xbf16>, vector<256x128xbf16>, vector<16x128xf32> -> vector<16x128xf32>
    %cst_129 = arith.constant 1.000000e-30 : f32
    %269 = vector.broadcast %cst_129 : f32 to vector<16x128xf32>
    %270 = arith.maximumf %268, %269 : vector<16x128xf32>
    %271 = tpu.reciprocal %270 {approx = true} : vector<16x128xf32> -> vector<16x128xf32>
    %272 = arith.mulf %267, %271 : vector<16x128xf32>
    %273 = arith.truncf %272 : vector<16x128xf32> to vector<16x128xbf16>
    %c1_130 = arith.constant 1 : index
    %c0_131 = arith.constant 0 : index
    %c0_132 = arith.constant 0 : index
    %274 = vector.load %arg14[%c1_130, %c0_131, %c0_132] : memref<2x128x128xbf16, #tpu.memory_space<vmem>>, vector<1x128x128xbf16>
    %275 = vector.shape_cast %274 : vector<1x128x128xbf16> to vector<128x128xbf16>
    %cst_133 = arith.constant dense<0.000000e+00> : vector<16x128xf32>
    %276 = tpu.matmul %273, %275, %cst_133 {dimension_numbers = #tpu.dot_dimension_numbers<[1], [0], [0], [1], [0, 0, 1, 1], [], []>} : vector<16x128xbf16>, vector<128x128xbf16>, vector<16x128xf32> -> vector<16x128xf32>
    %c1_134 = arith.constant 1 : index
    %c0_135 = arith.constant 0 : index
    %c0_136 = arith.constant 0 : index
    %277 = vector.load %arg15[%c1_134, %c0_135, %c0_136] : memref<2x1x128xf32, #tpu.memory_space<vmem>>, vector<1x1x128xf32>
    %278 = vector.shape_cast %277 : vector<1x1x128xf32> to vector<1x128xf32>
    %279 = vector.broadcast %278 : vector<1x128xf32> to vector<16x128xf32>
    %280 = arith.addf %276, %279 : vector<16x128xf32>
    %281 = arith.addf %243, %280 : vector<16x128xf32>
    %282 = vector.extract_strided_slice %180 {offsets = [1, 0], sizes = [1, 128], strides = [1, 1]} : vector<3x128xf32> to vector<1x128xf32>
    %283 = vector.extract_strided_slice %182 {offsets = [1, 0], sizes = [1, 128], strides = [1, 1]} : vector<3x128xf32> to vector<1x128xf32>
    %cst_137 = arith.constant dense<0.000000e+00> : vector<16xf32>
    %284 = vector.multi_reduction <add>, %281, %cst_137 [1] : vector<16x128xf32> to vector<16xf32>
    %285 = vector.shape_cast %284 : vector<16xf32> to vector<16x1xf32>
    %cst_138 = arith.constant 1.280000e+02 : f32
    %286 = vector.broadcast %cst_138 : f32 to vector<16x1xf32>
    %287 = arith.divf %285, %286 : vector<16x1xf32>
    %288 = vector.broadcast %287 : vector<16x1xf32> to vector<16x128xf32>
    %289 = arith.subf %281, %288 : vector<16x128xf32>
    %290 = arith.mulf %289, %289 : vector<16x128xf32>
    %cst_139 = arith.constant dense<0.000000e+00> : vector<16xf32>
    %291 = vector.multi_reduction <add>, %290, %cst_139 [1] : vector<16x128xf32> to vector<16xf32>
    %292 = vector.shape_cast %291 : vector<16xf32> to vector<16x1xf32>
    %cst_140 = arith.constant 1.280000e+02 : f32
    %293 = vector.broadcast %cst_140 : f32 to vector<16x1xf32>
    %294 = arith.divf %292, %293 : vector<16x1xf32>
    %cst_141 = arith.constant 9.99999974E-6 : f32
    %295 = vector.broadcast %cst_141 : f32 to vector<16x1xf32>
    %296 = arith.addf %294, %295 : vector<16x1xf32>
    %297 = math.rsqrt %296 : vector<16x1xf32>
    %298 = vector.broadcast %297 : vector<16x1xf32> to vector<16x128xf32>
    %299 = arith.mulf %289, %298 : vector<16x128xf32>
    %300 = vector.broadcast %282 : vector<1x128xf32> to vector<16x128xf32>
    %301 = arith.mulf %299, %300 : vector<16x128xf32>
    %302 = vector.broadcast %283 : vector<1x128xf32> to vector<16x128xf32>
    %303 = arith.addf %301, %302 : vector<16x128xf32>
    %304 = arith.truncf %303 : vector<16x128xf32> to vector<16x128xbf16>
    %c1_142 = arith.constant 1 : index
    %c0_143 = arith.constant 0 : index
    %c0_144 = arith.constant 0 : index
    %305 = vector.load %arg16[%c1_142, %c0_143, %c0_144] : memref<2x128x256xbf16, #tpu.memory_space<vmem>>, vector<1x128x256xbf16>
    %306 = vector.shape_cast %305 : vector<1x128x256xbf16> to vector<128x256xbf16>
    %cst_145 = arith.constant dense<0.000000e+00> : vector<16x256xf32>
    %307 = tpu.matmul %304, %306, %cst_145 {dimension_numbers = #tpu.dot_dimension_numbers<[1], [0], [0], [1], [0, 0, 1, 1], [], []>} : vector<16x128xbf16>, vector<128x256xbf16>, vector<16x256xf32> -> vector<16x256xf32>
    %c1_146 = arith.constant 1 : index
    %c0_147 = arith.constant 0 : index
    %c0_148 = arith.constant 0 : index
    %308 = vector.load %arg17[%c1_146, %c0_147, %c0_148] : memref<2x1x256xf32, #tpu.memory_space<vmem>>, vector<1x1x256xf32>
    %309 = vector.shape_cast %308 : vector<1x1x256xf32> to vector<1x256xf32>
    %310 = vector.broadcast %309 : vector<1x256xf32> to vector<16x256xf32>
    %311 = arith.addf %307, %310 : vector<16x256xf32>
    %cst_149 = arith.constant 0.000000e+00 : f32
    %312 = vector.broadcast %cst_149 : f32 to vector<16x256xf32>
    %313 = arith.maximumf %311, %312 : vector<16x256xf32>
    %314 = arith.truncf %313 : vector<16x256xf32> to vector<16x256xbf16>
    %c1_150 = arith.constant 1 : index
    %c0_151 = arith.constant 0 : index
    %c0_152 = arith.constant 0 : index
    %315 = vector.load %arg18[%c1_150, %c0_151, %c0_152] : memref<2x256x128xbf16, #tpu.memory_space<vmem>>, vector<1x256x128xbf16>
    %316 = vector.shape_cast %315 : vector<1x256x128xbf16> to vector<256x128xbf16>
    %cst_153 = arith.constant dense<0.000000e+00> : vector<16x128xf32>
    %317 = tpu.matmul %314, %316, %cst_153 {dimension_numbers = #tpu.dot_dimension_numbers<[1], [0], [0], [1], [0, 0, 1, 1], [], []>} : vector<16x256xbf16>, vector<256x128xbf16>, vector<16x128xf32> -> vector<16x128xf32>
    %c1_154 = arith.constant 1 : index
    %c0_155 = arith.constant 0 : index
    %c0_156 = arith.constant 0 : index
    %318 = vector.load %arg19[%c1_154, %c0_155, %c0_156] : memref<2x1x128xf32, #tpu.memory_space<vmem>>, vector<1x1x128xf32>
    %319 = vector.shape_cast %318 : vector<1x1x128xf32> to vector<1x128xf32>
    %320 = vector.broadcast %319 : vector<1x128xf32> to vector<16x128xf32>
    %321 = arith.addf %317, %320 : vector<16x128xf32>
    %322 = arith.addf %303, %321 : vector<16x128xf32>
    %323 = vector.extract_strided_slice %180 {offsets = [2, 0], sizes = [1, 128], strides = [1, 1]} : vector<3x128xf32> to vector<1x128xf32>
    %324 = vector.extract_strided_slice %182 {offsets = [2, 0], sizes = [1, 128], strides = [1, 1]} : vector<3x128xf32> to vector<1x128xf32>
    %cst_157 = arith.constant dense<0.000000e+00> : vector<16xf32>
    %325 = vector.multi_reduction <add>, %322, %cst_157 [1] : vector<16x128xf32> to vector<16xf32>
    %326 = vector.shape_cast %325 : vector<16xf32> to vector<16x1xf32>
    %cst_158 = arith.constant 1.280000e+02 : f32
    %327 = vector.broadcast %cst_158 : f32 to vector<16x1xf32>
    %328 = arith.divf %326, %327 : vector<16x1xf32>
    %329 = vector.broadcast %328 : vector<16x1xf32> to vector<16x128xf32>
    %330 = arith.subf %322, %329 : vector<16x128xf32>
    %331 = arith.mulf %330, %330 : vector<16x128xf32>
    %cst_159 = arith.constant dense<0.000000e+00> : vector<16xf32>
    %332 = vector.multi_reduction <add>, %331, %cst_159 [1] : vector<16x128xf32> to vector<16xf32>
    %333 = vector.shape_cast %332 : vector<16xf32> to vector<16x1xf32>
    %cst_160 = arith.constant 1.280000e+02 : f32
    %334 = vector.broadcast %cst_160 : f32 to vector<16x1xf32>
    %335 = arith.divf %333, %334 : vector<16x1xf32>
    %cst_161 = arith.constant 9.99999974E-6 : f32
    %336 = vector.broadcast %cst_161 : f32 to vector<16x1xf32>
    %337 = arith.addf %335, %336 : vector<16x1xf32>
    %338 = math.rsqrt %337 : vector<16x1xf32>
    %339 = vector.broadcast %338 : vector<16x1xf32> to vector<16x128xf32>
    %340 = arith.mulf %330, %339 : vector<16x128xf32>
    %341 = vector.broadcast %323 : vector<1x128xf32> to vector<16x128xf32>
    %342 = arith.mulf %340, %341 : vector<16x128xf32>
    %343 = vector.broadcast %324 : vector<1x128xf32> to vector<16x128xf32>
    %344 = arith.addf %342, %343 : vector<16x128xf32>
    %345 = arith.truncf %344 : vector<16x128xf32> to vector<16x128xbf16>
    %c0_162 = arith.constant 0 : index
    %c0_163 = arith.constant 0 : index
    %346 = vector.load %arg22[%c0_162, %c0_163] : memref<128x128xbf16, #tpu.memory_space<vmem>>, vector<128x128xbf16>
    %cst_164 = arith.constant dense<0.000000e+00> : vector<16x128xf32>
    %347 = tpu.matmul %345, %346, %cst_164 {dimension_numbers = #tpu.dot_dimension_numbers<[1], [0], [0], [1], [0, 0, 1, 1], [], []>} : vector<16x128xbf16>, vector<128x128xbf16>, vector<16x128xf32> -> vector<16x128xf32>
    %c0_165 = arith.constant 0 : index
    %c0_166 = arith.constant 0 : index
    %348 = vector.load %arg23[%c0_165, %c0_166] : memref<1x128xf32, #tpu.memory_space<vmem>>, vector<1x128xf32>
    %349 = vector.broadcast %348 : vector<1x128xf32> to vector<16x128xf32>
    %350 = arith.addf %347, %349 : vector<16x128xf32>
    %c0_167 = arith.constant 0 : index
    %c0_168 = arith.constant 0 : index
    %351 = vector.load %arg24[%c0_167, %c0_168] : memref<16x128xf32, #tpu.memory_space<vmem>>, vector<16x128xf32>
    tpu.vector_store %arg24[%c0_167, %c0_168], %350 {strides = array<i32>} : memref<16x128xf32, #tpu.memory_space<vmem>>, vector<16x128xf32>,
    return
  }
}

</mosaic_0001>

<bundles_post_ra>
// kernel: tile.19
= control target key start
LH: loop header
LB: loop body
LE: loop exit
PB: predicated region body
PF: predicated region fallthrough
CT: control target
= control target key end

     0   :  { %vm48_vm0 = vcmask 1047556   ;;  %s227_s14 = smov 96   ;;  %s228_s27 = smov 64   ;;  %vm3_vm1 = vcmask 261120   ;;  %vm52_vm2 = vcmask 1048320   ;;  %vm95_vm3 = vcmask 785920   ;;  %s444_s0 = inlined_call_operand.vmem [shape: f32[16,8,32], index: 0, kind: input, shape index: {}]   ;;  %s445_s1 = inlined_call_operand.vmem [shape: f32[16,256], index: 1, kind: output, shape index: {}]  }
   0x1   :  { %v196_v0 = vld [vmem:[%s444_s0 + $0x43] ss:$8 sm:$0xf]   ;;  %v199_v6 = vld [vmem:[%s444_s0 + $0x47] ss:$8 sm:$0xf]  }
   0x2   :  { %v197_v1 = vld [vmem:[%s444_s0 + $0x43] ss:$8 sm:$0xf0]   ;;  %v200_v7 = vld [vmem:[%s444_s0 + $0x47] ss:$8 sm:$0xf0]  }
   0x3   :  { %v70_v2 = vsel %vm48_vm0, %v197_v1, %v196_v0  ;;  %v191_v3 = vld [vmem:[%s444_s0 + $0x3] ss:$8 sm:$0xf]   ;;  %v193_v8 = vld [vmem:[%s444_s0 + $0x7] ss:$8 sm:$0xf]   ;;  %v81_v12 = vsel %vm48_vm0, %v200_v7, %v199_v6 }
   0x4   :  { %v192_v4 = vld [vmem:[%s444_s0 + $0x3] ss:$8 sm:$0xf0]   ;;  %71 = vrot.lane.b32.xlu1 %v70_v2, %s227_s14  ;;  %v194_v9 = vld [vmem:[%s444_s0 + $0x7] ss:$8 sm:$0xf0]  }
   0x5   :  { %v49_v5 = vsel %vm48_vm0, %v192_v4, %v191_v3  ;;  %v202_v10 = vld [vmem:[%s444_s0 + $0x2] ss:$8 sm:$0xf]   ;;  %v59_v14 = vsel %vm48_vm0, %v194_v9, %v193_v8  ;;  %v204_v15 = vld [vmem:[%s444_s0 + $0x6] ss:$8 sm:$0xf]  }
   0x6   :  { %50 = vrot.lane.b32.xlu0 %v49_v5, %s227_s14  ;;  %v203_v11 = vld [vmem:[%s444_s0 + $0x2] ss:$8 sm:$0xf0]   ;;  %v205_v16 = vld [vmem:[%s444_s0 + $0x6] ss:$8 sm:$0xf0]  }
   0x7   :  { %v92_v13 = vsel %vm48_vm0, %v203_v11, %v202_v10  ;;  %v210_v17 = vld [vmem:[%s444_s0 + $0x46] ss:$8 sm:$0xf]   ;;  %v207_v19 = vld [vmem:[%s444_s0 + $0x42] ss:$8 sm:$0xf]   ;;  %v102_v21 = vsel %vm48_vm0, %v205_v16, %v204_v15 }
   0x8   :  { %93 = vrot.lane.b32.xlu2 %v92_v13, %s228_s27  ;;  %v211_v18 = vld [vmem:[%s444_s0 + $0x46] ss:$8 sm:$0xf0]   ;;  %v208_v20 = vld [vmem:[%s444_s0 + $0x42] ss:$8 sm:$0xf0]  }
   0x9   :  { %v124_v22 = vsel %vm48_vm0, %v211_v18, %v210_v17  ;;  %v113_v23 = vsel %vm48_vm0, %v208_v20, %v207_v19  ;;  %v213_v24 = vld [vmem:[%s444_s0 + $0x1] ss:$8 sm:$0xf]   ;;  %v215_v28 = vld [vmem:[%s444_s0 + $0x5] ss:$8 sm:$0xf]  }
   0xa   :  { %v214_v25 = vld [vmem:[%s444_s0 + $0x1] ss:$8 sm:$0xf0]   ;;  %v216_v29 = vld [vmem:[%s444_s0 + $0x5] ss:$8 sm:$0xf0]  }
   0xb   :  { %v218_v26 = vld [vmem:[%s444_s0 + $0x41] ss:$8 sm:$0xf]   ;;  %v135_v30 = vsel %vm48_vm0, %v214_v25, %v213_v24  ;;  %v145_v32 = vsel %vm48_vm0, %v216_v29, %v215_v28  ;;  %s229_s23 = smov 32   ;;  %v2_v36 = vld [vmem:[%s444_s0] ss:$4 sm:$0xff]  }
   0xc   :  { %82 = vrot.lane.b32.xlu1 %v81_v12, %s227_s14  ;;  %v219_v27 = vld [vmem:[%s444_s0 + $0x41] ss:$8 sm:$0xf0]   ;;  %v221_v33 = vld [vmem:[%s444_s0 + $0x45] ss:$8 sm:$0xf]  }
   0xd   :  { %v156_v31 = vsel %vm48_vm0, %v219_v27, %v218_v26  ;;  %v222_v34 = vld [vmem:[%s444_s0 + $0x45] ss:$8 sm:$0xf0]   ;;  %4 = vst.msk [vmem:[%s445_s1] ss:$8 sm:$0x3] %vm3_vm1, %v2_v36  }
   0xe   :  { %60 = vrot.lane.b32.xlu0 %v59_v14, %s227_s14  ;;  %v167_v35 = vsel %vm48_vm0, %v222_v34, %v221_v33  ;;  %173 = vst.msk [vmem:[%s445_s1 - $0xf] ss:$8 sm:$0xc] %vm3_vm1, %v2_v36   ;;  %v176_v37 = vld [vmem:[%s444_s0 + $0x20] ss:$4 sm:$0xff]   ;;  %vm138_vm4 = vcmask 523520  }
   0xf   :  { %174 = vst.msk [vmem:[%s445_s1 - $0x1e] ss:$8 sm:$0x30] %vm3_vm1, %v2_v36   ;;  %v181_v38 = vld [vmem:[%s444_s0 + $0x40] ss:$4 sm:$0xff]  }
  0x10   :  { %103 = vrot.lane.b32.xlu2 %v102_v21, %s228_s27  ;;  %175 = vst.msk [vmem:[%s445_s1 - $0x2d] ss:$8 sm:$0xc0] %vm3_vm1, %v2_v36   ;;  %v186_v39 = vld [vmem:[%s444_s0 + $0x60] ss:$4 sm:$0xff]  }
  0x11   :  { %177 = vst.msk [vmem:[%s445_s1 + $0x4] ss:$8 sm:$0x3] %vm3_vm1, %v176_v37  }
  0x12   :  { %178 = vst.msk [vmem:[%s445_s1 - $0xb] ss:$8 sm:$0xc] %vm3_vm1, %v176_v37  }
  0x13   :  { %179 = vst.msk [vmem:[%s445_s1 - $0x1a] ss:$8 sm:$0x30] %vm3_vm1, %v176_v37  }
  0x14   :  { %125 = vrot.lane.b32.xlu1 %v124_v22, %s228_s27  ;;  %180 = vst.msk [vmem:[%s445_s1 - $0x29] ss:$8 sm:$0xc0] %vm3_vm1, %v176_v37  }
  0x15   :  { %182 = vst.msk [vmem:[%s445_s1 + $0x10] ss:$8 sm:$0x3] %vm3_vm1, %v181_v38  }
  0x16   :  { %114 = vrot.lane.b32.xlu0 %v113_v23, %s228_s27  ;;  %183 = vst.msk [vmem:[%s445_s1 + $0x1] ss:$8 sm:$0xc] %vm3_vm1, %v181_v38  }
  0x17   :  { %184 = vst.msk [vmem:[%s445_s1 - $0xe] ss:$8 sm:$0x30] %vm3_vm1, %v181_v38  }
  0x18   :  { %136 = vrot.lane.b32.xlu2 %v135_v30, %s229_s23  ;;  %185 = vst.msk [vmem:[%s445_s1 - $0x1d] ss:$8 sm:$0xc0] %vm3_vm1, %v181_v38  }
  0x19   :  { %187 = vst.msk [vmem:[%s445_s1 + $0x14] ss:$8 sm:$0x3] %vm3_vm1, %v186_v39  }
  0x1a   :  { %188 = vst.msk [vmem:[%s445_s1 + $0x5] ss:$8 sm:$0xc] %vm3_vm1, %v186_v39  }
  0x1b   :  { %189 = vst.msk [vmem:[%s445_s1 - $0xa] ss:$8 sm:$0x30] %vm3_vm1, %v186_v39  }
  0x1c   :  { %157 = vrot.lane.b32.xlu1 %v156_v31, %s229_s23  ;;  %190 = vst.msk [vmem:[%s445_s1 - $0x19] ss:$8 sm:$0xc0] %vm3_vm1, %v186_v39  }
  0x1e   :  { %146 = vrot.lane.b32.xlu0 %v145_v32, %s229_s23 }
  0x20   :  { %168 = vrot.lane.b32.xlu2 %v167_v35, %s229_s23 }
  0x62   :  { %v94_v40 = vpop.permute.xlu2 %93  }
  0x6a   :  { %v104_v41 = vpop.permute.xlu2 %103  }
  0x72   :  { %v137_v42 = vpop.permute.xlu2 %136  }
  0x76   :  { %v72_v43 = vpop.permute.xlu1 %71  }
  0x77   :  { %198 = vst.msk [vmem:[%s445_s1 + $0x10] sm:$0xff] %vm52_vm2, %v72_v43  }
  0x78   :  { %v51_v44 = vpop.permute.xlu0 %50  }
  0x79   :  { %53 = vst.msk [vmem:[%s445_s1] sm:$0xff] %vm52_vm2, %v51_v44  }
  0x7a   :  { %96 = vst.msk [vmem:[%s445_s1] sm:$0xff] %vm95_vm3, %v94_v40   ;;  %v169_v45 = vpop.permute.xlu2 %168  }
  0x7b   :  { %139 = vst.msk [vmem:[%s445_s1] sm:$0xff] %vm138_vm4, %v137_v42  }
  0x7e   :  { %v83_v46 = vpop.permute.xlu1 %82  }
  0x7f   :  { %201 = vst.msk [vmem:[%s445_s1 + $0x18] sm:$0xff] %vm52_vm2, %v83_v46  }
  0x80   :  { %v61_v47 = vpop.permute.xlu0 %60  }
  0x81   :  { %195 = vst.msk [vmem:[%s445_s1 + $0x8] sm:$0xff] %vm52_vm2, %v61_v47  }
  0x82   :  { %206 = vst.msk [vmem:[%s445_s1 + $0x8] sm:$0xff] %vm95_vm3, %v104_v41  }
  0x86   :  { %v126_v48 = vpop.permute.xlu1 %125  }
  0x87   :  { %212 = vst.msk [vmem:[%s445_s1 + $0x18] sm:$0xff] %vm95_vm3, %v126_v48  }
  0x88   :  { %v115_v49 = vpop.permute.xlu0 %114   ;;  %223 = vst.msk [vmem:[%s445_s1 + $0x18] sm:$0xff] %vm138_vm4, %v169_v45  }
  0x89   :  { %209 = vst.msk [vmem:[%s445_s1 + $0x10] sm:$0xff] %vm95_vm3, %v115_v49  }
  0x8e   :  { %v158_v50 = vpop.permute.xlu1 %157  }
  0x8f   :  { %220 = vst.msk [vmem:[%s445_s1 + $0x10] sm:$0xff] %vm138_vm4, %v158_v50  }
  0x90   :  { %v147_v51 = vpop.permute.xlu0 %146  }
  0x91   :  { %217 = vst.msk [vmem:[%s445_s1 + $0x8] sm:$0xff] %vm138_vm4, %v147_v51  }

// kernel: tile.14
= control target key start
LH: loop header
LB: loop body
LE: loop exit
PB: predicated region body
PF: predicated region fallthrough
CT: control target
= control target key end

     0   :  { %vm4_vm0 = vcmask 1047556   ;;  %s209_s14 = smov 96   ;;  %s210_s15 = smov 112   ;;  %vm6_vm1 = vcmask 130048   ;;  %vm25_vm2 = vcmask 1048448   ;;  %vm46_vm3 = vcmask 917248   ;;  %s386_s0 = inlined_call_operand.vmem [shape: f32[16,8,16], index: 0, kind: input, shape index: {}]   ;;  %s387_s1 = inlined_call_operand.vmem [shape: f32[16,128], index: 1, kind: output, shape index: {}]  }
   0x1   :  { %v172_v0 = vld [vmem:[%s386_s0 + $0x6] ss:$8 sm:$0xf]   ;;  %v167_v3 = vld [vmem:[%s386_s0 + $0x7] ss:$8 sm:$0xf]  }
   0x2   :  { %v173_v1 = vld [vmem:[%s386_s0 + $0x6] ss:$8 sm:$0xf0]   ;;  %v168_v4 = vld [vmem:[%s386_s0 + $0x7] ss:$8 sm:$0xf0]  }
   0x3   :  { %v43_v2 = vsel %vm4_vm0, %v173_v1, %v172_v0  ;;  %v22_v5 = vsel %vm4_vm0, %v168_v4, %v167_v3  ;;  %v174_v6 = vld [vmem:[%s386_s0 + $0x46] ss:$8 sm:$0xf]   ;;  %v169_v8 = vld [vmem:[%s386_s0 + $0x47] ss:$8 sm:$0xf]  }
   0x4   :  { %44 = vrot.lane.b32.xlu1 %v43_v2, %s209_s14  ;;  %23 = vrot.lane.b32.xlu0 %v22_v5, %s210_s15  ;;  %v175_v7 = vld [vmem:[%s386_s0 + $0x46] ss:$8 sm:$0xf0]   ;;  %v170_v9 = vld [vmem:[%s386_s0 + $0x47] ss:$8 sm:$0xf0]  }
   0x5   :  { %v53_v10 = vsel %vm4_vm0, %v175_v7, %v174_v6  ;;  %v32_v11 = vsel %vm4_vm0, %v170_v9, %v169_v8  ;;  %v177_v12 = vld [vmem:[%s386_s0 + $0x5] ss:$8 sm:$0xf]   ;;  %v184_v15 = vld [vmem:[%s386_s0 + $0x44] ss:$8 sm:$0xf]  }
   0x6   :  { %v178_v13 = vld [vmem:[%s386_s0 + $0x5] ss:$8 sm:$0xf0]   ;;  %v185_v16 = vld [vmem:[%s386_s0 + $0x44] ss:$8 sm:$0xf0]  }
   0x7   :  { %v64_v14 = vsel %vm4_vm0, %v178_v13, %v177_v12  ;;  %s211_s3 = smov 80   ;;  %v182_v17 = vld [vmem:[%s386_s0 + $0x4] ss:$8 sm:$0xf]   ;;  %v95_v21 = vsel %vm4_vm0, %v185_v16, %v184_v15  ;;  %s212_s12 = smov 64   ;;  %vm67_vm4 = vcmask 786048  }
   0x8   :  { %65 = vrot.lane.b32.xlu2 %v64_v14, %s211_s3  ;;  %v183_v18 = vld [vmem:[%s386_s0 + $0x4] ss:$8 sm:$0xf0]   ;;  %v179_v19 = vld [vmem:[%s386_s0 + $0x45] ss:$8 sm:$0xf]  }
   0x9   :  { %v180_v20 = vld [vmem:[%s386_s0 + $0x45] ss:$8 sm:$0xf0]   ;;  %v85_v22 = vsel %vm4_vm0, %v183_v18, %v182_v17  ;;  %v192_v24 = vld [vmem:[%s386_s0 + $0x2] ss:$8 sm:$0xf]  }
   0xa   :  { %v74_v23 = vsel %vm4_vm0, %v180_v20, %v179_v19  ;;  %v193_v25 = vld [vmem:[%s386_s0 + $0x2] ss:$8 sm:$0xf0]   ;;  %v189_v26 = vld [vmem:[%s386_s0 + $0x43] ss:$8 sm:$0xf]  }
   0xb   :  { %v190_v27 = vld [vmem:[%s386_s0 + $0x43] ss:$8 sm:$0xf0]   ;;  %v127_v30 = vsel %vm4_vm0, %v193_v25, %v192_v24  ;;  %s213_s25 = smov 32   ;;  %s214_s26 = smov 48   ;;  %vm88_vm5 = vcmask 654848  }
   0xc   :  { %54 = vrot.lane.b32.xlu1 %v53_v10, %s209_s14  ;;  %33 = vrot.lane.b32.xlu0 %v32_v11, %s210_s15  ;;  %v187_v28 = vld [vmem:[%s386_s0 + $0x3] ss:$8 sm:$0xf]   ;;  %v116_v31 = vsel %vm4_vm0, %v190_v27, %v189_v26  ;;  %v199_v33 = vld [vmem:[%s386_s0 + $0x41] ss:$8 sm:$0xf]  }
   0xd   :  { %v188_v29 = vld [vmem:[%s386_s0 + $0x3] ss:$8 sm:$0xf0]   ;;  %v200_v34 = vld [vmem:[%s386_s0 + $0x41] ss:$8 sm:$0xf0]  }
   0xe   :  { %v106_v32 = vsel %vm4_vm0, %v188_v29, %v187_v28  ;;  %v197_v35 = vld [vmem:[%s386_s0 + $0x1] ss:$8 sm:$0xf]   ;;  %v194_v37 = vld [vmem:[%s386_s0 + $0x42] ss:$8 sm:$0xf]   ;;  %v158_v39 = vsel %vm4_vm0, %v200_v34, %v199_v33 }
   0xf   :  { %v198_v36 = vld [vmem:[%s386_s0 + $0x1] ss:$8 sm:$0xf0]   ;;  %v195_v38 = vld [vmem:[%s386_s0 + $0x42] ss:$8 sm:$0xf0]  }
  0x10   :  { %75 = vrot.lane.b32.xlu2 %v74_v23, %s211_s3  ;;  %v148_v40 = vsel %vm4_vm0, %v198_v36, %v197_v35  ;;  %v137_v41 = vsel %vm4_vm0, %v195_v38, %v194_v37  ;;  %s215_s10 = smov 16   ;;  %v2_v42 = vld [vmem:[%s386_s0] ss:$8 sm:$0xf]   ;;  %vm109_vm6 = vcmask 523648   ;;  %vm130_vm7 = vcmask 392448  }
  0x11   :  { %v3_v43 = vld [vmem:[%s386_s0] ss:$8 sm:$0xf0]   ;;  %vm151_vm8 = vcmask 261248  }
  0x12   :  { %v5_v44 = vsel %vm4_vm0, %v3_v43, %v2_v42  ;;  %v164_v45 = vld [vmem:[%s386_s0 + $0x40] ss:$8 sm:$0xf]  }
  0x13   :  { %7 = vst.msk [vmem:[%s387_s1] sm:$0xff] %vm6_vm1, %v5_v44   ;;  %v165_v46 = vld [vmem:[%s386_s0 + $0x40] ss:$8 sm:$0xf0]  }
  0x14   :  { %96 = vrot.lane.b32.xlu1 %v95_v21, %s212_s12  ;;  %86 = vrot.lane.b32.xlu0 %v85_v22, %s212_s12  ;;  %v13_v47 = vsel %vm4_vm0, %v165_v46, %v164_v45 }
  0x15   :  { %166 = vst.msk [vmem:[%s387_s1 + $0x8] sm:$0xff] %vm6_vm1, %v13_v47  }
  0x18   :  { %107 = vrot.lane.b32.xlu2 %v106_v32, %s214_s26 }
  0x1c   :  { %128 = vrot.lane.b32.xlu1 %v127_v30, %s213_s25  ;;  %117 = vrot.lane.b32.xlu0 %v116_v31, %s214_s26 }
  0x20   :  { %138 = vrot.lane.b32.xlu2 %v137_v41, %s213_s25 }
  0x24   :  { %159 = vrot.lane.b32.xlu1 %v158_v39, %s215_s10  ;;  %149 = vrot.lane.b32.xlu0 %v148_v40, %s215_s10 }
  0x62   :  { %v66_v48 = vpop.permute.xlu2 %65  }
  0x6a   :  { %v76_v49 = vpop.permute.xlu2 %75  }
  0x72   :  { %v108_v52 = vpop.permute.xlu2 %107  }
  0x76   :  { %v45_v50 = vpop.permute.xlu1 %44   ;;  %v24_v51 = vpop.permute.xlu0 %23  }
  0x77   :  { %26 = vst.msk [vmem:[%s387_s1] sm:$0xff] %vm25_vm2, %v24_v51  }
  0x78   :  { %47 = vst.msk [vmem:[%s387_s1] sm:$0xff] %vm46_vm3, %v45_v50  }
  0x79   :  { %68 = vst.msk [vmem:[%s387_s1] sm:$0xff] %vm67_vm4, %v66_v48  }
  0x7a   :  { %v139_v55 = vpop.permute.xlu2 %138  }
  0x7e   :  { %v55_v53 = vpop.permute.xlu1 %54   ;;  %v34_v54 = vpop.permute.xlu0 %33  }
  0x7f   :  { %171 = vst.msk [vmem:[%s387_s1 + $0x8] sm:$0xff] %vm25_vm2, %v34_v54  }
  0x80   :  { %176 = vst.msk [vmem:[%s387_s1 + $0x8] sm:$0xff] %vm46_vm3, %v55_v53  }
  0x81   :  { %181 = vst.msk [vmem:[%s387_s1 + $0x8] sm:$0xff] %vm67_vm4, %v76_v49  }
  0x86   :  { %v97_v56 = vpop.permute.xlu1 %96   ;;  %v87_v57 = vpop.permute.xlu0 %86  }
  0x87   :  { %186 = vst.msk [vmem:[%s387_s1 + $0x8] sm:$0xff] %vm88_vm5, %v97_v56  }
  0x88   :  { %89 = vst.msk [vmem:[%s387_s1] sm:$0xff] %vm88_vm5, %v87_v57  }
  0x89   :  { %110 = vst.msk [vmem:[%s387_s1] sm:$0xff] %vm109_vm6, %v108_v52  }
  0x8e   :  { %v129_v58 = vpop.permute.xlu1 %128   ;;  %v118_v59 = vpop.permute.xlu0 %117  }
  0x8f   :  { %131 = vst.msk [vmem:[%s387_s1] sm:$0xff] %vm130_vm7, %v129_v58  }
  0x90   :  { %191 = vst.msk [vmem:[%s387_s1 + $0x8] sm:$0xff] %vm109_vm6, %v118_v59  }
  0x91   :  { %196 = vst.msk [vmem:[%s387_s1 + $0x8] sm:$0xff] %vm130_vm7, %v139_v55  }
  0x96   :  { %v160_v60 = vpop.permute.xlu1 %159   ;;  %v150_v61 = vpop.permute.xlu0 %149  }
  0x97   :  { %201 = vst.msk [vmem:[%s387_s1 + $0x8] sm:$0xff] %vm151_vm8, %v160_v60  }
  0x98   :  { %152 = vst.msk [vmem:[%s387_s1] sm:$0xff] %vm151_vm8, %v150_v61  }

// kernel: text_decoder_forward.1
= control target key start
LH: loop header
LB: loop body
LE: loop exit
PB: predicated region body
PF: predicated region fallthrough
CT: control target
= control target key end

     0   :  { %s6596_s0 = inlined_call_operand.vmem [shape: f32[16,128], index: 0, kind: input, shape index: {}]   ;;  %s6597_s1 = inlined_call_operand.vmem [shape: f32[32,128], index: 1, kind: input, shape index: {}]   ;;  %s6598_s2 = inlined_call_operand.vmem [shape: f32[16,128], index: 2, kind: input, shape index: {}]   ;;  %s6599_s3 = inlined_call_operand.vmem [shape: f32[16,256], index: 3, kind: input, shape index: {}]   ;;  %s6600_s4 = inlined_call_operand.vmem [shape: bf16[128,128], index: 4, kind: input, shape index: {}]   ;;  %s6601_s5 = inlined_call_operand.vmem [shape: bf16[256,128], index: 5, kind: input, shape index: {}]   ;;  %s6602_s6 = inlined_call_operand.vmem [shape: bf16[2,128,384], index: 6, kind: input, shape index: {}]   ;;  %s6603_s7 = inlined_call_operand.vmem [shape: f32[2,1,384], index: 7, kind: input, shape index: {}]   ;;  %s6604_s8 = inlined_call_operand.vmem [shape: bf16[2,128,128], index: 8, kind: input, shape index: {}]   ;;  %s6605_s9 = inlined_call_operand.vmem [shape: f32[2,1,128], index: 9, kind: input, shape index: {}]   ;;  %s6606_s10 = inlined_call_operand.vmem [shape: bf16[2,128,128], index: 10, kind: input, shape index: {}]   ;;  %s6607_s11 = inlined_call_operand.vmem [shape: f32[2,1,128], index: 11, kind: input, shape index: {}]   ;;  %s6608_s12 = inlined_call_operand.vmem [shape: bf16[128,512], index: 12, kind: input, shape index: {}]   ;;  %s6609_s13 = inlined_call_operand.vmem [shape: f32[1,512], index: 13, kind: input, shape index: {}]   ;;  %s6610_s14 = inlined_call_operand.hbm [shape: bf16[2,128,128], index: 14, kind: input, shape index: {}]   ;;  %s6611_s15 = inlined_call_operand.vmem [shape: f32[2,1,128], index: 15, kind: input, shape index: {}]   ;;  %s6612_s16 = inlined_call_operand.hbm [shape: bf16[2,128,256], index: 16, kind: input, shape index: {}]   ;;  %s6613_s17 = inlined_call_operand.vmem [shape: f32[2,1,256], index: 17, kind: input, shape index: {}]   ;;  %s6614_s18 = inlined_call_operand.hbm [shape: bf16[2,256,128], index: 18, kind: input, shape index: {}]   ;;  %s6615_s19 = inlined_call_operand.vmem [shape: f32[2,1,128], index: 19, kind: input, shape index: {}]   ;;  %s6616_s20 = inlined_call_operand.vmem [shape: f32[2,3,128], index: 20, kind: input, shape index: {}]   ;;  %s6617_s21 = inlined_call_operand.vmem [shape: f32[2,3,128], index: 21, kind: input, shape index: {}]   ;;  %s6618_s22 = inlined_call_operand.vmem [shape: bf16[128,128], index: 22, kind: input, shape index: {}]   ;;  %s6619_s23 = inlined_call_operand.vmem [shape: f32[1,128], index: 23, kind: input, shape index: {}]   ;;  %s6620_s24 = inlined_call_operand.hbm [shape: f32[16,128], index: 24, kind: output, shape index: {}]  }
   0x1   :  { %6714 = sst [smem:[#allocation66_spill]] %s6596_s0 }
   0x2   :  { %6715 = sst [smem:[#allocation67_spill]] %s6597_s1 }
   0x3   :  { %6716 = sst [smem:[#allocation68_spill]] %s6598_s2 }
   0x4   :  { %6717 = sst [smem:[#allocation69_spill]] %s6599_s3 }
   0x5   :  { %6718 = sst [smem:[#allocation70_spill]] %s6600_s4 }
   0x6   :  { %6719 = sst [smem:[#allocation71_spill]] %s6601_s5 }
   0x7   :  { %6720 = sst [smem:[#allocation72_spill]] %s6602_s6 }
   0x8   :  { %6721 = sst [smem:[#allocation73_spill]] %s6603_s7 }
   0x9   :  { %6722 = sst [smem:[#allocation74_spill]] %s6604_s8 }
   0xa   :  { %29 = vsyncpa [#allocation3], 0 }
   0xb   :  { %30 = vsyncpa [#allocation6], 0  ;;  %s79_s27 = sshll.u32 %s6612_s16, 4  ;;  %s80_s27 = int_to_ptr.hbm [resolvable:$true] %s79_s27 }
   0xc   :  { %31 = vsyncpa [#allocation4], 0  ;;  %s4739_s28 = smov [#allocation5]   ;;  %s64_s0 = sshll.u32 %s6610_s14, 4  ;;  %s65_s0 = int_to_ptr.hbm [resolvable:$true] %s64_s0 }
   0xd   :  { %s81_s6 = sshll.u32 %s4739_s28, 4  ;;  %s4740_s7 = smov 128   ;;  %s82_s6 = int_to_ptr.vmem [resolvable:$true] %s81_s6 }
   0xe   :  { %s4741_s30 = smov 8   ;;  %s4742_s3 = smov [#allocation2]  }
   0xf   :  { %87 = dma.hbm_to_vmem [thread:$0]  %s80_s27, 4096, %s82_s6, [#allocation6], %s4740_s7, %s4740_s7, %s4741_s30  }
  0x10   :  { %s66_s25 = sshll.u32 %s4742_s3, 4  ;;  %s4743_s16 = smov 64   ;;  %s67_s25 = int_to_ptr.vmem [resolvable:$true] %s66_s25 }
  0x11   :  { %s4744_s8 = smov 4   ;;  %s94_s5 = sshll.u32 %s6614_s18, 4  ;;  %s95_s5 = int_to_ptr.hbm [resolvable:$true] %s94_s5 }
  0x12   :  { %72 = dma.hbm_to_vmem [thread:$0]  %s65_s0, 2048, %s67_s25, [#allocation3], %s4743_s16, %s4743_s16, %s4744_s8  }
  0x13   :  { %s4745_s26 = smov [#allocation7]  }
  0x14   :  { %s96_s14 = sshll.u32 %s4745_s26, 4  ;;  %s97_s14 = int_to_ptr.vmem [resolvable:$true] %s96_s14 }
  0x15   :  { %102 = dma.hbm_to_vmem [thread:$0]  %s95_s5, 4096, %s97_s14, [#allocation6], %s4743_s16, %s4743_s16, %s4744_s8  }
  0x16   :  { %4733 = dma.done.wait [#allocation3], 2048  }
  0x17   :  { %4734 = vsyncadd [#allocation3], 4294965248 }
  0x18   :  { %4735 = dma.done.wait [#allocation6], 8192  }
  0x19   :  { %4736 = vsyncadd [#allocation6], 4294959104  ;;  %v3443_v0 = vld [vmem:[%s6608_s12 + $0xe0] sm:$0xf]  ;;  %v4351_v1 = vld [vmem:[%s6608_s12 + $0xec] sm:$0xf0] }
  0x1a   :  { %v4349_v2 = vld [vmem:[%s6608_s12 + $0xe4] sm:$0xf]  ;;  %v3444_v3 = vor.u32 %v4351_v1, %v3443_v0  ;;  %v3445_v4 = vld [vmem:[%s6608_s12 + $0xf0] sm:$0xf0]  ;;  %v3427_v5 = vld [vmem:[%s6608_s12 + $0xc0] sm:$0xf] }
  0x1b   :  { %v4347_v6 = vld [vmem:[%s6608_s12 + $0xcc] sm:$0xf0]  ;;  %v3448_v7 = vor.u32 %v4349_v2, %v3445_v4  ;;  %v4345_v8 = vld [vmem:[%s6608_s12 + $0xc4] sm:$0xf]  ;;  %v3429_v9 = vld [vmem:[%s6608_s12 + $0xd0] sm:$0xf0] }
  0x1c   :  { %389 = vmatpush.bf16.msra.mxu0 %v3444_v3  ;;  %v3428_v10 = vor.u32 %v4347_v6, %v3427_v5  ;;  %v3432_v11 = vor.u32 %v4345_v8, %v3429_v9  ;;  %v3411_v12 = vld [vmem:[%s6608_s12 + $0xa0] sm:$0xf]  ;;  %v4343_v13 = vld [vmem:[%s6608_s12 + $0xac] sm:$0xf0]  ;;  %v4341_v14 = vld [vmem:[%s6608_s12 + $0xa4] sm:$0xf] }
  0x1d   :  { %408 = vmatpush.bf16.msra.mxu1 %v3448_v7  ;;  %v3413_v15 = vld [vmem:[%s6608_s12 + $0xb0] sm:$0xf0]  ;;  %v3412_v16 = vor.u32 %v4343_v13, %v3411_v12  ;;  %v3395_v18 = vld [vmem:[%s6608_s12 + $0x80] sm:$0xf]  ;;  %v4339_v19 = vld [vmem:[%s6608_s12 + $0x8c] sm:$0xf0] }
  0x1e   :  { %v3416_v17 = vor.u32 %v4341_v14, %v3413_v15  ;;  %v4337_v20 = vld [vmem:[%s6608_s12 + $0x84] sm:$0xf]  ;;  %v3397_v21 = vld [vmem:[%s6608_s12 + $0x90] sm:$0xf0]  ;;  %v3396_v22 = vor.u32 %v4339_v19, %v3395_v18  ;;  %v3379_v24 = vld [vmem:[%s6608_s12 + $0x60] sm:$0xf] }
  0x1f   :  { %v3400_v23 = vor.u32 %v4337_v20, %v3397_v21  ;;  %v4335_v25 = vld [vmem:[%s6608_s12 + $0x6c] sm:$0xf0]  ;;  %v4333_v26 = vld [vmem:[%s6608_s12 + $0x64] sm:$0xf]  ;;  %v3381_v27 = vld [vmem:[%s6608_s12 + $0x70] sm:$0xf0] }
  0x20   :  { %390 = vmatpush.bf16.msra.mxu0 %v3428_v10  ;;  %v3380_v28 = vor.u32 %v4335_v25, %v3379_v24  ;;  %v3384_v29 = vor.u32 %v4333_v26, %v3381_v27  ;;  %v3363_v30 = vld [vmem:[%s6608_s12 + $0x40] sm:$0xf]  ;;  %v4331_v31 = vld [vmem:[%s6608_s12 + $0x4c] sm:$0xf0]  ;;  %v4329_v32 = vld [vmem:[%s6608_s12 + $0x44] sm:$0xf] }
  0x21   :  { %409 = vmatpush.bf16.msra.mxu1 %v3432_v11  ;;  %v3365_v33 = vld [vmem:[%s6608_s12 + $0x50] sm:$0xf0]  ;;  %v3364_v34 = vor.u32 %v4331_v31, %v3363_v30  ;;  %v3347_v36 = vld [vmem:[%s6608_s12 + $0x20] sm:$0xf]  ;;  %v4327_v37 = vld [vmem:[%s6608_s12 + $0x2c] sm:$0xf0] }
  0x22   :  { %v3368_v35 = vor.u32 %v4329_v32, %v3365_v33  ;;  %v4325_v38 = vld [vmem:[%s6608_s12 + $0x24] sm:$0xf]  ;;  %v3349_v39 = vld [vmem:[%s6608_s12 + $0x30] sm:$0xf0]  ;;  %v3348_v40 = vor.u32 %v4327_v37, %v3347_v36  ;;  %v3331_v42 = vld [vmem:[%s6608_s12] sm:$0xf] }
  0x23   :  { %v3352_v41 = vor.u32 %v4325_v38, %v3349_v39  ;;  %v4323_v43 = vld [vmem:[%s6608_s12 + $0xc] sm:$0xf0]  ;;  %v4321_v44 = vld [vmem:[%s6608_s12 + $0x4] sm:$0xf]  ;;  %v3333_v45 = vld [vmem:[%s6608_s12 + $0x10] sm:$0xf0] }
  0x24   :  { %391 = vmatpush.bf16.msra.mxu0 %v3412_v16  ;;  %s6723_s6 = sld [smem:[#allocation72_spill]]  ;;  %v3332_v50 = vor.u32 %v4323_v43, %v3331_v42  ;;  %v3336_v53 = vor.u32 %v4321_v44, %v3333_v45  ;;  %v3451_v3 = vld [vmem:[%s6608_s12 + $0xe8] sm:$0xf]  ;;  %v4352_v4 = vld [vmem:[%s6608_s12 + $0xf4] sm:$0xf0]  ;;  %s4747_s1 = smov [#allocation8]  }
  0x25   :  { %410 = vmatpush.bf16.msra.mxu1 %v3416_v17  ;;  %s6724_s4 = sld [smem:[#allocation67_spill]]  ;;  %v3435_v5 = vld [vmem:[%s6608_s12 + $0xc8] sm:$0xf]  ;;  %v3452_v7 = vor.u32 %v4352_v4, %v3451_v3  ;;  %v4348_v8 = vld [vmem:[%s6608_s12 + $0xd4] sm:$0xf0]  ;;  %s3315_s5 = sshll.u32 %s6620_s24, 4  ;;  %s3316_s5 = int_to_ptr.hbm [resolvable:$true] %s3315_s5 }
  0x26   :  { %v3436_v14 = vor.u32 %v4348_v8, %v3435_v5  ;;  %v3419_v15 = vld [vmem:[%s6608_s12 + $0xa8] sm:$0xf]  ;;  %v4344_v16 = vld [vmem:[%s6608_s12 + $0xb4] sm:$0xf0]  ;;  %s6725_s28 = sld [smem:[#allocation66_spill]] }
  0x27   :  { %427 = vmatpush.bf16.msra.mxu2 %v3452_v7  ;;  %v3420_v24 = vor.u32 %v4344_v16, %v3419_v15  ;;  %v3403_v26 = vld [vmem:[%s6608_s12 + $0x88] sm:$0xf]  ;;  %v4340_v27 = vld [vmem:[%s6608_s12 + $0x94] sm:$0xf0]  ;;  %s6726_s14 = sld [smem:[#allocation70_spill]] }
  0x28   :  { %392 = vmatpush.bf16.msra.mxu0 %v3396_v22  ;;  %v3387_v36 = vld [vmem:[%s6608_s12 + $0x68] sm:$0xf]  ;;  %v4336_v37 = vld [vmem:[%s6608_s12 + $0x74] sm:$0xf0]  ;;  %s6727_s29 = sld [smem:[#allocation74_spill]] }
  0x29   :  { %411 = vmatpush.bf16.msra.mxu1 %v3400_v23  ;;  %v3388_v44 = vor.u32 %v4336_v37, %v3387_v36  ;;  %v3371_v45 = vld [vmem:[%s6608_s12 + $0x48] sm:$0xf]  ;;  %v3453_v36 = vld [vmem:[%s6608_s12 + $0xf8] sm:$0xf0]  ;;  %s6728_s18 = sld [smem:[#allocation71_spill]] }
  0x2a   :  { %v3543_v46 = vld [vmem:[%s6723_s6 + $0xa8] sm:$0xf]  ;;  %v4375_v47 = vld [vmem:[%s6723_s6 + $0xb0] sm:$0xf0]  ;;  %v4374_v48 = vld [vmem:[%s6723_s6 + $0xac] sm:$0xf] }
  0x2b   :  { %v3545_v49 = vld [vmem:[%s6723_s6 + $0xb4] sm:$0xf0]  ;;  %v181_v51 = vld [vmem:[%s6724_s4] sm:$0xff]  ;;  %v182_v52 = vld [vmem:[%s6724_s4 + $0x8] sm:$0xff]  ;;  %v3544_v54 = vor.u32 %v4375_v47, %v3543_v46  ;;  %428 = vmatpush.bf16.msra.mxu2 %v3436_v14  ;;  %s6729_s8 = sld [smem:[#allocation73_spill]] }
  0x2c   :  { %393 = vmatpush.bf16.msra.mxu0 %v3380_v28  ;;  %v3548_v55 = vor.u32 %v4374_v48, %v3545_v49  ;;  %v3531_v56 = vld [vmem:[%s6723_s6 + $0x90] sm:$0xf]  ;;  %v4372_v57 = vld [vmem:[%s6723_s6 + $0x98] sm:$0xf0]  ;;  %v5005_v58 = vpack.c.bf16 %v182_v52, %v181_v51  ;;  %v4371_v59 = vld [vmem:[%s6723_s6 + $0x94] sm:$0xf] }
  0x2d   :  { %412 = vmatpush.bf16.msra.mxu1 %v3384_v29  ;;  %v3533_v60 = vld [vmem:[%s6723_s6 + $0x9c] sm:$0xf0]  ;;  %v3532_v61 = vor.u32 %v4372_v57, %v3531_v56  ;;  %v3519_v63 = vld [vmem:[%s6723_s6 + $0x78] sm:$0xf]  ;;  %v4369_v0 = vld [vmem:[%s6723_s6 + $0x80] sm:$0xf0] }
  0x2e   :  { %v3536_v62 = vor.u32 %v4371_v59, %v3533_v60  ;;  %v4368_v1 = vld [vmem:[%s6723_s6 + $0x7c] sm:$0xf]  ;;  %v3521_v2 = vld [vmem:[%s6723_s6 + $0x84] sm:$0xf0]  ;;  %v3520_v6 = vor.u32 %v4369_v0, %v3519_v63  ;;  %v3507_v10 = vld [vmem:[%s6723_s6 + $0x60] sm:$0xf] }
  0x2f   :  { %v3524_v9 = vor.u32 %v4368_v1, %v3521_v2  ;;  %v4366_v11 = vld [vmem:[%s6723_s6 + $0x68] sm:$0xf0]  ;;  %v4365_v12 = vld [vmem:[%s6723_s6 + $0x64] sm:$0xf]  ;;  %v3509_v13 = vld [vmem:[%s6723_s6 + $0x6c] sm:$0xf0]  ;;  %429 = vmatpush.bf16.msra.mxu2 %v3420_v24 }
  0x30   :  { %394 = vmatpush.bf16.msra.mxu0 %v3364_v34  ;;  %v3508_v17 = vor.u32 %v4366_v11, %v3507_v10  ;;  %v3512_v18 = vor.u32 %v4365_v12, %v3509_v13  ;;  %v3495_v19 = vld [vmem:[%s6723_s6 + $0x48] sm:$0xf]  ;;  %v4363_v20 = vld [vmem:[%s6723_s6 + $0x50] sm:$0xf0]  ;;  %v4362_v22 = vld [vmem:[%s6723_s6 + $0x4c] sm:$0xf] }
  0x31   :  { %413 = vmatpush.bf16.msra.mxu1 %v3368_v35  ;;  %v183_v21 = vld [vmem:[%s6724_s4 + $0x10] sm:$0xff]  ;;  %v3497_v23 = vld [vmem:[%s6723_s6 + $0x54] sm:$0xf0]  ;;  %v3496_v28 = vor.u32 %v4363_v20, %v3495_v19  ;;  %v4360_v31 = vld [vmem:[%s6723_s6 + $0x38] sm:$0xf0]  ;;  %v3404_v35 = vor.u32 %v4340_v27, %v3403_v26  ;;  %s6768_s25 = sld [smem:[#allocation68_spill]] }
  0x32   :  { %v184_v25 = vld [vmem:[%s6724_s4 + $0x18] sm:$0xff]  ;;  %v3500_v29 = vor.u32 %v4362_v22, %v3497_v23  ;;  %v3483_v30 = vld [vmem:[%s6723_s6 + $0x30] sm:$0xf]  ;;  %v4359_v33 = vld [vmem:[%s6723_s6 + $0x34] sm:$0xf] }
  0x33   :  { %v5087_v32 = vpack.c.bf16 %v184_v25, %v183_v21  ;;  %v3485_v34 = vld [vmem:[%s6723_s6 + $0x3c] sm:$0xf0]  ;;  %v3484_v38 = vor.u32 %v4360_v31, %v3483_v30  ;;  %v4356_v42 = vld [vmem:[%s6723_s6 + $0x1c] sm:$0xf]  ;;  %v3473_v43 = vld [vmem:[%s6723_s6 + $0x24] sm:$0xf0]  ;;  %430 = vmatpush.bf16.msra.mxu2 %v3404_v35 }
  0x34   :  { %395 = vmatpush.bf16.msra.mxu0 %v3348_v40  ;;  %v3488_v39 = vor.u32 %v4359_v33, %v3485_v34  ;;  %v3471_v40 = vld [vmem:[%s6723_s6 + $0x18] sm:$0xf]  ;;  %v3476_v48 = vor.u32 %v4356_v42, %v3473_v43  ;;  %v3459_v49 = vld [vmem:[%s6723_s6] sm:$0xf]  ;;  %v4353_v51 = vld [vmem:[%s6723_s6 + $0x4] sm:$0xf] }
  0x35   :  { %414 = vmatpush.bf16.msra.mxu1 %v3352_v41  ;;  %v4357_v41 = vld [vmem:[%s6723_s6 + $0x20] sm:$0xf0]  ;;  %v4332_v46 = vld [vmem:[%s6608_s12 + $0x54] sm:$0xf0]  ;;  %v3461_v52 = vld [vmem:[%s6723_s6 + $0xc] sm:$0xf0] }
  0x36   :  { %v3472_v47 = vor.u32 %v4357_v41, %v3471_v40  ;;  %v3464_v57 = vor.u32 %v4353_v51, %v3461_v52  ;;  %v125_v59 = vld [vmem:[%s6725_s28] sm:$0xff]  ;;  %v4324_v63 = vld [vmem:[%s6608_s12 + $0x14] sm:$0xf0]  ;;  %v3551_v0 = vld [vmem:[%s6723_s6 + $0xb0] sm:$0xf] }
  0x37   :  { %431 = vmatpush.bf16.msra.mxu2 %v3388_v44  ;;  %v4376_v1 = vld [vmem:[%s6723_s6 + $0xb8] sm:$0xf0]  ;;  %v3539_v5 = vld [vmem:[%s6723_s6 + $0x98] sm:$0xf]  ;;  %v3527_v8 = vld [vmem:[%s6723_s6 + $0x80] sm:$0xf] }
  0x38   :  { %396 = vmatpush.bf16.msra.mxu0 %v3332_v50  ;;  %v4354_v50 = vld [vmem:[%s6723_s6 + $0x8] sm:$0xf0]  ;;  %v3552_v4 = vor.u32 %v4376_v1, %v3551_v0  ;;  %v3515_v11 = vld [vmem:[%s6723_s6 + $0x68] sm:$0xf]  ;;  %v4367_v12 = vld [vmem:[%s6723_s6 + $0x70] sm:$0xf0] }
  0x39   :  { %415 = vmatpush.bf16.msra.mxu1 %v3336_v53  ;;  %v3372_v53 = vor.u32 %v4332_v46, %v3371_v45  ;;  %v3460_v56 = vor.u32 %v4354_v50, %v3459_v49  ;;  %v3516_v13 = vor.u32 %v4367_v12, %v3515_v11  ;;  %v3503_v14 = vld [vmem:[%s6723_s6 + $0x50] sm:$0xf]  ;;  %v4364_v15 = vld [vmem:[%s6723_s6 + $0x58] sm:$0xf0]  ;;  %v3479_v20 = vld [vmem:[%s6723_s6 + $0x20] sm:$0xf] }
  0x3a   :  { %v3504_v16 = vor.u32 %v4364_v15, %v3503_v14  ;;  %v4358_v21 = vld [vmem:[%s6723_s6 + $0x28] sm:$0xf0]  ;;  %v3467_v23 = vld [vmem:[%s6723_s6 + $0x8] sm:$0xf]  ;;  %v4355_v24 = vld [vmem:[%s6723_s6 + $0x10] sm:$0xf0] }
  0x3b   :  { %397 = vmatmul.bf16.vlgmr.msra.gmra.mxu0 %v5005_v58  ;;  %432 = vmatpush.bf16.msra.mxu2 %v3372_v53  ;;  %v3480_v22 = vor.u32 %v4358_v21, %v3479_v20  ;;  %v3468_v25 = vor.u32 %v4355_v24, %v3467_v23  ;;  %v4304_v26 = vld [vmem:[%s6726_s14 + $0x38] sm:$0xff]  ;;  %v4302_v30 = vld [vmem:[%s6726_s14 + $0x28] sm:$0xff]  ;;  %v4301_v33 = vld [vmem:[%s6726_s14 + $0x20] sm:$0xff] }
  0x3c   :  { %644 = vmatpush.bf16.msrb.mxu0 %v3544_v54  ;;  %416 = vmatmul.bf16.vlgmr.msra.gmra.mxu1 %v5005_v58  ;;  %v3355_v54 = vld [vmem:[%s6608_s12 + $0x28] sm:$0xf]  ;;  %v4384_v27 = vld [vmem:[%s6727_s29 + $0x38] sm:$0xff]  ;;  %v4381_v34 = vld [vmem:[%s6727_s29 + $0x20] sm:$0xff] }
  0x3d   :  { %658 = vmatpush.bf16.msrb.mxu1 %v3548_v55  ;;  %v4328_v55 = vld [vmem:[%s6608_s12 + $0x34] sm:$0xf0]  ;;  %v4382_v31 = vld [vmem:[%s6727_s29 + $0x28] sm:$0xff]  ;;  %v3437_v41 = vld [vmem:[%s6608_s12 + $0xd8] sm:$0xf0] }
  0x3e   :  { %v3356_v60 = vor.u32 %v4328_v55, %v3355_v54  ;;  %v4350_v35 = vld [vmem:[%s6608_s12 + $0xec] sm:$0xf]  ;;  %v4299_v43 = vld [vmem:[%s6726_s14 + $0x10] sm:$0xff]  ;;  %v5252_v45 = vld [vmem:[%s6609_s13] sm:$0xf] }
  0x3f   :  { %v3456_v37 = vor.u32 %v4350_v35, %v3453_v36  ;;  %v4346_v40 = vld [vmem:[%s6608_s12 + $0xcc] sm:$0xf]  ;;  %v4379_v44 = vld [vmem:[%s6727_s29 + $0x10] sm:$0xff]  ;;  %v3421_v49 = vld [vmem:[%s6608_s12 + $0xb8] sm:$0xf0]  ;;  %v221_v50 = vperm.slane %v5252_v45, 0 }
  0x40   :  { %645 = vmatpush.bf16.msrb.mxu0 %v3532_v61  ;;  %v126_v61 = vld [vmem:[%s6725_s28 + $0x8] sm:$0xff]  ;;  %433 = vmatpush.bf16.msra.mxu2 %v3356_v60  ;;  %v3440_v42 = vor.u32 %v4346_v40, %v3437_v41  ;;  %v222_v51 = vperm.slane %v5252_v45, 1  ;;  %v5316_v40 = vld [vmem:[%s6729_s8] sm:$0x7] }
  0x41   :  { %659 = vmatpush.bf16.msrb.mxu1 %v3536_v62  ;;  %v3339_v62 = vld [vmem:[%s6608_s12 + $0x8] sm:$0xf]  ;;  %v475_v2 = vpack.c.bf16 %v126_v61, %v125_v59  ;;  %446 = vmatpush.bf16.msra.mxu3 %v3456_v37  ;;  %v4338_v55 = vld [vmem:[%s6608_s12 + $0x8c] sm:$0xf]  ;;  %v4297_v61 = vld [vmem:[%s6726_s14] sm:$0xff] }
  0x42   :  { %v3340_v3 = vor.u32 %v4324_v63, %v3339_v62  ;;  %v4298_v53 = vld [vmem:[%s6726_s14 + $0x8] sm:$0xff]  ;;  %v4377_v62 = vld [vmem:[%s6727_s29] sm:$0xff] }
  0x43   :  { %v4378_v54 = vld [vmem:[%s6727_s29 + $0x8] sm:$0xff] }
  0x44   :  { %646 = vmatpush.bf16.msrb.mxu0 %v3520_v6  ;;  %v4373_v6 = vld [vmem:[%s6723_s6 + $0xa0] sm:$0xf0]  ;;  %434 = vmatpush.bf16.msra.mxu2 %v3340_v3  ;;  %v3389_v3 = vld [vmem:[%s6608_s12 + $0x78] sm:$0xf0] }
  0x45   :  { %660 = vmatpush.bf16.msrb.mxu1 %v3524_v9  ;;  %v3540_v7 = vor.u32 %v4373_v6, %v3539_v5  ;;  %v4370_v9 = vld [vmem:[%s6723_s6 + $0x88] sm:$0xf0]  ;;  %447 = vmatpush.bf16.msra.mxu3 %v3440_v42 }
  0x46   :  { %v3528_v10 = vor.u32 %v4370_v9, %v3527_v8  ;;  %v4330_v8 = vld [vmem:[%s6608_s12 + $0x4c] sm:$0xf]  ;;  %v3373_v9 = vld [vmem:[%s6608_s12 + $0x58] sm:$0xf0] }
  0x47   :  { %435 = vmatmul.bf16.vlgmr.msra.gmra.mxu2 %v5005_v58  ;;  %v3376_v12 = vor.u32 %v4330_v8, %v3373_v9  ;;  %v157_v8 = vld [vmem:[%s6728_s18 + $0x20] sm:$0xff]  }
  0x48   :  { %647 = vmatpush.bf16.msrb.mxu0 %v3508_v17  ;;  %672 = vmatpush.bf16.msrb.mxu2 %v3552_v4  ;;  %v3491_v17 = vld [vmem:[%s6723_s6 + $0x38] sm:$0xf]  ;;  %v173_v9 = vld [vmem:[%s6728_s18 + $0x60] sm:$0xff]  }
  0x49   :  { %661 = vmatpush.bf16.msrb.mxu1 %v3512_v18  ;;  %v4361_v18 = vld [vmem:[%s6723_s6 + $0x40] sm:$0xf0] }
  0x4a   :  { %v3492_v19 = vor.u32 %v4361_v18, %v3491_v17  ;;  %v3357_v17 = vld [vmem:[%s6608_s12 + $0x38] sm:$0xf0]  ;;  %v4322_v18 = vld [vmem:[%s6608_s12 + $0xc] sm:$0xf] }
  0x4b   :  { %402 = vmatmul.bf16.gmra.mxu0 %v5087_v32 }
  0x4c   :  { %648 = vmatpush.bf16.msrb.mxu0 %v3496_v28  ;;  %421 = vmatmul.bf16.gmra.mxu1 %v5087_v32  ;;  %v4303_v28 = vld [vmem:[%s6726_s14 + $0x30] sm:$0xff] }
  0x4d   :  { %662 = vmatpush.bf16.msrb.mxu1 %v3500_v29  ;;  %673 = vmatpush.bf16.msrb.mxu2 %v3540_v7  ;;  %v4383_v29 = vld [vmem:[%s6727_s29 + $0x30] sm:$0xff] }
  0x50   :  { %649 = vmatpush.bf16.msrb.mxu0 %v3484_v38  ;;  %v4300_v38 = vld [vmem:[%s6726_s14 + $0x18] sm:$0xff] }
  0x51   :  { %663 = vmatpush.bf16.msrb.mxu1 %v3488_v39  ;;  %674 = vmatpush.bf16.msrb.mxu2 %v3528_v10  ;;  %v4380_v39 = vld [vmem:[%s6727_s29 + $0x18] sm:$0xff] }
  0x54   :  { %650 = vmatpush.bf16.msrb.mxu0 %v3472_v47 }
  0x55   :  { %664 = vmatpush.bf16.msrb.mxu1 %v3476_v48  ;;  %675 = vmatpush.bf16.msrb.mxu2 %v3516_v13  ;;  %v4342_v48 = vld [vmem:[%s6608_s12 + $0xac] sm:$0xf] }
  0x56   :  { %v3424_v52 = vor.u32 %v4342_v48, %v3421_v49  ;;  %v161_v48 = vld [vmem:[%s6728_s18 + $0x30] sm:$0xff]  }
  0x57   :  { %440 = vmatmul.bf16.gmra.mxu2 %v5087_v32 }
  0x58   :  { %651 = vmatpush.bf16.msrb.mxu0 %v3460_v56  ;;  %448 = vmatpush.bf16.msra.mxu3 %v3424_v52  ;;  %v3405_v56 = vld [vmem:[%s6608_s12 + $0x98] sm:$0xf0]  ;;  %v510_v52 = vperm.slane %v5316_v40, 0 }
  0x59   :  { %665 = vmatpush.bf16.msrb.mxu1 %v3464_v57  ;;  %676 = vmatpush.bf16.msrb.mxu2 %v3504_v16  ;;  %v3408_v60 = vor.u32 %v4338_v55, %v3405_v56  ;;  %v4326_v16 = vld [vmem:[%s6608_s12 + $0x2c] sm:$0xf]  ;;  %v5340_v56 = vunpack.c.l.bf16 %v161_v48 }
  0x5a   :  { %v3360_v20 = vor.u32 %v4326_v16, %v3357_v17  ;;  %v159_v16 = vld [vmem:[%s6728_s18 + $0x28] sm:$0xff]  }
  0x5b   :  { %652 = vmatmul.bf16.vlgmr.msrb.gmra.mxu0 %v475_v2 }
  0x5c   :  { %666 = vmatmul.bf16.vlgmr.msrb.gmra.mxu1 %v475_v2  ;;  %449 = vmatpush.bf16.msra.mxu3 %v3408_v60 }
  0x5d   :  { %677 = vmatpush.bf16.msrb.mxu2 %v3492_v19  ;;  %861 = vmatpush.bf16.msra.mxu1 %v4304_v26  ;;  %v3341_v19 = vld [vmem:[%s6608_s12 + $0x18] sm:$0xf0] }
  0x5e   :  { %v3344_v21 = vor.u32 %v4322_v18, %v3341_v19 }
  0x61   :  { %678 = vmatpush.bf16.msrb.mxu2 %v3480_v22  ;;  %862 = vmatpush.bf16.msra.mxu1 %v4303_v28 }
  0x65   :  { %679 = vmatpush.bf16.msrb.mxu2 %v3468_v25  ;;  %863 = vmatpush.bf16.msra.mxu1 %v4302_v30 }
  0x68   :  { %680 = vmatmul.bf16.vlgmr.msrb.gmra.mxu2 %v475_v2  ;;  %v4334_v2 = vld [vmem:[%s6608_s12 + $0x6c] sm:$0xf]  ;;  %s6817_s12 = sld [smem:[#allocation69_spill]] }
  0x69   :  { %950 = vmatpush.bf16.msra.mxu2 %v4384_v27  ;;  %864 = vmatpush.bf16.msra.mxu1 %v4301_v33  ;;  %v3392_v6 = vor.u32 %v4334_v2, %v3389_v3 }
  0x6b   :  { %450 = vmatpush.bf16.msra.mxu3 %v3392_v6 }
  0x6d   :  { %951 = vmatpush.bf16.msra.mxu2 %v4383_v29  ;;  %865 = vmatpush.bf16.msra.mxu1 %v4300_v38 }
  0x6f   :  { %451 = vmatpush.bf16.msra.mxu3 %v3376_v12 }
  0x71   :  { %952 = vmatpush.bf16.msra.mxu2 %v4382_v31  ;;  %866 = vmatpush.bf16.msra.mxu1 %v4299_v43  ;;  %v163_v31 = vld [vmem:[%s6728_s18 + $0x38] sm:$0xff]  }
  0x72   :  { %v5318_v41 = vunpack.c.l.bf16 %v163_v31  ;;  %v5320_v42 = vunpack.c.h.bf16 %v163_v31 }
  0x73   :  { %452 = vmatpush.bf16.msra.mxu3 %v3360_v20  ;;  %v5377_v20 = vunpack.c.l.bf16 %v157_v8 }
  0x75   :  { %953 = vmatpush.bf16.msra.mxu2 %v4381_v34  ;;  %867 = vmatpush.bf16.msra.mxu1 %v4298_v53  ;;  %v179_v34 = vld [vmem:[%s6728_s18 + $0x78] sm:$0xff]   ;;  %v511_v53 = vperm.slane %v5316_v40, 1 }
  0x77   :  { %453 = vmatpush.bf16.msra.mxu3 %v3344_v21  ;;  %v5379_v21 = vunpack.c.h.bf16 %v157_v8 }
  0x79   :  { %954 = vmatpush.bf16.msra.mxu2 %v4380_v39  ;;  %868 = vmatpush.bf16.msra.mxu1 %v4297_v61 }
  0x7a   :  { %454 = vmatmul.bf16.vlgmr.msra.gmra.mxu3 %v5005_v58 }
  0x7d   :  { %955 = vmatpush.bf16.msra.mxu2 %v4379_v44 }
  0x81   :  { %956 = vmatpush.bf16.msra.mxu2 %v4378_v54  ;;  %v177_v54 = vld [vmem:[%s6728_s18 + $0x70] sm:$0xff]  }
  0x85   :  { %957 = vmatpush.bf16.msra.mxu2 %v4377_v62 }
  0x8a   :  { %459 = vmatmul.bf16.gmra.mxu3 %v5087_v32 }
  0xb8   :  { %v398_v46 = vpop.f32.mrf.mxu0 }
  0xb9   :  { %v417_v47 = vpop.f32.mrf.mxu1  ;;  %v399_v57 = vadd.f32 %v398_v46, %v221_v50  ;;  %v5322_v46 = vunpack.c.l.bf16 %v179_v34 }
  0xba   :  { %v418_v59 = vadd.f32 %v417_v47, %v222_v51  ;;  %v5324_v47 = vunpack.c.h.bf16 %v179_v34 }
  0xbc   :  { %v465_v4 = vpack.c.bf16 %v418_v59, %v399_v57 }
  0xbe   :  { %v1199_v10 = vunpack.c.h.b16 %v465_v4  ;;  %v1107_v33 = vunpack.c.l.b16 %v465_v4 }
  0xc0   :  { %v400_v63 = vpop.f32.mrf.mxu0 }
  0xc1   :  { %v401_v0 = vadd.f32 %v400_v63, %v221_v50  ;;  %v419_v1 = vpop.f32.mrf.mxu1  ;;  %v5352_v63 = vunpack.c.h.bf16 %v161_v48 }
  0xc2   :  { %v420_v5 = vadd.f32 %v419_v1, %v222_v51  ;;  %v5356_v1 = vunpack.c.h.bf16 %v177_v54 }
  0xc4   :  { %v467_v7 = vpack.c.bf16 %v420_v5, %v401_v0  ;;  %v5354_v0 = vunpack.c.l.bf16 %v177_v54  ;;  %v171_v54 = vld [vmem:[%s6728_s18 + $0x58] sm:$0xff]  }
  0xc6   :  { %v1200_v11 = vunpack.c.h.b16 %v467_v7  ;;  %v1108_v29 = vunpack.c.l.b16 %v467_v7 }
  0xc8   :  { %v5292_v13 = vpack.c.b16 %v1200_v11, %v1199_v10  ;;  %v403_v14 = vpop.f32.mrf.mxu0  ;;  %v1111_v39 = vpack.c.b16 %v1108_v29, %v1107_v33 }
  0xc9   :  { %v422_v15 = vpop.f32.mrf.mxu1  ;;  %v404_v22 = vadd.f32 %v403_v14, %v221_v50 }
  0xca   :  { %v423_v23 = vadd.f32 %v422_v15, %v222_v51  ;;  %v5338_v55 = vunpack.c.l.bf16 %v1111_v39  ;;  %v5350_v62 = vunpack.c.h.bf16 %v1111_v39  ;;  %v5397_v29 = vunpack.c.l.bf16 %v5292_v13 }
  0xcc   :  { %v469_v27 = vpack.c.bf16 %v423_v23, %v404_v22  ;;  %v1163_v7 = vmul.f32 %v5340_v56, %v5338_v55  ;;  %v1164_v12 = vmul.f32 %v5352_v63, %v5350_v62  ;;  %v1179_v14 = vmul.f32 %v5354_v0, %v5338_v55 }
  0xcd   :  { %v1180_v15 = vmul.f32 %v5356_v1, %v5350_v62  ;;  %v5381_v22 = vunpack.c.l.bf16 %v173_v9 }
  0xce   :  { %v1109_v35 = vunpack.c.l.b16 %v469_v27  ;;  %v1201_v36 = vunpack.c.h.b16 %v469_v27  ;;  %v5390_v27 = vunpack.c.h.bf16 %v159_v16  ;;  %v1189_v31 = vpack.c.bf16 %v1164_v12, %v1163_v7 }
  0xcf   :  { %v1197_v33 = vpack.c.bf16 %v1180_v15, %v1179_v14  ;;  %v5463_v12 = vunpack.c.h.bf16 %v171_v54  ;;  %v167_v14 = vld [vmem:[%s6728_s18 + $0x48] sm:$0xff]  }
  0xd0   :  { %v405_v24 = vpop.f32.mrf.mxu0 }
  0xd1   :  { %v406_v25 = vadd.f32 %v405_v24, %v221_v50  ;;  %v424_v26 = vpop.f32.mrf.mxu1  ;;  %6736 = vst [vmem:[#allocation18_spill] sm:$0xff] %v5463_v12 }
  0xd2   :  { %v425_v28 = vadd.f32 %v424_v26, %v222_v51  ;;  %v5388_v26 = vunpack.c.l.bf16 %v159_v16 }
  0xd4   :  { %v471_v30 = vpack.c.bf16 %v425_v28, %v406_v25  ;;  %v147_v25 = vld [vmem:[%s6726_s14 + $0x38] sm:$0xff]   ;;  %v175_v28 = vld [vmem:[%s6728_s18 + $0x68] sm:$0xff]  }
  0xd5   :  { %v5404_v39 = vunpack.c.l.bf16 %v175_v28 }
  0xd6   :  { %v1110_v37 = vunpack.c.l.b16 %v471_v30  ;;  %v1202_v38 = vunpack.c.h.b16 %v471_v30  ;;  %v5400_v30 = vunpack.c.h.bf16 %v5292_v13  ;;  %v5412_v13 = vunpack.c.h.bf16 %v147_v25 }
  0xd8   :  { %v1112_v58 = vpack.c.b16 %v1110_v37, %v1109_v35  ;;  %v1204_v43 = vpack.c.b16 %v1202_v38, %v1201_v36  ;;  %v653_v44 = vpop.f32.mrf.mxu0  ;;  %v5402_v38 = vunpack.c.l.bf16 %v147_v25 }
  0xd9   :  { %v667_v49 = vpop.f32.mrf.mxu1  ;;  %v654_v2 = vadd.f32 %v653_v44, %v510_v52  ;;  %v169_v44 = vld [vmem:[%s6728_s18 + $0x50] sm:$0xff]  }
  0xda   :  { %v5329_v50 = vunpack.c.l.bf16 %v1112_v58  ;;  %v5331_v51 = vunpack.c.h.bf16 %v1112_v58  ;;  %v668_v3 = vadd.f32 %v667_v49, %v511_v53  ;;  %v5375_v19 = vunpack.c.l.bf16 %v1204_v43 }
  0xdb   :  { %v5383_v23 = vunpack.c.h.bf16 %v1204_v43  ;;  %v5406_v58 = vunpack.c.h.bf16 %v175_v28  ;;  %v5453_v7 = vunpack.c.l.bf16 %v169_v44 }
  0xdc   :  { %v1165_v57 = vmul.f32 %v5318_v41, %v5329_v50  ;;  %v1166_v59 = vmul.f32 %v5320_v42, %v5331_v51  ;;  %v1181_v60 = vmul.f32 %v5322_v46, %v5329_v50  ;;  %v1182_v61 = vmul.f32 %v5324_v47, %v5331_v51 }
  0xdd   :  { %v686_v17 = vpack.c.bf16 %v668_v3, %v654_v2  ;;  %v5410_v32 = vmul.f32 %v5375_v19, %v5322_v46  ;;  %v5421_v49 = vmul.f32 %v5383_v23, %v5324_v47  ;;  %v1162_v2 = vmul.f32 %v5390_v27, %v5331_v51  ;;  %v145_v3 = vld [vmem:[%s6726_s14 + $0x30] sm:$0xff]   ;;  %6735 = vst [vmem:[#allocation17_spill] sm:$0xff] %v5453_v7 }
  0xde   :  { %v1190_v4 = vpack.c.bf16 %v1166_v59, %v1165_v57  ;;  %v1198_v5 = vpack.c.bf16 %v1182_v61, %v1181_v60  ;;  %v5432_v57 = vmul.f32 %v5397_v29, %v5354_v0  ;;  %v5436_v59 = vmul.f32 %v5400_v30, %v5356_v1 }
  0xdf   :  { %v692_v34 = vunpack.c.h.b16 %v686_v17  ;;  %v770_v35 = vunpack.c.l.b16 %v686_v17  ;;  %6730 = vst [vmem:[#allocation12_spill] sm:$0xff] %v5410_v32  ;;  %v5468_v15 = vunpack.c.l.bf16 %v145_v3  ;;  %v5470_v16 = vunpack.c.h.bf16 %v145_v3  ;;  %v165_v17 = vld [vmem:[%s6728_s18 + $0x40] sm:$0xff]  }
  0xe0   :  { %1259 = vmatpush.bf16.xpose.msrb.mxu1 %v1190_v4  ;;  %1273 = vmatpush.bf16.xpose.msrb.mxu2 %v1198_v5  ;;  %v655_v6 = vpop.f32.mrf.mxu0  ;;  %6731 = vst [vmem:[#allocation13_spill] sm:$0xff] %v5421_v49  ;;  %v1177_v5 = vmul.f32 %v5404_v39, %v5329_v50  ;;  %v1160_v3 = vmul.f32 %v5379_v21, %v5350_v62 }
  0xe1   :  { %v656_v10 = vadd.f32 %v655_v6, %v510_v52  ;;  %v669_v11 = vpop.f32.mrf.mxu1  ;;  %v1161_v52 = vmul.f32 %v5388_v26, %v5329_v50  ;;  %6733 = vst [vmem:[#allocation15_spill] sm:$0xff] %v5432_v57  ;;  %v1178_v6 = vmul.f32 %v5406_v58, %v5331_v51 }
  0xe2   :  { %v670_v18 = vadd.f32 %v669_v11, %v511_v53  ;;  %v5425_v53 = vunpack.c.h.bf16 %v173_v9  ;;  %6734 = vst [vmem:[#allocation16_spill] sm:$0xff] %v5436_v59  ;;  %v5461_v11 = vunpack.c.l.bf16 %v171_v54  ;;  %v5501_v54 = vunpack.c.h.bf16 %v165_v17 }
  0xe3   :  { %6737 = vst [vmem:[#allocation19_spill] sm:$0xff] %v5468_v15  ;;  %v1188_v28 = vpack.c.bf16 %v1162_v2, %v1161_v52  ;;  %v5499_v52 = vunpack.c.l.bf16 %v165_v17  ;;  %v5524_v17 = vmul.f32 %v5383_v23, %v5463_v12 }
  0xe4   :  { %v688_v24 = vpack.c.bf16 %v670_v18, %v656_v10  ;;  %6732 = vst [vmem:[#allocation14_spill] sm:$0xff] %v5425_v53  ;;  %v5477_v18 = vmul.f32 %v5375_v19, %v5404_v39  ;;  %v5505_v2 = vmul.f32 %v5375_v19, %v5461_v11 }
  0xe5   :  { %6738 = vst [vmem:[#allocation20_spill] sm:$0xff] %v5470_v16 }
  0xe6   :  { %v693_v36 = vunpack.c.h.b16 %v688_v24  ;;  %v771_v37 = vunpack.c.l.b16 %v688_v24  ;;  %6739 = vst [vmem:[#allocation21_spill] sm:$0xff] %v5477_v18  ;;  %v5481_v24 = vmul.f32 %v5383_v23, %v5406_v58  ;;  %v5557_v18 = vmul.f32 %v5400_v30, %v5501_v54 }
  0xe7   :  { %6744 = vst [vmem:[#allocation26_spill] sm:$0xff] %v5505_v2 }
  0xe8   :  { %v694_v43 = vpack.c.b16 %v693_v36, %v692_v34  ;;  %1260 = vmatpush.bf16.xpose.msrb.mxu1 %v1189_v31  ;;  %1274 = vmatpush.bf16.xpose.msrb.mxu2 %v1197_v33  ;;  %v5417_v48 = vpack.c.b16 %v771_v37, %v770_v35  ;;  %6740 = vst [vmem:[#allocation22_spill] sm:$0xff] %v5481_v24  ;;  %v5491_v35 = vunpack.c.h.bf16 %v169_v44  ;;  %v5493_v36 = vunpack.c.l.bf16 %v167_v14 }
  0xe9   :  { %v5485_v31 = vmul.f32 %v5397_v29, %v5381_v22  ;;  %v5489_v33 = vmul.f32 %v5400_v30, %v5425_v53  ;;  %v1196_v34 = vpack.c.bf16 %v1178_v6, %v1177_v5  ;;  %v5495_v37 = vunpack.c.h.bf16 %v167_v14  ;;  %v155_v6 = vld [vmem:[%s6728_s18 + $0x18] sm:$0xff]   ;;  %6745 = vst [vmem:[#allocation27_spill] sm:$0xff] %v5524_v17 }
  0xea   :  { %v5438_v60 = vunpack.c.l.bf16 %v694_v43  ;;  %v5440_v61 = vunpack.c.h.bf16 %v694_v43  ;;  %6743 = vst [vmem:[#allocation25_spill] sm:$0xff] %v5491_v35  ;;  %v1159_v43 = vmul.f32 %v5377_v20, %v5338_v55  ;;  %v1175_v5 = vmul.f32 %v5381_v22, %v5338_v55 }
  0xeb   :  { %6741 = vst [vmem:[#allocation23_spill] sm:$0xff] %v5485_v31  ;;  %v5541_v14 = vmul.f32 %v5375_v19, %v5493_v36  ;;  %v5545_v8 = vmul.f32 %v5383_v23, %v5495_v37  ;;  %v5547_v4 = vunpack.c.l.bf16 %v155_v6  ;;  %v5559_v57 = vunpack.c.h.bf16 %v155_v6 }
  0xec   :  { %v728_v9 = vmul.f32 %v5402_v38, %v5438_v60  ;;  %v729_v10 = vmul.f32 %v5412_v13, %v5440_v61  ;;  %6742 = vst [vmem:[#allocation24_spill] sm:$0xff] %v5489_v33  ;;  %v726_v44 = vmul.f32 %v5468_v15, %v5438_v60  ;;  %v5553_v33 = vmul.f32 %v5397_v29, %v5499_v52 }
  0xed   :  { %6748 = vst [vmem:[#allocation30_spill] sm:$0xff] %v5541_v14  ;;  %v1187_v24 = vpack.c.bf16 %v1160_v3, %v1159_v43  ;;  %v1158_v6 = vmul.f32 %v5559_v57, %v5331_v51 }
  0xee   :  { %v737_v25 = vpack.c.bf16 %v729_v10, %v728_v9  ;;  %v727_v10 = vmul.f32 %v5470_v16, %v5440_v61  ;;  %v5537_v9 = vmul.f32 %v5400_v30, %v5491_v35  ;;  %6749 = vst [vmem:[#allocation31_spill] sm:$0xff] %v5545_v8 }
  0xef   :  { %6750 = vst [vmem:[#allocation32_spill] sm:$0xff] %v5553_v33 }
  0xf0   :  { %774 = vmatpush.bf16.xpose.msrb.mxu3 %v737_v25  ;;  %1261 = vmatpush.bf16.xpose.msrb.mxu1 %v1188_v28  ;;  %v5528_v25 = vmul.f32 %v5397_v29, %v5453_v7  ;;  %v1176_v28 = vmul.f32 %v5425_v53, %v5350_v62  ;;  %6747 = vst [vmem:[#allocation29_spill] sm:$0xff] %v5537_v9 }
  0xf1   :  { %1275 = vmatpush.bf16.xpose.msrb.mxu2 %v1196_v34  ;;  %v143_v34 = vld [vmem:[%s6726_s14 + $0x28] sm:$0xff]   ;;  %6751 = vst [vmem:[#allocation33_spill] sm:$0xff] %v5557_v18  ;;  %v736_v49 = vpack.c.bf16 %v727_v10, %v726_v44  ;;  %v1157_v44 = vmul.f32 %v5547_v4, %v5329_v50  ;;  %v153_v10 = vld [vmem:[%s6728_s18 + $0x10] sm:$0xff]  }
  0xf2   :  { %6746 = vst [vmem:[#allocation28_spill] sm:$0xff] %v5528_v25  ;;  %v5565_v53 = vunpack.c.l.bf16 %v143_v34  ;;  %v5567_v31 = vunpack.c.h.bf16 %v143_v34  ;;  %v1195_v17 = vpack.c.bf16 %v1176_v28, %v1175_v5  ;;  %v141_v5 = vld [vmem:[%s6726_s14 + $0x20] sm:$0xff]   ;;  %v5591_v28 = vunpack.c.h.bf16 %v153_v10 }
  0xf3   :  { %v1186_v2 = vpack.c.bf16 %v1158_v6, %v1157_v44  ;;  %v5593_v32 = vunpack.c.l.bf16 %v141_v5  ;;  %v5595_v59 = vunpack.c.h.bf16 %v141_v5  ;;  %v139_v44 = vld [vmem:[%s6726_s14 + $0x18] sm:$0xff]  }
  0xf4   :  { %6752 = vst [vmem:[#allocation34_spill] sm:$0xff] %v5565_v53  ;;  %v724_v43 = vmul.f32 %v5565_v53, %v5438_v60  ;;  %v725_v3 = vmul.f32 %v5567_v31, %v5440_v61  ;;  %v5621_v8 = vunpack.c.h.bf16 %v139_v44 }
  0xf5   :  { %6753 = vst [vmem:[#allocation35_spill] sm:$0xff] %v5567_v31  ;;  %v722_v18 = vmul.f32 %v5593_v32, %v5438_v60  ;;  %v723_v14 = vmul.f32 %v5595_v59, %v5440_v61 }
  0xf6   :  { %v735_v34 = vpack.c.bf16 %v725_v3, %v724_v43  ;;  %6754 = vst [vmem:[#allocation36_spill] sm:$0xff] %v5593_v32  ;;  %v1156_v43 = vmul.f32 %v5591_v28, %v5350_v62  ;;  %v151_v3 = vld [vmem:[%s6728_s18 + $0x8] sm:$0xff]  }
  0xf7   :  { %6755 = vst [vmem:[#allocation37_spill] sm:$0xff] %v5595_v59  ;;  %v5615_v6 = vunpack.c.l.bf16 %v151_v3 }
  0xf8   :  { %775 = vmatpush.bf16.xpose.msrb.mxu3 %v736_v49  ;;  %1262 = vmatpush.bf16.xpose.msrb.mxu1 %v1187_v24  ;;  %v1173_v49 = vmul.f32 %v5461_v11, %v5329_v50  ;;  %v1174_v24 = vmul.f32 %v5463_v12, %v5331_v51  ;;  %6759 = vst [vmem:[#allocation41_spill] sm:$0xff] %v5621_v8 }
  0xf9   :  { %1276 = vmatpush.bf16.xpose.msrb.mxu2 %v1195_v17  ;;  %v5589_v17 = vunpack.c.l.bf16 %v153_v10  ;;  %6756 = vst [vmem:[#allocation38_spill] sm:$0xff] %v5615_v6 }
  0xfa   :  { %v1194_v33 = vpack.c.bf16 %v1174_v24, %v1173_v49  ;;  %v5617_v49 = vunpack.c.h.bf16 %v151_v3  ;;  %v734_v24 = vpack.c.bf16 %v723_v14, %v722_v18  ;;  %v1153_v3 = vmul.f32 %v5615_v6, %v5329_v50  ;;  %v149_v14 = vld [vmem:[%s6728_s18] sm:$0xff]  }
  0xfb   :  { %v1155_v10 = vmul.f32 %v5589_v17, %v5338_v55 }
  0xfc   :  { %6757 = vst [vmem:[#allocation39_spill] sm:$0xff] %v5617_v49  ;;  %v1154_v18 = vmul.f32 %v5617_v49, %v5331_v51 }
  0xfd   :  { %v1185_v5 = vpack.c.bf16 %v1156_v43, %v1155_v10  ;;  %v1169_v10 = vmul.f32 %v5493_v36, %v5329_v50  ;;  %v137_v43 = vld [vmem:[%s6726_s14 + $0x10] sm:$0xff]  }
 0x100   :  { %776 = vmatpush.bf16.xpose.msrb.mxu3 %v735_v34  ;;  %1263 = vmatpush.bf16.xpose.msrb.mxu1 %v1186_v2  ;;  %v1171_v2 = vmul.f32 %v5453_v7, %v5338_v55  ;;  %v5619_v34 = vunpack.c.l.bf16 %v139_v44  ;;  %v5647_v7 = vunpack.c.h.bf16 %v137_v43 }
 0x101   :  { %1277 = vmatpush.bf16.xpose.msrb.mxu2 %v1194_v33  ;;  %v1172_v33 = vmul.f32 %v5491_v35, %v5350_v62  ;;  %v721_v35 = vmul.f32 %v5621_v8, %v5440_v61 }
 0x102   :  { %6758 = vst [vmem:[#allocation40_spill] sm:$0xff] %v5619_v34  ;;  %v720_v9 = vmul.f32 %v5619_v34, %v5438_v60 }
 0x103   :  { %v1193_v25 = vpack.c.bf16 %v1172_v33, %v1171_v2  ;;  %v5641_v2 = vunpack.c.l.bf16 %v149_v14  ;;  %v5643_v33 = vunpack.c.h.bf16 %v149_v14  ;;  %6763 = vst [vmem:[#allocation45_spill] sm:$0xff] %v5647_v7 }
 0x104   :  { %v733_v44 = vpack.c.bf16 %v721_v35, %v720_v9  ;;  %v1167_v9 = vmul.f32 %v5499_v52, %v5338_v55 }
 0x105   :  { %6760 = vst [vmem:[#allocation42_spill] sm:$0xff] %v5641_v2  ;;  %v1151_v14 = vmul.f32 %v5641_v2, %v5338_v55  ;;  %v1152_v35 = vmul.f32 %v5643_v33, %v5350_v62 }
 0x106   :  { %6761 = vst [vmem:[#allocation43_spill] sm:$0xff] %v5643_v33 }
 0x108   :  { %777 = vmatpush.bf16.xpose.msrb.mxu3 %v734_v24  ;;  %1264 = vmatpush.bf16.xpose.msrb.mxu1 %v1185_v5  ;;  %v1184_v24 = vpack.c.bf16 %v1154_v18, %v1153_v3  ;;  %v5645_v5 = vunpack.c.l.bf16 %v137_v43  ;;  %v1168_v3 = vmul.f32 %v5501_v54, %v5350_v62 }
 0x109   :  { %1278 = vmatpush.bf16.xpose.msrb.mxu2 %v1193_v25  ;;  %v1170_v25 = vmul.f32 %v5495_v37, %v5331_v51  ;;  %v719_v51 = vmul.f32 %v5647_v7, %v5440_v61 }
 0x10a   :  { %6762 = vst [vmem:[#allocation44_spill] sm:$0xff] %v5645_v5  ;;  %v718_v50 = vmul.f32 %v5645_v5, %v5438_v60 }
 0x10b   :  { %v1192_v12 = vpack.c.bf16 %v1170_v25, %v1169_v10  ;;  %v1183_v10 = vpack.c.bf16 %v1152_v35, %v1151_v14 }
 0x10c   :  { %v732_v18 = vpack.c.bf16 %v719_v51, %v718_v50 }
 0x110   :  { %778 = vmatpush.bf16.xpose.msrb.mxu3 %v733_v44  ;;  %1265 = vmatpush.bf16.xpose.msrb.mxu1 %v1184_v24  ;;  %v1191_v44 = vpack.c.bf16 %v1168_v3, %v1167_v9  ;;  %v133_v24 = vld [vmem:[%s6726_s14] sm:$0xff]   ;;  %v1225_v3 = vmul.f32 %v5375_v19, %v5318_v41 }
 0x111   :  { %1279 = vmatpush.bf16.xpose.msrb.mxu2 %v1192_v12  ;;  %v135_v12 = vld [vmem:[%s6726_s14 + $0x8] sm:$0xff]   ;;  %v5675_v51 = vunpack.c.l.bf16 %v133_v24  ;;  %v5677_v14 = vunpack.c.h.bf16 %v133_v24 }
 0x112   :  { %v5664_v25 = vunpack.c.l.bf16 %v135_v12  ;;  %v5666_v43 = vunpack.c.h.bf16 %v135_v12  ;;  %v1226_v12 = vmul.f32 %v5383_v23, %v5320_v42 }
 0x113   :  { %6766 = vst [vmem:[#allocation48_spill] sm:$0xff] %v5675_v51  ;;  %v714_v35 = vmul.f32 %v5675_v51, %v5438_v60  ;;  %v715_v9 = vmul.f32 %v5677_v14, %v5440_v61 }
 0x114   :  { %6764 = vst [vmem:[#allocation46_spill] sm:$0xff] %v5664_v25  ;;  %v716_v55 = vmul.f32 %v5664_v25, %v5438_v60  ;;  %v717_v62 = vmul.f32 %v5666_v43, %v5440_v61  ;;  %v1221_v61 = vmul.f32 %v5375_v19, %v5388_v26 }
 0x115   :  { %6765 = vst [vmem:[#allocation47_spill] sm:$0xff] %v5666_v43 }
 0x116   :  { %v731_v50 = vpack.c.bf16 %v717_v62, %v716_v55  ;;  %6767 = vst [vmem:[#allocation49_spill] sm:$0xff] %v5677_v14  ;;  %v1224_v55 = vmul.f32 %v5400_v30, %v5352_v63  ;;  %v1222_v62 = vmul.f32 %v5383_v23, %v5390_v27 }
 0x118   :  { %779 = vmatpush.bf16.xpose.msrb.mxu3 %v732_v18  ;;  %1266 = vmatpush.bf16.xpose.msrb.mxu1 %v1183_v10  ;;  %v730_v18 = vpack.c.bf16 %v715_v9, %v714_v35  ;;  %v1250_v10 = vpack.c.bf16 %v1226_v12, %v1225_v3  ;;  %v1248_v24 = vpack.c.bf16 %v1222_v62, %v1221_v61 }
 0x119   :  { %1280 = vmatpush.bf16.xpose.msrb.mxu2 %v1191_v44  ;;  %v1223_v44 = vmul.f32 %v5397_v29, %v5340_v56  ;;  %v1220_v35 = vmul.f32 %v5400_v30, %v5379_v21  ;;  %v1217_v3 = vmul.f32 %v5375_v19, %v5547_v4  ;;  %v1218_v12 = vmul.f32 %v5383_v23, %v5559_v57 }
 0x11a   :  { %v1211_v62 = vmul.f32 %v5397_v29, %v5641_v2 }
 0x11b   :  { %v1249_v60 = vpack.c.bf16 %v1224_v55, %v1223_v44  ;;  %v1213_v55 = vmul.f32 %v5375_v19, %v5615_v6 }
 0x120   :  { %780 = vmatpush.bf16.xpose.msrb.mxu3 %v731_v50  ;;  %v1219_v50 = vmul.f32 %v5397_v29, %v5377_v20 }
 0x122   :  { %v1247_v9 = vpack.c.bf16 %v1220_v35, %v1219_v50  ;;  %v436_v35 = vpop.f32.mrf.mxu2 }
 0x128   :  { %781 = vmatpush.bf16.xpose.msrb.mxu3 %v730_v18  ;;  %v1246_v18 = vpack.c.bf16 %v1218_v12, %v1217_v3  ;;  %v224_v3 = vperm.slane %v5252_v45, 3  ;;  %v455_v12 = vpop.f32.mrf.mxu3 }
 0x12f   :  { %782 = vmatmul.bf16.vlgmr.msrb.gmra.mxu3 %v5417_v48  ;;  %v1215_v48 = vmul.f32 %v5397_v29, %v5589_v17 }
 0x130   :  { %1307 = vmatpush.bf16.msra.mxu3 %v1250_v10  ;;  %v1216_v10 = vmul.f32 %v5400_v30, %v5591_v28 }
 0x132   :  { %v1245_v44 = vpack.c.bf16 %v1216_v10, %v1215_v48 }
 0x134   :  { %1308 = vmatpush.bf16.msra.mxu3 %v1249_v60  ;;  %v1214_v60 = vmul.f32 %v5383_v23, %v5617_v49  ;;  %v456_v23 = vadd.f32 %v455_v12, %v224_v3 }
 0x136   :  { %v1244_v61 = vpack.c.bf16 %v1214_v60, %v1213_v55 }
 0x138   :  { %1309 = vmatpush.bf16.msra.mxu3 %v1248_v24  ;;  %v1212_v24 = vmul.f32 %v5400_v30, %v5643_v33 }
 0x13a   :  { %v1243_v50 = vpack.c.bf16 %v1212_v24, %v1211_v62 }
 0x13c   :  { %1310 = vmatpush.bf16.msra.mxu3 %v1247_v9  ;;  %v223_v9 = vperm.slane %v5252_v45, 2 }
 0x13e   :  { %v437_v19 = vadd.f32 %v436_v35, %v223_v9 }
 0x140   :  { %1311 = vmatpush.bf16.msra.mxu3 %v1246_v18  ;;  %v438_v18 = vpop.f32.mrf.mxu2  ;;  %v466_v48 = vpack.c.bf16 %v456_v23, %v437_v19 }
 0x141   :  { %v439_v10 = vadd.f32 %v438_v18, %v223_v9 }
 0x142   :  { %v2512_v60 = vunpack.c.l.b16 %v466_v48  ;;  %v2572_v2 = vunpack.c.h.b16 %v466_v48 }
 0x144   :  { %1312 = vmatpush.bf16.msra.mxu3 %v1245_v44  ;;  %v457_v44 = vpop.f32.mrf.mxu3 }
 0x145   :  { %v458_v55 = vadd.f32 %v457_v44, %v224_v3 }
 0x147   :  { %v468_v30 = vpack.c.bf16 %v458_v55, %v439_v10  ;;  %v512_v55 = vperm.slane %v5316_v40, 2 }
 0x148   :  { %1313 = vmatpush.bf16.msra.mxu3 %v1244_v61  ;;  %v441_v29 = vpop.f32.mrf.mxu2 }
 0x149   :  { %v2513_v61 = vunpack.c.l.b16 %v468_v30  ;;  %v2573_v62 = vunpack.c.h.b16 %v468_v30  ;;  %v442_v33 = vadd.f32 %v441_v29, %v223_v9 }
 0x14b   :  { %v5718_v24 = vpack.c.b16 %v2513_v61, %v2512_v60 }
 0x14c   :  { %1314 = vmatpush.bf16.msra.mxu3 %v1243_v50  ;;  %v2576_v50 = vpack.c.b16 %v2573_v62, %v2572_v2  ;;  %v460_v49 = vpop.f32.mrf.mxu3 }
 0x14d   :  { %v461_v45 = vadd.f32 %v460_v49, %v224_v3 }
 0x14f   :  { %v5720_v35 = vpack.c.bf16 %v461_v45, %v442_v33  ;;  %v127_v45 = vld [vmem:[%s6768_s25] sm:$0xff] }
 0x150   :  { %v443_v6 = vpop.f32.mrf.mxu2 }
 0x151   :  { %v444_v12 = vadd.f32 %v443_v6, %v223_v9  ;;  %v2574_v23 = vunpack.c.h.b16 %v5720_v35 }
 0x154   :  { %v462_v19 = vpop.f32.mrf.mxu3 }
 0x155   :  { %v463_v18 = vadd.f32 %v462_v19, %v224_v3 }
 0x157   :  { %v5723_v44 = vpack.c.bf16 %v463_v18, %v444_v12 }
 0x158   :  { %v681_v60 = vpop.f32.mrf.mxu2 }
 0x159   :  { %v2575_v48 = vunpack.c.h.b16 %v5723_v44  ;;  %v682_v2 = vadd.f32 %v681_v60, %v512_v55 }
 0x15b   :  { %v2577_v10 = vpack.c.b16 %v2575_v48, %v2574_v23  ;;  %v687_v29 = vpack.c.bf16 %v682_v2, %v682_v2 }
 0x15d   :  { %v740_v33 = vunpack.c.l.b16 %v687_v29 }
 0x160   :  { %v683_v30 = vpop.f32.mrf.mxu2 }
 0x161   :  { %v684_v49 = vadd.f32 %v683_v30, %v512_v55  ;;  %v5749_v30 = vunpack.c.l.bf16 %v2576_v50 }
 0x163   :  { %v689_v61 = vpack.c.bf16 %v684_v49, %v684_v49  ;;  %6769 = vst [vmem:[#allocation50_spill] sm:$0xff] %v5749_v30  ;;  %v5751_v49 = vunpack.c.h.bf16 %v2576_v50 }
 0x165   :  { %v741_v62 = vunpack.c.l.b16 %v689_v61  ;;  %6770 = vst [vmem:[#allocation51_spill] sm:$0xff] %v5751_v49 }
 0x167   :  { %v742_v6 = vpack.c.b16 %v741_v62, %v740_v33  ;;  %v128_v33 = vld [vmem:[%s6768_s25 + $0x8] sm:$0xff] }
 0x169   :  { %v5727_v9 = vunpack.c.l.bf16 %v742_v6  ;;  %v5729_v3 = vunpack.c.h.bf16 %v742_v6 }
 0x16b   :  { %v760_v40 = vmul.f32 %v5727_v9, %v5402_v38  ;;  %v761_v12 = vmul.f32 %v5729_v3, %v5412_v13  ;;  %v758_v19 = vmul.f32 %v5727_v9, %v5468_v15  ;;  %v759_v18 = vmul.f32 %v5729_v3, %v5470_v16 }
 0x16c   :  { %v756_v2 = vmul.f32 %v5727_v9, %v5565_v53  ;;  %v757_v29 = vmul.f32 %v5729_v3, %v5567_v31  ;;  %v754_v62 = vmul.f32 %v5727_v9, %v5593_v32  ;;  %v755_v6 = vmul.f32 %v5729_v3, %v5595_v59  ;;  %v4392_v31 = vld [vmem:[%s6606_s10 + $0x38] sm:$0xff]  ;;  %v6794_v32 = vld [vmem:[#allocation12_spill] sm:$0xff] }
 0x16d   :  { %v769_v48 = vpack.c.bf16 %v761_v12, %v760_v40  ;;  %v768_v60 = vpack.c.bf16 %v759_v18, %v758_v19  ;;  %v5762_v12 = vunpack.c.h.bf16 %v2577_v10  ;;  %v752_v50 = vmul.f32 %v5727_v9, %v5619_v34 }
 0x16e   :  { %v767_v61 = vpack.c.bf16 %v757_v29, %v756_v2  ;;  %v753_v18 = vmul.f32 %v5729_v3, %v5621_v8  ;;  %v5783_v2 = vmul.f32 %v5749_v30, %v5381_v22  ;;  %v6785_v8 = vld [vmem:[#allocation17_spill] sm:$0xff]  ;;  %v5853_v59 = vmul.f32 %v5751_v49, %v5501_v54 }
 0x16f   :  { %799 = vmatpush.bf16.msra.mxu0 %v769_v48  ;;  %6772 = vst [vmem:[#allocation53_spill] sm:$0xff] %v5762_v12  ;;  %v5772_v48 = vmul.f32 %v5749_v30, %v5354_v0  ;;  %v5825_v34 = vmul.f32 %v5749_v30, %v6785_v8 }
 0x170   :  { %6775 = vst [vmem:[#allocation56_spill] sm:$0xff] %v5783_v2  ;;  %v765_v29 = vpack.c.bf16 %v753_v18, %v752_v50  ;;  %v5805_v18 = vmul.f32 %v5762_v12, %v5406_v58 }
 0x171   :  { %6773 = vst [vmem:[#allocation54_spill] sm:$0xff] %v5772_v48 }
 0x172   :  { %6779 = vst [vmem:[#allocation60_spill] sm:$0xff] %v5805_v18 }
 0x173   :  { %800 = vmatpush.bf16.msra.mxu0 %v768_v60  ;;  %v5776_v60 = vmul.f32 %v5751_v49, %v5356_v1  ;;  %6786 = vst [vmem:[#allocation17_spill] sm:$0xff] %v5825_v34 }
 0x174   :  { %6792 = vst [vmem:[#allocation65_spill] sm:$0xff] %v5853_v59  ;;  %v6797_v59 = vld [vmem:[#allocation15_spill] sm:$0xff] }
 0x175   :  { %6774 = vst [vmem:[#allocation55_spill] sm:$0xff] %v5776_v60  ;;  %v5841_v60 = vmul.f32 %v5762_v12, %v5495_v37 }
 0x177   :  { %801 = vmatpush.bf16.msra.mxu0 %v767_v61  ;;  %6790 = vst [vmem:[#allocation63_spill] sm:$0xff] %v5841_v60 }
 0x1b2   :  { %v783_v23 = vpop.f32.mrf.mxu3 }
 0x1b3   :  { %v5742_v55 = vadd.f32 %v783_v23, %v127_v45  ;;  %v5760_v45 = vunpack.c.l.bf16 %v2577_v10  ;;  %v766_v23 = vpack.c.bf16 %v755_v6, %v754_v62  ;;  %v750_v10 = vmul.f32 %v5727_v9, %v5645_v5  ;;  %v6780_v5 = vld [vmem:[#allocation14_spill] sm:$0xff] }
 0x1b4   :  { %v5793_v62 = vmul.f32 %v5762_v12, %v5324_v47  ;;  %v748_v6 = vmul.f32 %v5727_v9, %v5664_v25 }
 0x1b5   :  { %788 = vmax.xlane.f32.xlu0 %v5742_v55  ;;  %6771 = vst [vmem:[#allocation52_spill] sm:$0xff] %v5760_v45  ;;  %v5789_v61 = vmul.f32 %v5760_v45, %v5322_v46  ;;  %802 = vmatpush.bf16.msra.mxu0 %v766_v23  ;;  %v5801_v50 = vmul.f32 %v5760_v45, %v5404_v39 }
 0x1b6   :  { %6777 = vst [vmem:[#allocation58_spill] sm:$0xff] %v5793_v62  ;;  %v5811_v23 = vmul.f32 %v5751_v49, %v6780_v5  ;;  %v5815_v25 = vmul.f32 %v5760_v45, %v5461_v11  ;;  %v5833_v62 = vmul.f32 %v5760_v45, %v5493_v36  ;;  %v749_v45 = vmul.f32 %v5729_v3, %v5666_v43 }
 0x1b7   :  { %6776 = vst [vmem:[#allocation57_spill] sm:$0xff] %v5789_v61 }
 0x1b8   :  { %6778 = vst [vmem:[#allocation59_spill] sm:$0xff] %v5801_v50  ;;  %v5845_v50 = vmul.f32 %v5749_v30, %v5499_v52 }
 0x1b9   :  { %6781 = vst [vmem:[#allocation14_spill] sm:$0xff] %v5811_v23  ;;  %803 = vmatpush.bf16.msra.mxu0 %v765_v29  ;;  %v747_v29 = vmul.f32 %v5729_v3, %v5677_v14 }
 0x1ba   :  { %v785_v40 = vpop.f32.mrf.mxu3  ;;  %6782 = vst [vmem:[#allocation61_spill] sm:$0xff] %v5815_v25  ;;  %v4391_v25 = vld [vmem:[%s6606_s10 + $0x30] sm:$0xff] }
 0x1bb   :  { %v5764_v19 = vadd.f32 %v785_v40, %v128_v33  ;;  %v751_v33 = vmul.f32 %v5729_v3, %v5647_v7  ;;  %v6783_v40 = vld [vmem:[#allocation18_spill] sm:$0xff]  ;;  %v6787_v7 = vld [vmem:[#allocation25_spill] sm:$0xff]  ;;  %6789 = vst [vmem:[#allocation62_spill] sm:$0xff] %v5833_v62 }
 0x1bc   :  { %v5819_v48 = vmul.f32 %v5762_v12, %v6783_v40  ;;  %v5829_v61 = vmul.f32 %v5751_v49, %v6787_v7  ;;  %6791 = vst [vmem:[#allocation64_spill] sm:$0xff] %v5845_v50  ;;  %v4389_v3 = vld [vmem:[%s6606_s10 + $0x20] sm:$0xff] }
 0x1bd   :  { %790 = vmax.xlane.f32.xlu0 %v5764_v19  ;;  %v764_v18 = vpack.c.bf16 %v751_v33, %v750_v10  ;;  %v746_v10 = vmul.f32 %v5727_v9, %v5675_v51  ;;  %v4390_v9 = vld [vmem:[%s6606_s10 + $0x28] sm:$0xff] }
 0x1be   :  { %6784 = vst [vmem:[#allocation18_spill] sm:$0xff] %v5819_v48  ;;  %v763_v48 = vpack.c.bf16 %v749_v45, %v748_v6  ;;  %v4388_v45 = vld [vmem:[%s6606_s10 + $0x18] sm:$0xff] }
 0x1bf   :  { %6788 = vst [vmem:[#allocation25_spill] sm:$0xff] %v5829_v61  ;;  %804 = vmatpush.bf16.msra.mxu0 %v764_v18  ;;  %v762_v33 = vpack.c.bf16 %v747_v29, %v746_v10 }
 0x1c3   :  { %805 = vmatpush.bf16.msra.mxu0 %v763_v48  ;;  %v4385_v48 = vld [vmem:[%s6606_s10] sm:$0xff] }
 0x1c7   :  { %806 = vmatpush.bf16.msra.mxu0 %v762_v33 }
 0x1cb   :  { %1088 = vmatpush.bf16.msrb.mxu0 %v4392_v31  ;;  %v4387_v31 = vld [vmem:[%s6606_s10 + $0x10] sm:$0xff] }
 0x1cf   :  { %1089 = vmatpush.bf16.msrb.mxu0 %v4391_v25  ;;  %v4386_v25 = vld [vmem:[%s6606_s10 + $0x8] sm:$0xff] }
 0x1d3   :  { %1090 = vmatpush.bf16.msrb.mxu0 %v4390_v9 }
 0x1d7   :  { %1091 = vmatpush.bf16.msrb.mxu0 %v4389_v3 }
 0x1db   :  { %1092 = vmatpush.bf16.msrb.mxu0 %v4388_v45 }
 0x1df   :  { %1093 = vmatpush.bf16.msrb.mxu0 %v4387_v31 }
 0x1e3   :  { %1094 = vmatpush.bf16.msrb.mxu0 %v4386_v25  ;;  %v6793_v25 = vld [vmem:[#allocation13_spill] sm:$0xff] }
 0x1e4   :  { %v6795_v50 = vpack.c.bf16 %v6793_v25, %v6794_v32  ;;  %v6812_v25 = vld [vmem:[#allocation30_spill] sm:$0xff] }
 0x1e7   :  { %1095 = vmatpush.bf16.msrb.mxu0 %v4385_v48  ;;  %v6796_v48 = vld [vmem:[#allocation16_spill] sm:$0xff] }
 0x1e8   :  { %v6798_v62 = vpack.c.bf16 %v6796_v48, %v6797_v59  ;;  %v6815_v48 = vld [vmem:[#allocation32_spill] sm:$0xff] }
 0x228   :  { %v789_v6 = vpop.xlane.xlu0 %788 }
 0x229   :  { %v792_v18 = vsub.f32 %v5742_v55, %v789_v6  ;;  %v6799_v55 = vld [vmem:[#allocation22_spill] sm:$0xff]  ;;  %v6800_v6 = vld [vmem:[#allocation21_spill] sm:$0xff] }
 0x22b   :  { %v794_v10 = vmul.f32 1.442695, %v792_v18  ;;  %v6801_v18 = vpack.c.bf16 %v6799_v55, %v6800_v6 }
 0x22d   :  { %4539 = vpow2.f32 %v794_v10  ;;  %v6803_v10 = vld [vmem:[#allocation23_spill] sm:$0xff] }
 0x230   :  { %v791_v29 = vpop.xlane.xlu0 %790 }
 0x231   :  { %v793_v33 = vsub.f32 %v5764_v19, %v791_v29  ;;  %v6802_v19 = vld [vmem:[#allocation24_spill] sm:$0xff] }
 0x232   :  { %v6804_v29 = vpack.c.bf16 %v6802_v19, %v6803_v10 }
 0x233   :  { %v796_v9 = vmul.f32 1.442695, %v793_v33  ;;  %v4540_v3 = vpop.eup %4539  ;;  %v6805_v33 = vld [vmem:[#allocation27_spill] sm:$0xff] }
 0x235   :  { %4541 = vpow2.f32 %v796_v9  ;;  %v6806_v9 = vld [vmem:[#allocation26_spill] sm:$0xff] }
 0x23b   :  { %v4542_v45 = vpop.eup %4541 }
 0x23c   :  { %v798_v31 = vpack.c.bf16 %v4542_v45, %v4540_v3  ;;  %v6807_v3 = vpack.c.bf16 %v6805_v33, %v6806_v9  ;;  %v6808_v45 = vld [vmem:[#allocation29_spill] sm:$0xff] }
 0x23e   :  { %807 = vmatmul.bf16.vlgmr.msra.gmra.mxu0 %v798_v31  ;;  %869 = vmatmul.bf16.vlgmr.msra.gmra.mxu1 %v798_v31  ;;  %v6809_v31 = vld [vmem:[#allocation28_spill] sm:$0xff] }
 0x23f   :  { %1321 = vmatpush.bf16.msra.mxu0 %v6795_v50  ;;  %v6810_v32 = vpack.c.bf16 %v6808_v45, %v6809_v31  ;;  %v6811_v50 = vld [vmem:[#allocation31_spill] sm:$0xff] }
 0x240   :  { %v6813_v59 = vpack.c.bf16 %v6811_v50, %v6812_v25  ;;  %v4530_v50 = vld [vmem:[%s6605_s9] ss:$0 sm:$0xff] }
 0x243   :  { %1322 = vmatpush.bf16.msra.mxu0 %v6798_v62  ;;  %v6814_v62 = vld [vmem:[#allocation33_spill] sm:$0xff] }
 0x244   :  { %v6816_v55 = vpack.c.bf16 %v6814_v62, %v6815_v48  ;;  %v4605_v62 = vld [vmem:[%s6725_s28] sm:$0xff] }
 0x247   :  { %1323 = vmatpush.bf16.msra.mxu0 %v6801_v18 }
 0x24b   :  { %1324 = vmatpush.bf16.msra.mxu0 %v6804_v29 }
 0x24f   :  { %1325 = vmatpush.bf16.msra.mxu0 %v6807_v3 }
 0x253   :  { %1326 = vmatpush.bf16.msra.mxu0 %v6810_v32 }
 0x257   :  { %1327 = vmatpush.bf16.msra.mxu0 %v6813_v59 }
 0x25b   :  { %1328 = vmatpush.bf16.msra.mxu0 %v6816_v55 }
 0x2bb   :  { %v870_v6 = vpop.f32.mrf.mxu1  ;;  %v808_v19 = vpop.f32.mrf.mxu0 }
 0x2bc   :  { %v875_v18 = vmax.f32 %v870_v6, 1e-30 }
 0x2be   :  { %4543 = vrcp.f32 %v875_v18  ;;  %v4606_v18 = vld [vmem:[%s6725_s28 + $0x8] sm:$0xff] }
 0x2c3   :  { %v872_v10 = vpop.f32.mrf.mxu1  ;;  %v810_v3 = vpop.f32.mrf.mxu0 }
 0x2c4   :  { %v876_v29 = vmax.f32 %v872_v10, 1e-30  ;;  %v4544_v33 = vpop.eup %4543  ;;  %v4746_v10 = vmov 128.0  }
 0x2c5   :  { %v879_v45 = vmul.f32 %v4544_v33, %v808_v19 }
 0x2c6   :  { %4545 = vrcp.f32 %v876_v29 }
 0x2c7   :  { %4547 = vrcp.f32 %v4746_v10 }
 0x2cc   :  { %v4546_v9 = vpop.eup %4545 }
 0x2cd   :  { %v880_v31 = vmul.f32 %v4546_v9, %v810_v3  ;;  %v4548_v29 = vpop.eup %4547 }
 0x2ce   :  { %v971_v33 = vmul.f32 128.0, %v4548_v29  ;;  %vm975_vm0 = vweird.f32 %v4548_v29 }
 0x2cf   :  { %v881_v32 = vpack.c.bf16 %v880_v31, %v879_v45 }
 0x2d0   :  { %v972_v9 = vsub.f32 1.0, %v971_v33 }
 0x2d1   :  { %958 = vmatmul.bf16.vlgmr.msra.gmra.mxu2 %v881_v32 }
 0x2d2   :  { %v973_v3 = vmul.f32 %v4548_v29, %v972_v9 }
 0x2d4   :  { %v974_v45 = vadd.f32 %v4548_v29, %v973_v3 }
 0x2d6   :  { %v5922_v31 = vsel %vm975_vm0, %v4548_v29, %v974_v45 }
 0x354   :  { %v959_v25 = vpop.f32.mrf.mxu2 }
 0x355   :  { %v960_v59 = vadd.f32 %v4530_v50, %v959_v25 }
 0x357   :  { %v964_v48 = vadd.f32 %v4605_v62, %v960_v59 }
 0x359   :  { %966 = vadd.xlane.f32.xlu1 %v964_v48 }
 0x35c   :  { %v961_v55 = vpop.f32.mrf.mxu2 }
 0x35d   :  { %v962_v6 = vadd.f32 %v4530_v50, %v961_v55 }
 0x35f   :  { %v965_v19 = vadd.f32 %v4606_v18, %v962_v6 }
 0x361   :  { %968 = vadd.xlane.f32.xlu1 %v965_v19 }
 0x3cc   :  { %v967_v32 = vpop.xlane.xlu1 %966 }
 0x3cd   :  { %v977_v25 = vmul.f32 %v5922_v31, %v967_v32 }
 0x3cf   :  { %v979_v50 = vsub.f32 %v964_v48, %v977_v25 }
 0x3d1   :  { %v981_v59 = vmul.f32 %v979_v50, %v979_v50 }
 0x3d3   :  { %983 = vadd.xlane.f32.xlu2 %v981_v59 }
 0x3d4   :  { %v969_v62 = vpop.xlane.xlu1 %968 }
 0x3d5   :  { %v978_v55 = vmul.f32 %v5922_v31, %v969_v62 }
 0x3d7   :  { %v980_v6 = vsub.f32 %v965_v19, %v978_v55 }
 0x3d9   :  { %v982_v18 = vmul.f32 %v980_v6, %v980_v6 }
 0x3db   :  { %985 = vadd.xlane.f32.xlu2 %v982_v18 }
 0x446   :  { %v984_v10 = vpop.xlane.xlu2 %983 }
 0x447   :  { %v987_v33 = vmul.f32 %v984_v10, %v5922_v31 }
 0x449   :  { %v989_v9 = vadd.f32 1e-05, %v987_v33  ;;  %v5931_v33 = vld [vmem:[%s6616_s20] sm:$0x7] }
 0x44b   :  { %4549 = vrsqrt.f32 %v989_v9  ;;  %vm997_vm2 = vweird.f32 %v989_v9 }
 0x44e   :  { %v986_v3 = vpop.xlane.xlu2 %985 }
 0x44f   :  { %v988_v29 = vmul.f32 %v986_v3, %v5922_v31 }
 0x451   :  { %v4550_v45 = vpop.eup %4549  ;;  %v990_v60 = vadd.f32 1e-05, %v988_v29 }
 0x452   :  { %v992_v32 = vmul.f32 %v4550_v45, %v989_v9  ;;  %vm998_vm1 = vweird.f32 %v4550_v45  ;;  %v5937_v9 = vld [vmem:[%s6617_s21] sm:$0x7] }
 0x453   :  { %4551 = vrsqrt.f32 %v990_v60  ;;  %vm999_vm3 = vmor %vm997_vm2, %vm998_vm1  ;;  %vm1007_vm5 = vweird.f32 %v990_v60 }
 0x454   :  { %v993_v48 = vmul.f32 %v4550_v45, %v992_v32  ;;  %v1013_v32 = vperm.slane %v5931_v33, 0 }
 0x456   :  { %v994_v25 = vmul.f32 0.5, %v993_v48 }
 0x458   :  { %v995_v59 = vsub.f32 1.5, %v994_v25 }
 0x459   :  { %v4552_v34 = vpop.eup %4551 }
 0x45a   :  { %v996_v62 = vmul.f32 %v4550_v45, %v995_v59  ;;  %v1002_v19 = vmul.f32 %v4552_v34, %v990_v60  ;;  %vm1008_vm4 = vweird.f32 %v4552_v34 }
 0x45b   :  { %vm1009_vm6 = vmor %vm1007_vm5, %vm1008_vm4 }
 0x45c   :  { %v1003_v55 = vmul.f32 %v4552_v34, %v1002_v19  ;;  %v1000_v18 = vsel %vm999_vm3, %v4550_v45, %v996_v62  ;;  %v1016_v62 = vperm.slane %v5937_v9, 0 }
 0x45d   :  { %v1011_v29 = vmul.f32 %v1000_v18, %v979_v50  ;;  %v4531_v18 = vld [vmem:[%s6607_s11] ss:$0 sm:$0xff] }
 0x45e   :  { %v1004_v10 = vmul.f32 0.5, %v1003_v55 }
 0x45f   :  { %v1014_v59 = vmul.f32 %v1013_v32, %v1011_v29 }
 0x460   :  { %v1005_v3 = vsub.f32 1.5, %v1004_v10 }
 0x461   :  { %v5940_v55 = vadd.f32 %v1016_v62, %v1014_v59 }
 0x462   :  { %v1006_v48 = vmul.f32 %v4552_v34, %v1005_v3 }
 0x464   :  { %v1010_v45 = vsel %vm1009_vm6, %v4552_v34, %v1006_v48  ;;  %v129_v48 = vld [vmem:[%s6817_s12] sm:$0xff] }
 0x465   :  { %v1012_v25 = vmul.f32 %v1010_v45, %v980_v6  ;;  %v130_v45 = vld [vmem:[%s6817_s12 + $0x8] sm:$0xff] }
 0x467   :  { %v1015_v19 = vmul.f32 %v1013_v32, %v1012_v25 }
 0x469   :  { %v5942_v10 = vadd.f32 %v1016_v62, %v1015_v19 }
 0x46b   :  { %v1019_v50 = vpack.c.bf16 %v5942_v10, %v5940_v55 }
 0x46d   :  { %1096 = vmatmul.bf16.vlgmr.msrb.gmra.mxu0 %v1019_v50  ;;  %v131_v50 = vld [vmem:[%s6817_s12 + $0x10] sm:$0xff] }
 0x4ea   :  { %v1097_v60 = vpop.f32.mrf.mxu0 }
 0x4eb   :  { %v1098_v34 = vadd.f32 %v4531_v18, %v1097_v60 }
 0x4f2   :  { %v1099_v3 = vpop.f32.mrf.mxu0 }
 0x4f3   :  { %v1100_v6 = vadd.f32 %v4531_v18, %v1099_v3  ;;  %v132_v18 = vld [vmem:[%s6817_s12 + $0x18] sm:$0xff] }
 0x4f5   :  { %v1102_v29 = vpack.c.bf16 %v1100_v6, %v1098_v34 }
 0x4f7   :  { %1267 = vmatmul.bf16.vlgmr.msrb.gmra.mxu1 %v1102_v29  ;;  %1281 = vmatmul.bf16.vlgmr.msrb.gmra.mxu2 %v1102_v29 }
 0x574   :  { %v1268_v32 = vpop.f32.mrf.mxu1 }
 0x575   :  { %v1269_v59 = vadd.f32 %v1268_v32, %v129_v48  ;;  %v4312_v32 = vld [vmem:[%s6728_s18 + $0x38] sm:$0xff] }
 0x576   :  { %v4320_v48 = vld [vmem:[%s6728_s18 + $0x78] sm:$0xff]  ;;  %1431 = vmatpush.bf16.msrb.mxu3 %v4312_v32  ;;  %v4307_v32 = vld [vmem:[%s6728_s18 + $0x10] sm:$0xff] }
 0x577   :  { %1445 = vmatpush.bf16.msrb.mxu0 %v4320_v48  ;;  %v4315_v48 = vld [vmem:[%s6728_s18 + $0x50] sm:$0xff] }
 0x57a   :  { %v1282_v25 = vpop.f32.mrf.mxu2 }
 0x57b   :  { %v1283_v62 = vadd.f32 %v1282_v25, %v130_v45  ;;  %v4311_v45 = vld [vmem:[%s6728_s18 + $0x30] sm:$0xff] }
 0x57c   :  { %v1270_v60 = vpop.f32.mrf.mxu1  ;;  %v4319_v25 = vld [vmem:[%s6728_s18 + $0x70] sm:$0xff]  ;;  %1432 = vmatpush.bf16.msrb.mxu3 %v4311_v45 }
 0x57d   :  { %v1287_v19 = vmax.f32 %v1269_v59, %v1283_v62  ;;  %v1271_v34 = vadd.f32 %v1270_v60, %v131_v50  ;;  %1446 = vmatpush.bf16.msrb.mxu0 %v4319_v25  ;;  %v4318_v50 = vld [vmem:[%s6728_s18 + $0x68] sm:$0xff]  ;;  %v4309_v60 = vld [vmem:[%s6728_s18 + $0x20] sm:$0xff] }
 0x57e   :  { %v4306_v25 = vld [vmem:[%s6728_s18 + $0x8] sm:$0xff] }
 0x57f   :  { %1288 = vmax.xlane.f32.xlu0 %v1287_v19  ;;  %v4310_v19 = vld [vmem:[%s6728_s18 + $0x28] sm:$0xff] }
 0x580   :  { %1433 = vmatpush.bf16.msrb.mxu3 %v4310_v19  ;;  %v4314_v19 = vld [vmem:[%s6728_s18 + $0x48] sm:$0xff] }
 0x581   :  { %1447 = vmatpush.bf16.msrb.mxu0 %v4318_v50 }
 0x582   :  { %v1284_v3 = vpop.f32.mrf.mxu2 }
 0x583   :  { %v1285_v6 = vadd.f32 %v1284_v3, %v132_v18  ;;  %v4317_v18 = vld [vmem:[%s6728_s18 + $0x60] sm:$0xff]  ;;  %v4308_v3 = vld [vmem:[%s6728_s18 + $0x18] sm:$0xff] }
 0x584   :  { %1434 = vmatpush.bf16.msrb.mxu3 %v4309_v60 }
 0x585   :  { %v1290_v29 = vmax.f32 %v1271_v34, %v1285_v6  ;;  %1448 = vmatpush.bf16.msrb.mxu0 %v4317_v18  ;;  %v4305_v18 = vld [vmem:[%s6728_s18] sm:$0xff] }
 0x587   :  { %1291 = vmax.xlane.f32.xlu1 %v1290_v29  ;;  %v4316_v29 = vld [vmem:[%s6728_s18 + $0x58] sm:$0xff] }
 0x588   :  { %1435 = vmatpush.bf16.msrb.mxu3 %v4308_v3  ;;  %v4313_v3 = vld [vmem:[%s6728_s18 + $0x40] sm:$0xff] }
 0x589   :  { %1449 = vmatpush.bf16.msrb.mxu0 %v4316_v29 }
 0x58c   :  { %1436 = vmatpush.bf16.msrb.mxu3 %v4307_v32 }
 0x58d   :  { %1450 = vmatpush.bf16.msrb.mxu0 %v4315_v48 }
 0x590   :  { %1437 = vmatpush.bf16.msrb.mxu3 %v4306_v25 }
 0x591   :  { %1451 = vmatpush.bf16.msrb.mxu0 %v4314_v19 }
 0x594   :  { %1438 = vmatpush.bf16.msrb.mxu3 %v4305_v18 }
 0x595   :  { %1452 = vmatpush.bf16.msrb.mxu0 %v4313_v3  ;;  %v4396_v3 = vld [vmem:[#allocation2 + $0x18] sm:$0xff] }
 0x5f2   :  { %v1289_v45 = vpop.xlane.xlu0 %1288 }
 0x5f3   :  { %v1293_v50 = vsub.f32 %v1269_v59, %v1289_v45  ;;  %v1294_v60 = vsub.f32 %v1283_v62, %v1289_v45 }
 0x5f5   :  { %v1297_v29 = vmul.f32 1.442695, %v1293_v50  ;;  %v1299_v32 = vmul.f32 1.442695, %v1294_v60  ;;  %v4400_v50 = vld [vmem:[#allocation2 + $0x38] sm:$0xff] }
 0x5f6   :  { %1534 = vmatpush.bf16.msra.mxu1 %v4400_v50 }
 0x5f7   :  { %4553 = vpow2.f32 %v1297_v29  ;;  %v4395_v29 = vld [vmem:[#allocation2 + $0x10] sm:$0xff] }
 0x5f8   :  { %4555 = vpow2.f32 %v1299_v32 }
 0x5fa   :  { %v1292_v48 = vpop.xlane.xlu1 %1291 }
 0x5fb   :  { %v1295_v61 = vsub.f32 %v1271_v34, %v1292_v48  ;;  %v1296_v2 = vsub.f32 %v1285_v6, %v1292_v48  ;;  %v4399_v34 = vld [vmem:[#allocation2 + $0x30] sm:$0xff] }
 0x5fc   :  { %1535 = vmatpush.bf16.msra.mxu1 %v4399_v34 }
 0x5fd   :  { %v1301_v59 = vmul.f32 1.442695, %v1295_v61  ;;  %v1303_v62 = vmul.f32 1.442695, %v1296_v2  ;;  %v4554_v45 = vpop.eup %4553  ;;  %v4398_v61 = vld [vmem:[#allocation2 + $0x28] sm:$0xff]  ;;  %v4397_v2 = vld [vmem:[#allocation2 + $0x20] sm:$0xff] }
 0x5fe   :  { %v4556_v25 = vpop.eup %4555 }
 0x5ff   :  { %4557 = vpow2.f32 %v1301_v59 }
 0x600   :  { %4559 = vpow2.f32 %v1303_v62  ;;  %1536 = vmatpush.bf16.msra.mxu1 %v4398_v61 }
 0x604   :  { %1537 = vmatpush.bf16.msra.mxu1 %v4397_v2 }
 0x605   :  { %v4558_v19 = vpop.eup %4557 }
 0x606   :  { %v4560_v23 = vpop.eup %4559  ;;  %v1305_v49 = vpack.c.bf16 %v4558_v19, %v4554_v45 }
 0x607   :  { %v1306_v30 = vpack.c.bf16 %v4560_v23, %v4556_v25  ;;  %v4394_v23 = vld [vmem:[#allocation2 + $0x8] sm:$0xff] }
 0x608   :  { %1315 = vmatmul.bf16.vlgmr.msra.gmra.mxu3 %v1305_v49  ;;  %1538 = vmatpush.bf16.msra.mxu1 %v4396_v3 }
 0x609   :  { %1329 = vmatmul.bf16.vlgmr.msra.gmra.mxu0 %v1306_v30 }
 0x60c   :  { %1539 = vmatpush.bf16.msra.mxu1 %v4395_v29 }
 0x610   :  { %1540 = vmatpush.bf16.msra.mxu1 %v4394_v23  ;;  %v4532_v23 = vld [vmem:[%s6611_s15] ss:$0 sm:$0xff] }
 0x618   :  { %1439 = vmatmul.bf16.vlgmr.msrb.gmra.mxu3 %v1305_v49 }
 0x619   :  { %1453 = vmatmul.bf16.vlgmr.msrb.gmra.mxu0 %v1306_v30  ;;  %v4393_v30 = vld [vmem:[#allocation2] sm:$0xff] }
 0x61a   :  { %1541 = vmatpush.bf16.msra.mxu1 %v4393_v30 }
 0x686   :  { %v1330_v6 = vpop.f32.mrf.mxu0 }
 0x68b   :  { %v1316_v60 = vpop.f32.mrf.mxu3 }
 0x68c   :  { %v1331_v61 = vadd.f32 %v1330_v6, %v1316_v60 }
 0x68e   :  { %v1332_v18 = vpop.f32.mrf.mxu0 }
 0x693   :  { %v1318_v32 = vpop.f32.mrf.mxu3 }
 0x694   :  { %v1333_v2 = vadd.f32 %v1332_v18, %v1318_v32 }
 0x696   :  { %v1454_v48 = vpop.f32.mrf.mxu0 }
 0x69b   :  { %v1440_v49 = vpop.f32.mrf.mxu3 }
 0x69c   :  { %v1455_v59 = vadd.f32 %v1454_v48, %v1440_v49 }
 0x69e   :  { %v1459_v62 = vmax.f32 %v1455_v59, 1e-30  ;;  %v1456_v45 = vpop.f32.mrf.mxu0 }
 0x6a0   :  { %4561 = vrcp.f32 %v1459_v62 }
 0x6a3   :  { %v1442_v25 = vpop.f32.mrf.mxu3 }
 0x6a4   :  { %v1457_v19 = vadd.f32 %v1456_v45, %v1442_v25 }
 0x6a6   :  { %v1460_v50 = vmax.f32 %v1457_v19, 1e-30  ;;  %v4562_v34 = vpop.eup %4561  ;;  %v4416_v19 = vld [vmem:[#allocation5 + $0x74] sm:$0xf0] }
 0x6a7   :  { %v1463_v12 = vmul.f32 %v4562_v34, %v1331_v61  ;;  %v3805_v61 = vld [vmem:[#allocation5 + $0x78] sm:$0xf0] }
 0x6a8   :  { %4563 = vrcp.f32 %v1460_v50  ;;  %v4415_v50 = vld [vmem:[#allocation5 + $0x74] sm:$0xf] }
 0x6ae   :  { %v4564_v3 = vpop.eup %4563 }
 0x6af   :  { %v1464_v29 = vmul.f32 %v4564_v3, %v1333_v2  ;;  %v3808_v2 = vor.u32 %v4415_v50, %v3805_v61  ;;  %v3795_v3 = vld [vmem:[#allocation5 + $0x60] sm:$0xf]  ;;  %v4409_v50 = vld [vmem:[#allocation5 + $0x44] sm:$0xf] }
 0x6b1   :  { %v1465_v14 = vpack.c.bf16 %v1464_v29, %v1463_v12  ;;  %1713 = vmatpush.bf16.msra.mxu3 %v3808_v2  ;;  %v4414_v29 = vld [vmem:[#allocation5 + $0x64] sm:$0xf0] }
 0x6b3   :  { %1542 = vmatmul.bf16.vlgmr.msra.gmra.mxu1 %v1465_v14 }
 0x730   :  { %v1543_v48 = vpop.f32.mrf.mxu1 }
 0x731   :  { %v1544_v30 = vadd.f32 %v4532_v23, %v1543_v48 }
 0x733   :  { %v1548_v49 = vadd.f32 %v1544_v30, %v5940_v55  ;;  %v3796_v30 = vor.u32 %v4414_v29, %v3795_v3  ;;  %v3771_v3 = vld [vmem:[#allocation5 + $0x30] sm:$0xf]  ;;  %v4408_v29 = vld [vmem:[#allocation5 + $0x34] sm:$0xf0] }
 0x735   :  { %1550 = vadd.xlane.f32.xlu2 %v1548_v49 }
 0x738   :  { %v1545_v59 = vpop.f32.mrf.mxu1 }
 0x739   :  { %v1546_v62 = vadd.f32 %v4532_v23, %v1545_v59  ;;  %v4413_v23 = vld [vmem:[#allocation5 + $0x64] sm:$0xf]  ;;  %v3787_v59 = vld [vmem:[#allocation5 + $0x50] sm:$0xf] }
 0x73b   :  { %v1549_v45 = vadd.f32 %v1546_v62, %v5942_v10  ;;  %v3803_v10 = vld [vmem:[#allocation5 + $0x70] sm:$0xf]  ;;  %v4412_v62 = vld [vmem:[#allocation5 + $0x54] sm:$0xf0] }
 0x73c   :  { %v3804_v34 = vor.u32 %v4416_v19, %v3803_v10  ;;  %v3779_v10 = vld [vmem:[#allocation5 + $0x40] sm:$0xf]  ;;  %v4410_v19 = vld [vmem:[#allocation5 + $0x44] sm:$0xf0] }
 0x73d   :  { %1552 = vadd.xlane.f32.xlu0 %v1549_v45  ;;  %v3780_v61 = vor.u32 %v4410_v19, %v3779_v10  ;;  %v4405_v19 = vld [vmem:[#allocation5 + $0x24] sm:$0xf] }
 0x73e   :  { %1699 = vmatpush.bf16.msra.mxu2 %v3804_v34  ;;  %v3781_v34 = vld [vmem:[#allocation5 + $0x48] sm:$0xf0] }
 0x73f   :  { %v3784_v2 = vor.u32 %v4409_v50, %v3781_v34  ;;  %v3765_v50 = vld [vmem:[#allocation5 + $0x28] sm:$0xf0]  ;;  %v4431_v34 = vld [vmem:[#allocation7 + $0x70] sm:$0xff] }
 0x742   :  { %1700 = vmatpush.bf16.msra.mxu2 %v3796_v30  ;;  %v3773_v30 = vld [vmem:[#allocation5 + $0x38] sm:$0xf0] }
 0x7a8   :  { %v1551_v6 = vpop.xlane.xlu2 %1550 }
 0x7a9   :  { %v1554_v60 = vmul.f32 %v1551_v6, %v5922_v31 }
 0x7ab   :  { %v6015_v18 = vsub.f32 %v1548_v49, %v1554_v60  ;;  %v3797_v49 = vld [vmem:[#allocation5 + $0x68] sm:$0xf0]  ;;  %v4411_v60 = vld [vmem:[#allocation5 + $0x54] sm:$0xf] }
 0x7ac   :  { %v3800_v6 = vor.u32 %v4413_v23, %v3797_v49 }
 0x7ad   :  { %v1558_v14 = vmul.f32 %v6015_v18, %v6015_v18 }
 0x7ae   :  { %1714 = vmatpush.bf16.msra.mxu3 %v3800_v6  ;;  %v3763_v6 = vld [vmem:[#allocation5 + $0x20] sm:$0xf] }
 0x7af   :  { %1560 = vadd.xlane.f32.xlu1 %v1558_v14  ;;  %v3789_v14 = vld [vmem:[#allocation5 + $0x58] sm:$0xf0] }
 0x7b0   :  { %v1553_v12 = vpop.xlane.xlu0 %1552 }
 0x7b1   :  { %v1555_v32 = vmul.f32 %v1553_v12, %v5922_v31  ;;  %v3788_v12 = vor.u32 %v4412_v62, %v3787_v59  ;;  %v4424_v59 = vld [vmem:[#allocation7 + $0x38] sm:$0xff] }
 0x7b2   :  { %v4432_v62 = vld [vmem:[#allocation7 + $0x78] sm:$0xff]  ;;  %1865 = vmatpush.bf16.msra.mxu0 %v4424_v59  ;;  %v4430_v59 = vld [vmem:[#allocation7 + $0x68] sm:$0xff] }
 0x7b3   :  { %v6020_v25 = vsub.f32 %v1549_v45, %v1555_v32  ;;  %1701 = vmatpush.bf16.msra.mxu2 %v3788_v12  ;;  %v4406_v12 = vld [vmem:[#allocation5 + $0x24] sm:$0xf0]  ;;  %1879 = vmatpush.bf16.msrb.mxu1 %v4432_v62 }
 0x7b4   :  { %v3764_v43 = vor.u32 %v4406_v12, %v3763_v6 }
 0x7b5   :  { %v1559_v55 = vmul.f32 %v6020_v25, %v6020_v25 }
 0x7b7   :  { %1562 = vadd.xlane.f32.xlu2 %v1559_v55  ;;  %v3792_v55 = vor.u32 %v4411_v60, %v3789_v14  ;;  %1702 = vmatpush.bf16.msra.mxu2 %v3780_v61  ;;  %v3768_v61 = vor.u32 %v4405_v19, %v3765_v50  ;;  %v3749_v19 = vld [vmem:[#allocation5 + $0x8] sm:$0xf0]  ;;  %v4429_v50 = vld [vmem:[#allocation7 + $0x60] sm:$0xff] }
 0x7b8   :  { %1880 = vmatpush.bf16.msrb.mxu1 %v4431_v34 }
 0x7b9   :  { %1715 = vmatpush.bf16.msra.mxu3 %v3792_v55  ;;  %v4423_v55 = vld [vmem:[#allocation7 + $0x30] sm:$0xff] }
 0x7ba   :  { %1866 = vmatpush.bf16.msra.mxu0 %v4423_v55  ;;  %v4401_v55 = vld [vmem:[#allocation5 + $0x4] sm:$0xf] }
 0x7bc   :  { %1881 = vmatpush.bf16.msrb.mxu1 %v4430_v59 }
 0x7bd   :  { %1716 = vmatpush.bf16.msra.mxu3 %v3784_v2  ;;  %v4422_v2 = vld [vmem:[#allocation7 + $0x28] sm:$0xff] }
 0x7be   :  { %1867 = vmatpush.bf16.msra.mxu0 %v4422_v2  ;;  %v1590_v2 = vperm.slane %v5931_v33, 1 }
 0x7c0   :  { %1882 = vmatpush.bf16.msrb.mxu1 %v4429_v50 }
 0x822   :  { %v1561_v48 = vpop.xlane.xlu1 %1560 }
 0x823   :  { %v1564_v45 = vmul.f32 %v1561_v48, %v5922_v31  ;;  %v4407_v48 = vld [vmem:[#allocation5 + $0x34] sm:$0xf] }
 0x824   :  { %v3776_v51 = vor.u32 %v4407_v48, %v3773_v30  ;;  %v4403_v30 = vld [vmem:[#allocation5 + $0x14] sm:$0xf] }
 0x825   :  { %v6025_v32 = vadd.f32 1e-05, %v1564_v45  ;;  %v3772_v45 = vor.u32 %v4408_v29, %v3771_v3  ;;  %v3755_v3 = vld [vmem:[#allocation5 + $0x10] sm:$0xf]  ;;  %v4404_v29 = vld [vmem:[#allocation5 + $0x14] sm:$0xf0] }
 0x826   :  { %1717 = vmatpush.bf16.msra.mxu3 %v3776_v51  ;;  %v3756_v16 = vor.u32 %v4404_v29, %v3755_v3  ;;  %v4421_v51 = vld [vmem:[#allocation7 + $0x20] sm:$0xff] }
 0x827   :  { %4565 = vrsqrt.f32 %v6025_v32  ;;  %1703 = vmatpush.bf16.msra.mxu2 %v3772_v45  ;;  %v4402_v45 = vld [vmem:[#allocation5 + $0x4] sm:$0xf0]  ;;  %vm1574_vm8 = vweird.f32 %v6025_v32  ;;  %1868 = vmatpush.bf16.msra.mxu0 %v4421_v51  ;;  %v4419_v51 = vld [vmem:[#allocation7 + $0x10] sm:$0xff] }
 0x82a   :  { %v1563_v23 = vpop.xlane.xlu2 %1562  ;;  %1718 = vmatpush.bf16.msra.mxu3 %v3768_v61 }
 0x82b   :  { %v1565_v49 = vmul.f32 %v1563_v23, %v5922_v31  ;;  %1704 = vmatpush.bf16.msra.mxu2 %v3764_v43 }
 0x82d   :  { %v4566_v60 = vpop.eup %4565  ;;  %v1567_v14 = vadd.f32 1e-05, %v1565_v49  ;;  %v3757_v49 = vld [vmem:[#allocation5 + $0x18] sm:$0xf0] }
 0x82e   :  { %v1569_v10 = vmul.f32 %v4566_v60, %v6025_v32  ;;  %v3760_v15 = vor.u32 %v4403_v30, %v3757_v49  ;;  %vm1575_vm7 = vweird.f32 %v4566_v60  ;;  %v1593_v30 = vperm.slane %v5937_v9, 1 }
 0x82f   :  { %4567 = vrsqrt.f32 %v1567_v14  ;;  %1705 = vmatpush.bf16.msra.mxu2 %v3756_v16  ;;  %vm1576_vm9 = vmor %vm1574_vm8, %vm1575_vm7  ;;  %vm1584_vm11 = vweird.f32 %v1567_v14 }
 0x830   :  { %v1570_v23 = vmul.f32 %v4566_v60, %v1569_v10  ;;  %v3747_v10 = vld [vmem:[#allocation5] sm:$0xf]  ;;  %1719 = vmatpush.bf16.msra.mxu3 %v3760_v15 }
 0x831   :  { %v3748_v43 = vor.u32 %v4402_v45, %v3747_v10  ;;  %v4420_v45 = vld [vmem:[#allocation7 + $0x18] sm:$0xff] }
 0x832   :  { %v1571_v48 = vmul.f32 0.5, %v1570_v23  ;;  %v3752_v23 = vor.u32 %v4401_v55, %v3749_v19  ;;  %1869 = vmatpush.bf16.msra.mxu0 %v4420_v45  ;;  %v1613_v55 = vld [vmem:[%s6613_s17] sm:$0x3] }
 0x833   :  { %1706 = vmatpush.bf16.msra.mxu2 %v3748_v43  ;;  %v1616_v43 = vperm.slane %v1613_v55, 1 }
 0x834   :  { %v1572_v53 = vsub.f32 1.5, %v1571_v48  ;;  %1720 = vmatpush.bf16.msra.mxu3 %v3752_v23 }
 0x835   :  { %v4568_v62 = vpop.eup %4567 }
 0x836   :  { %v1573_v6 = vmul.f32 %v4566_v60, %v1572_v53  ;;  %v1579_v12 = vmul.f32 %v4568_v62, %v1567_v14  ;;  %vm1585_vm10 = vweird.f32 %v4568_v62  ;;  %1870 = vmatpush.bf16.msra.mxu0 %v4419_v51  ;;  %v4418_v14 = vld [vmem:[#allocation7 + $0x8] sm:$0xff] }
 0x837   :  { %vm1586_vm12 = vmor %vm1584_vm11, %vm1585_vm10 }
 0x838   :  { %v1580_v34 = vmul.f32 %v4568_v62, %v1579_v12  ;;  %v1577_v61 = vsel %vm1576_vm9, %v4566_v60, %v1573_v6  ;;  %v4427_v6 = vld [vmem:[#allocation7 + $0x50] sm:$0xff]  ;;  %v4425_v12 = vld [vmem:[#allocation7 + $0x40] sm:$0xff] }
 0x839   :  { %v1588_v53 = vmul.f32 %v1577_v61, %v6015_v18  ;;  %v4428_v18 = vld [vmem:[#allocation7 + $0x58] sm:$0xff] }
 0x83a   :  { %v1581_v3 = vmul.f32 0.5, %v1580_v34  ;;  %1883 = vmatpush.bf16.msrb.mxu1 %v4428_v18  ;;  %1871 = vmatpush.bf16.msra.mxu0 %v4418_v14  ;;  %v1615_v34 = vperm.slane %v1613_v55, 0 }
 0x83b   :  { %v1591_v15 = vmul.f32 %v1590_v2, %v1588_v53 }
 0x83c   :  { %v1582_v29 = vsub.f32 1.5, %v1581_v3 }
 0x83d   :  { %v1594_v49 = vadd.f32 %v1593_v30, %v1591_v15 }
 0x83e   :  { %v1583_v48 = vmul.f32 %v4568_v62, %v1582_v29  ;;  %1884 = vmatpush.bf16.msrb.mxu1 %v4427_v6 }
 0x840   :  { %v1587_v16 = vsel %vm1586_vm12, %v4568_v62, %v1583_v48  ;;  %v4426_v62 = vld [vmem:[#allocation7 + $0x48] sm:$0xff] }
 0x841   :  { %v1589_v32 = vmul.f32 %v1587_v16, %v6020_v25  ;;  %v4417_v25 = vld [vmem:[#allocation7] sm:$0xff] }
 0x842   :  { %1885 = vmatpush.bf16.msrb.mxu1 %v4426_v62  ;;  %1872 = vmatpush.bf16.msra.mxu0 %v4417_v25 }
 0x843   :  { %v1592_v60 = vmul.f32 %v1590_v2, %v1589_v32 }
 0x845   :  { %v1595_v59 = vadd.f32 %v1593_v30, %v1592_v60 }
 0x846   :  { %1886 = vmatpush.bf16.msrb.mxu1 %v4425_v12 }
 0x847   :  { %v1596_v10 = vpack.c.bf16 %v1595_v59, %v1594_v49 }
 0x849   :  { %1707 = vmatmul.bf16.vlgmr.msra.gmra.mxu2 %v1596_v10  ;;  %1721 = vmatmul.bf16.vlgmr.msra.gmra.mxu3 %v1596_v10  ;;  %v4533_v10 = vld [vmem:[%s6615_s19] ss:$0 sm:$0xff] }
 0x8cc   :  { %v1708_v19 = vpop.f32.mrf.mxu2  ;;  %v1722_v50 = vpop.f32.mrf.mxu3 }
 0x8cd   :  { %v1709_v23 = vadd.f32 %v1708_v19, %v1615_v34  ;;  %v1723_v61 = vadd.f32 %v1722_v50, %v1616_v43  ;;  %v4454_v50 = vld [vmem:[%s6723_s6 + $0x16c] sm:$0xf] }
 0x8cf   :  { %v1727_v48 = vmax.f32 %v1709_v23, 0.0  ;;  %v1728_v16 = vmax.f32 %v1723_v61, 0.0  ;;  %v4456_v23 = vld [vmem:[%s6723_s6 + $0x178] sm:$0xf0]  ;;  %v3984_v61 = vld [vmem:[%s6723_s6 + $0x15c] sm:$0xf0] }
 0x8d4   :  { %v1710_v3 = vpop.f32.mrf.mxu2  ;;  %v1724_v29 = vpop.f32.mrf.mxu3 }
 0x8d5   :  { %v1711_v53 = vadd.f32 %v1710_v3, %v1615_v34  ;;  %v1725_v2 = vadd.f32 %v1724_v29, %v1616_v43  ;;  %v3996_v34 = vld [vmem:[%s6723_s6 + $0x174] sm:$0xf0]  ;;  %v4002_v43 = vld [vmem:[%s6723_s6 + $0x170] sm:$0xf] }
 0x8d6   :  { %v4003_v3 = vor.u32 %v4456_v23, %v4002_v43  ;;  %v3990_v29 = vld [vmem:[%s6723_s6 + $0x158] sm:$0xf] }
 0x8d7   :  { %v1729_v32 = vmax.f32 %v1711_v53, 0.0  ;;  %v1730_v15 = vmax.f32 %v1725_v2, 0.0  ;;  %v4453_v53 = vld [vmem:[%s6723_s6 + $0x160] sm:$0xf0] }
 0x8d8   :  { %2144 = vmatpush.bf16.msrb.mxu0 %v4003_v3 }
 0x8d9   :  { %v1731_v30 = vpack.c.bf16 %v1729_v32, %v1727_v48  ;;  %v1732_v60 = vpack.c.bf16 %v1730_v15, %v1728_v16  ;;  %v3991_v48 = vor.u32 %v4453_v53, %v3990_v29  ;;  %v4448_v16 = vld [vmem:[%s6723_s6 + $0x13c] sm:$0xf]  ;;  %v3972_v32 = vld [vmem:[%s6723_s6 + $0x144] sm:$0xf0]  ;;  %v3978_v15 = vld [vmem:[%s6723_s6 + $0x140] sm:$0xf] }
 0x8db   :  { %1873 = vmatmul.bf16.vlgmr.msra.gmra.mxu0 %v1731_v30  ;;  %1887 = vmatmul.bf16.vlgmr.msrb.gmra.mxu1 %v1732_v60  ;;  %v4450_v30 = vld [vmem:[%s6723_s6 + $0x148] sm:$0xf0]  ;;  %v3975_v60 = vor.u32 %v4448_v16, %v3972_v32  ;;  %v4439_v16 = vld [vmem:[%s6723_s6 + $0xf4] sm:$0xf]  ;;  %v3942_v32 = vld [vmem:[%s6723_s6 + $0xf8] sm:$0xf] }
 0x8dc   :  { %2145 = vmatpush.bf16.msrb.mxu0 %v3991_v48 }
 0x958   :  { %v1874_v45 = vpop.f32.mrf.mxu0  ;;  %v1888_v18 = vpop.f32.mrf.mxu1 }
 0x959   :  { %v1875_v51 = vadd.f32 %v4533_v10, %v1874_v45  ;;  %v4445_v45 = vld [vmem:[%s6723_s6 + $0x124] sm:$0xf] }
 0x95b   :  { %v1889_v6 = vadd.f32 %v1888_v18, %v1875_v51  ;;  %v3960_v18 = vld [vmem:[%s6723_s6 + $0x12c] sm:$0xf0]  ;;  %v3966_v51 = vld [vmem:[%s6723_s6 + $0x128] sm:$0xf] }
 0x95d   :  { %v1893_v14 = vadd.f32 %v1889_v6, %v1594_v49  ;;  %v3999_v49 = vor.u32 %v4454_v50, %v3996_v34  ;;  %v4447_v6 = vld [vmem:[%s6723_s6 + $0x130] sm:$0xf0]  ;;  %v3954_v50 = vld [vmem:[%s6723_s6 + $0x110] sm:$0xf]  ;;  %v4444_v34 = vld [vmem:[%s6723_s6 + $0x118] sm:$0xf0] }
 0x95f   :  { %1895 = vadd.xlane.f32.xlu0 %v1893_v14  ;;  %2130 = vmatpush.bf16.msrb.mxu3 %v3999_v49  ;;  %v3955_v49 = vor.u32 %v4444_v34, %v3954_v50  ;;  %v3912_v50 = vld [vmem:[%s6723_s6 + $0xcc] sm:$0xf0]  ;;  %v3918_v34 = vld [vmem:[%s6723_s6 + $0xc8] sm:$0xf] }
 0x960   :  { %v1876_v62 = vpop.f32.mrf.mxu0  ;;  %v1890_v12 = vpop.f32.mrf.mxu1 }
 0x961   :  { %v1877_v25 = vadd.f32 %v4533_v10, %v1876_v62  ;;  %v3979_v10 = vor.u32 %v4450_v30, %v3978_v15  ;;  %v3963_v62 = vor.u32 %v4445_v45, %v3960_v18  ;;  %v4436_v30 = vld [vmem:[%s6723_s6 + $0xdc] sm:$0xf]  ;;  %v3930_v45 = vld [vmem:[%s6723_s6 + $0xe0] sm:$0xf]  ;;  %v4438_v18 = vld [vmem:[%s6723_s6 + $0xe8] sm:$0xf0] }
 0x963   :  { %v1891_v55 = vadd.f32 %v1890_v12, %v1877_v25  ;;  %2146 = vmatpush.bf16.msrb.mxu0 %v3979_v10  ;;  %v3967_v25 = vor.u32 %v4447_v6, %v3966_v51  ;;  %v4442_v12 = vld [vmem:[%s6723_s6 + $0x10c] sm:$0xf]  ;;  %v3994_v51 = vld [vmem:[%s6723_s6 + $0x168] sm:$0xf] }
 0x965   :  { %v1894_v19 = vadd.f32 %v1891_v55, %v1595_v59  ;;  %v4451_v59 = vld [vmem:[%s6723_s6 + $0x154] sm:$0xf]  ;;  %v3948_v55 = vld [vmem:[%s6723_s6 + $0x114] sm:$0xf0] }
 0x966   :  { %v3987_v2 = vor.u32 %v4451_v59, %v3984_v61  ;;  %v3951_v43 = vor.u32 %v4442_v12, %v3948_v55  ;;  %v4433_v55 = vld [vmem:[%s6723_s6 + $0xc4] sm:$0xf] }
 0x967   :  { %1897 = vadd.xlane.f32.xlu1 %v1894_v19  ;;  %2147 = vmatpush.bf16.msrb.mxu0 %v3967_v25  ;;  %v3931_v25 = vor.u32 %v4438_v18, %v3930_v45  ;;  %v4446_v45 = vld [vmem:[%s6723_s6 + $0x128] sm:$0xf0]  ;;  %v4608_v18 = vld [vmem:[%s6726_s14 + $0x30] sm:$0xff] }
 0x968   :  { %2131 = vmatpush.bf16.msrb.mxu3 %v3987_v2 }
 0x96b   :  { %2148 = vmatpush.bf16.msrb.mxu0 %v3955_v49  ;;  %v3915_v49 = vor.u32 %v4433_v55, %v3912_v50  ;;  %v4443_v55 = vld [vmem:[%s6723_s6 + $0x110] sm:$0xf0] }
 0x96c   :  { %2132 = vmatpush.bf16.msrb.mxu3 %v3975_v60  ;;  %v3924_v60 = vld [vmem:[%s6723_s6 + $0xe4] sm:$0xf0] }
 0x96d   :  { %v3927_v6 = vor.u32 %v4436_v30, %v3924_v60  ;;  %v4463_v30 = vld [vmem:[%s6727_s29 + $0x70] sm:$0xff] }
 0x970   :  { %2133 = vmatpush.bf16.msrb.mxu3 %v3963_v62  ;;  %v4455_v62 = vld [vmem:[%s6723_s6 + $0x170] sm:$0xf0] }
 0x971   :  { %v3995_v12 = vor.u32 %v4455_v62, %v3994_v51 }
 0x973   :  { %2116 = vmatpush.bf16.msrb.mxu2 %v3995_v12  ;;  %v3946_v12 = vld [vmem:[%s6723_s6 + $0x108] sm:$0xf] }
 0x974   :  { %2134 = vmatpush.bf16.msrb.mxu3 %v3951_v43 }
 0x9d2   :  { %v1896_v23 = vpop.xlane.xlu0 %1895 }
 0x9d3   :  { %v1899_v59 = vmul.f32 %v1896_v23, %v5922_v31  ;;  %v4435_v23 = vld [vmem:[%s6723_s6 + $0xd0] sm:$0xf0] }
 0x9d5   :  { %v6102_v61 = vsub.f32 %v1893_v14, %v1899_v59  ;;  %v3936_v14 = vld [vmem:[%s6723_s6 + $0xfc] sm:$0xf0]  ;;  %v4464_v59 = vld [vmem:[%s6727_s29 + $0x78] sm:$0xff] }
 0x9d6   :  { %v3939_v15 = vor.u32 %v4439_v16, %v3936_v14  ;;  %v3970_v16 = vld [vmem:[%s6723_s6 + $0x138] sm:$0xf] }
 0x9d7   :  { %v1903_v3 = vmul.f32 %v6102_v61, %v6102_v61 }
 0x9d8   :  { %2135 = vmatpush.bf16.msrb.mxu3 %v3939_v15 }
 0x9d9   :  { %1905 = vadd.xlane.f32.xlu2 %v1903_v3  ;;  %v3982_v3 = vld [vmem:[%s6723_s6 + $0x150] sm:$0xf] }
 0x9da   :  { %v1898_v29 = vpop.xlane.xlu1 %1897 }
 0x9db   :  { %v1900_v53 = vmul.f32 %v1898_v29, %v5922_v31 }
 0x9dc   :  { %2136 = vmatpush.bf16.msrb.mxu3 %v3927_v6  ;;  %v4462_v6 = vld [vmem:[%s6727_s29 + $0x68] sm:$0xff] }
 0x9dd   :  { %v6107_v2 = vsub.f32 %v1894_v19, %v1900_v53  ;;  %v4441_v19 = vld [vmem:[%s6723_s6 + $0x100] sm:$0xf0]  ;;  %v3919_v53 = vor.u32 %v4435_v23, %v3918_v34 }
 0x9de   :  { %v3943_v10 = vor.u32 %v4441_v19, %v3942_v32  ;;  %v4449_v32 = vld [vmem:[%s6723_s6 + $0x140] sm:$0xf0]  ;;  %v4607_v19 = vld [vmem:[%s6726_s14 + $0x38] sm:$0xff] }
 0x9df   :  { %v1904_v48 = vmul.f32 %v6107_v2, %v6107_v2  ;;  %v3971_v60 = vor.u32 %v4449_v32, %v3970_v16  ;;  %v4461_v23 = vld [vmem:[%s6727_s29 + $0x60] sm:$0xff] }
 0x9e0   :  { %2149 = vmatpush.bf16.msrb.mxu0 %v3943_v10  ;;  %2137 = vmatpush.bf16.msrb.mxu3 %v3915_v49  ;;  %v3958_v10 = vld [vmem:[%s6723_s6 + $0x120] sm:$0xf] }
 0x9e1   :  { %1907 = vadd.xlane.f32.xlu0 %v1904_v48  ;;  %v4452_v48 = vld [vmem:[%s6723_s6 + $0x158] sm:$0xf0]  ;;  %v3959_v62 = vor.u32 %v4446_v45, %v3958_v10 }
 0x9e2   :  { %v3983_v14 = vor.u32 %v4452_v48, %v3982_v3  ;;  %v3934_v3 = vld [vmem:[%s6723_s6 + $0xf0] sm:$0xf]  ;;  %v4610_v48 = vld [vmem:[%s6726_s14 + $0x20] sm:$0xff]  ;;  %v4611_v45 = vld [vmem:[%s6726_s14 + $0x18] sm:$0xff] }
 0x9e4   :  { %2150 = vmatpush.bf16.msrb.mxu0 %v3931_v25  ;;  %2269 = vmatpush.bf16.msra.mxu3 %v4607_v19  ;;  %v3922_v19 = vld [vmem:[%s6723_s6 + $0xd8] sm:$0xf] }
 0x9e5   :  { %2117 = vmatpush.bf16.msrb.mxu2 %v3983_v14  ;;  %v4460_v14 = vld [vmem:[%s6727_s29 + $0x58] sm:$0xff] }
 0x9e8   :  { %2151 = vmatpush.bf16.msrb.mxu0 %v3919_v53  ;;  %2270 = vmatpush.bf16.msra.mxu3 %v4608_v18 }
 0x9e9   :  { %2118 = vmatpush.bf16.msrb.mxu2 %v3971_v60 }
 0x9ec   :  { %2360 = vmatpush.bf16.msra.mxu0 %v4464_v59  ;;  %v3947_v59 = vor.u32 %v4443_v55, %v3946_v12  ;;  %v4434_v12 = vld [vmem:[%s6723_s6 + $0xc8] sm:$0xf0]  ;;  %v2514_v55 = vunpack.c.l.b16 %v5720_v35 }
 0x9ed   :  { %2119 = vmatpush.bf16.msrb.mxu2 %v3959_v62 }
 0x9f0   :  { %2361 = vmatpush.bf16.msra.mxu0 %v4463_v30  ;;  %v4437_v30 = vld [vmem:[%s6723_s6 + $0xe0] sm:$0xf0] }
 0x9f1   :  { %2120 = vmatpush.bf16.msrb.mxu2 %v3947_v59  ;;  %v3923_v62 = vor.u32 %v4437_v30, %v3922_v19 }
 0x9f4   :  { %2362 = vmatpush.bf16.msra.mxu0 %v4462_v6  ;;  %v4459_v6 = vld [vmem:[%s6727_s29 + $0x50] sm:$0xff] }
 0x9f8   :  { %2363 = vmatpush.bf16.msra.mxu0 %v4461_v23  ;;  %v4612_v23 = vld [vmem:[%s6726_s14 + $0x10] sm:$0xff] }
 0x9fc   :  { %2364 = vmatpush.bf16.msra.mxu0 %v4460_v14  ;;  %v4457_v14 = vld [vmem:[%s6727_s29 + $0x40] sm:$0xff] }
 0xa00   :  { %2365 = vmatpush.bf16.msra.mxu0 %v4459_v6 }
 0xa4c   :  { %v1906_v43 = vpop.xlane.xlu2 %1905 }
 0xa4d   :  { %v1909_v29 = vmul.f32 %v1906_v43, %v5922_v31  ;;  %v4609_v43 = vld [vmem:[%s6726_s14 + $0x28] sm:$0xff] }
 0xa4e   :  { %2271 = vmatpush.bf16.msra.mxu3 %v4609_v43  ;;  %v2515_v43 = vunpack.c.l.b16 %v5723_v44 }
 0xa4f   :  { %v1911_v15 = vadd.f32 1e-05, %v1909_v29  ;;  %v4440_v29 = vld [vmem:[%s6723_s6 + $0xf8] sm:$0xf0] }
 0xa50   :  { %v3935_v32 = vor.u32 %v4440_v29, %v3934_v3  ;;  %v4458_v29 = vld [vmem:[%s6727_s29 + $0x48] sm:$0xff]  ;;  %v2517_v35 = vpack.c.b16 %v2515_v43, %v2514_v55 }
 0xa51   :  { %4569 = vrsqrt.f32 %v1911_v15  ;;  %vm1919_vm14 = vweird.f32 %v1911_v15  ;;  %2366 = vmatpush.bf16.msra.mxu0 %v4458_v29 }
 0xa52   :  { %2272 = vmatpush.bf16.msra.mxu3 %v4610_v48  ;;  %2121 = vmatpush.bf16.msrb.mxu2 %v3935_v32  ;;  %v6246_v32 = vunpack.c.l.bf16 %v2517_v35  ;;  %v6248_v19 = vunpack.c.h.bf16 %v2517_v35 }
 0xa54   :  { %v1908_v51 = vpop.xlane.xlu0 %1907  ;;  %v2535_v29 = vmul.f32 %v6248_v19, %v5390_v27  ;;  %v2551_v35 = vmul.f32 %v6248_v19, %v5406_v58  ;;  %v2531_v58 = vmul.f32 %v6248_v19, %v5559_v57 }
 0xa55   :  { %v1910_v25 = vmul.f32 %v1908_v51, %v5922_v31  ;;  %2367 = vmatpush.bf16.msra.mxu0 %v4457_v14 }
 0xa56   :  { %2273 = vmatpush.bf16.msra.mxu3 %v4611_v45  ;;  %2122 = vmatpush.bf16.msrb.mxu2 %v3923_v62  ;;  %v2555_v62 = vmul.f32 %v6248_v19, %v5324_v47 }
 0xa57   :  { %v4570_v50 = vpop.eup %4569  ;;  %v1912_v34 = vadd.f32 1e-05, %v1910_v25  ;;  %v3910_v25 = vld [vmem:[%s6723_s6 + $0xc0] sm:$0xf] }
 0xa58   :  { %v1914_v49 = vmul.f32 %v4570_v50, %v1911_v15  ;;  %vm1920_vm13 = vweird.f32 %v4570_v50  ;;  %v4613_v15 = vld [vmem:[%s6726_s14 + $0x8] sm:$0xff] }
 0xa59   :  { %4571 = vrsqrt.f32 %v1912_v34  ;;  %vm1921_vm15 = vmor %vm1919_vm14, %vm1920_vm13  ;;  %vm1929_vm1 = vweird.f32 %v1912_v34 }
 0xa5a   :  { %v1915_v53 = vmul.f32 %v4570_v50, %v1914_v49  ;;  %2274 = vmatpush.bf16.msra.mxu3 %v4612_v23 }
 0xa5c   :  { %v1916_v16 = vmul.f32 0.5, %v1915_v53  ;;  %v3911_v53 = vor.u32 %v4434_v12, %v3910_v25  ;;  %v2520_v25 = vunpack.c.l.bf16 %v5718_v24  ;;  %v2521_v12 = vunpack.c.h.bf16 %v5718_v24 }
 0xa5d   :  { %v2534_v24 = vmul.f32 %v6246_v32, %v5388_v26 }
 0xa5e   :  { %v1917_v60 = vsub.f32 1.5, %v1916_v16  ;;  %2275 = vmatpush.bf16.msra.mxu3 %v4613_v15  ;;  %2123 = vmatpush.bf16.msrb.mxu2 %v3911_v53  ;;  %v2552_v47 = vmul.f32 %v2520_v25, %v5354_v0  ;;  %v2553_v23 = vmul.f32 %v2521_v12, %v5356_v1  ;;  %v2550_v53 = vmul.f32 %v6246_v32, %v5404_v39 }
 0xa5f   :  { %v4572_v10 = vpop.eup %4571  ;;  %v2532_v1 = vmul.f32 %v2520_v25, %v5377_v20  ;;  %v2548_v15 = vmul.f32 %v2520_v25, %v5381_v22  ;;  %v2530_v39 = vmul.f32 %v6246_v32, %v5547_v4 }
 0xa60   :  { %v1918_v18 = vmul.f32 %v4570_v50, %v1917_v60  ;;  %v1924_v51 = vmul.f32 %v4572_v10, %v1912_v34  ;;  %vm1930_vm0 = vweird.f32 %v4572_v10  ;;  %v1938_v60 = vperm.slane %v5937_v9, 2 }
 0xa61   :  { %vm1931_vm2 = vmor %vm1929_vm1, %vm1930_vm0  ;;  %v2569_v0 = vpack.c.bf16 %v2551_v35, %v2550_v53 }
 0xa62   :  { %v1925_v49 = vmul.f32 %v4572_v10, %v1924_v51  ;;  %v1922_v59 = vsel %vm1921_vm15, %v4570_v50, %v1918_v18  ;;  %v1935_v50 = vperm.slane %v5931_v33, 2  ;;  %v4614_v33 = vld [vmem:[%s6726_s14] sm:$0xff]  ;;  %v2538_v18 = vmul.f32 %v6246_v32, %v5318_v41 }
 0xa63   :  { %v1933_v44 = vmul.f32 %v1922_v59, %v6102_v61  ;;  %2276 = vmatpush.bf16.msra.mxu3 %v4614_v33  ;;  %v2539_v51 = vmul.f32 %v6248_v19, %v5320_v42  ;;  %v2559_v33 = vpack.c.bf16 %v2531_v58, %v2530_v39 }
 0xa64   :  { %v1926_v3 = vmul.f32 0.5, %v1925_v49  ;;  %v2536_v49 = vmul.f32 %v2520_v25, %v5340_v56 }
 0xa65   :  { %v1936_v34 = vmul.f32 %v1935_v50, %v1933_v44  ;;  %v2563_v55 = vpack.c.bf16 %v2539_v51, %v2538_v18  ;;  %v2533_v44 = vmul.f32 %v2521_v12, %v5379_v21 }
 0xa66   :  { %v1927_v48 = vsub.f32 1.5, %v1926_v3  ;;  %v2570_v3 = vpack.c.bf16 %v2553_v23, %v2552_v47  ;;  %v2540_v23 = vmul.f32 %v2520_v25, %v5499_v52 }
 0xa67   :  { %v6259_v6 = vadd.f32 %v1938_v60, %v1936_v34  ;;  %v2529_v34 = vmul.f32 %v2521_v12, %v5591_v28 }
 0xa68   :  { %v1928_v16 = vmul.f32 %v4572_v10, %v1927_v48  ;;  %v2561_v48 = vpack.c.bf16 %v2535_v29, %v2534_v24 }
 0xa6a   :  { %v1932_v61 = vsel %vm1931_vm2, %v4572_v10, %v1928_v16  ;;  %v2560_v16 = vpack.c.bf16 %v2533_v44, %v2532_v1 }
 0xa6b   :  { %v1934_v30 = vmul.f32 %v1932_v61, %v6107_v2  ;;  %v2554_v2 = vmul.f32 %v6246_v32, %v5322_v46  ;;  %v2537_v46 = vmul.f32 %v2521_v12, %v5352_v63  ;;  %v2546_v61 = vmul.f32 %v6246_v32, %v5461_v11  ;;  %v6818_v11 = vld [vmem:[#allocation38_spill] sm:$0xff] }
 0xa6d   :  { %v1937_v45 = vmul.f32 %v1935_v50, %v1934_v30  ;;  %v2571_v43 = vpack.c.bf16 %v2555_v62, %v2554_v2  ;;  %v2562_v59 = vpack.c.bf16 %v2537_v46, %v2536_v49  ;;  %v2549_v50 = vmul.f32 %v2521_v12, %v6780_v5  ;;  %v6821_v46 = vld [vmem:[#allocation43_spill] sm:$0xff] }
 0xa6e   :  { %v2547_v30 = vmul.f32 %v6248_v19, %v6783_v40  ;;  %v2528_v5 = vmul.f32 %v2520_v25, %v5589_v17  ;;  %v2526_v2 = vmul.f32 %v6246_v32, %v6818_v11  ;;  %v6819_v40 = vld [vmem:[#allocation39_spill] sm:$0xff]  ;;  %v2525_v47 = vmul.f32 %v2521_v12, %v6821_v46 }
 0xa6f   :  { %v6261_v10 = vadd.f32 %v1938_v60, %v1937_v45  ;;  %v2568_v14 = vpack.c.bf16 %v2549_v50, %v2548_v15  ;;  %v2544_v60 = vmul.f32 %v2520_v25, %v6785_v8  ;;  %v2545_v45 = vmul.f32 %v2521_v12, %v6787_v7  ;;  %v6820_v7 = vld [vmem:[#allocation42_spill] sm:$0xff] }
 0xa70   :  { %v2567_v22 = vpack.c.bf16 %v2547_v30, %v2546_v61  ;;  %v2558_v18 = vpack.c.bf16 %v2529_v34, %v2528_v5  ;;  %v2527_v62 = vmul.f32 %v6248_v19, %v6819_v40  ;;  %v2524_v49 = vmul.f32 %v2520_v25, %v6820_v7 }
 0xa71   :  { %v1945_v9 = vpack.c.bf16 %v6261_v10, %v6259_v6  ;;  %v2566_v51 = vpack.c.bf16 %v2545_v45, %v2544_v60 }
 0xa73   :  { %2124 = vmatmul.bf16.vlgmr.msrb.gmra.mxu2 %v1945_v9  ;;  %2138 = vmatmul.bf16.vlgmr.msrb.gmra.mxu3 %v1945_v9 }
 0xa74   :  { %2152 = vmatmul.bf16.vlgmr.msrb.gmra.mxu0 %v1945_v9  ;;  %2632 = vmatpush.bf16.xpose.msrb.mxu3 %v2563_v55  ;;  %v2542_v9 = vmul.f32 %v6246_v32, %v5493_v36  ;;  %v2543_v55 = vmul.f32 %v6248_v19, %v5495_v37  ;;  %v3907_v36 = vld [vmem:[%s6729_s8 + $0x3] sm:$0x7] }
 0xa75   :  { %2646 = vmatpush.bf16.xpose.msrb.mxu0 %v2571_v43  ;;  %v2557_v43 = vpack.c.bf16 %v2527_v62, %v2526_v2  ;;  %v1984_v32 = vperm.slane %v3907_v36, 2  ;;  %v1982_v35 = vperm.slane %v3907_v36, 0 }
 0xa76   :  { %v2565_v8 = vpack.c.bf16 %v2543_v55, %v2542_v9  ;;  %v6822_v55 = vld [vmem:[#allocation19_spill] sm:$0xff] }
 0xa7c   :  { %2633 = vmatpush.bf16.xpose.msrb.mxu3 %v2562_v59  ;;  %v2541_v59 = vmul.f32 %v2521_v12, %v5501_v54 }
 0xa7d   :  { %2647 = vmatpush.bf16.xpose.msrb.mxu0 %v2570_v3  ;;  %v2556_v3 = vpack.c.bf16 %v2525_v47, %v2524_v49 }
 0xa7e   :  { %v2564_v24 = vpack.c.bf16 %v2541_v59, %v2540_v23 }
 0xa84   :  { %2634 = vmatpush.bf16.xpose.msrb.mxu3 %v2561_v48  ;;  %v1983_v48 = vperm.slane %v3907_v36, 1  ;;  %v6824_v36 = vld [vmem:[#allocation34_spill] sm:$0xff] }
 0xa85   :  { %2648 = vmatpush.bf16.xpose.msrb.mxu0 %v2569_v0 }
 0xa8c   :  { %2635 = vmatpush.bf16.xpose.msrb.mxu3 %v2560_v16 }
 0xa8d   :  { %2649 = vmatpush.bf16.xpose.msrb.mxu0 %v2568_v14 }
 0xa94   :  { %2636 = vmatpush.bf16.xpose.msrb.mxu3 %v2559_v33 }
 0xa95   :  { %2650 = vmatpush.bf16.xpose.msrb.mxu0 %v2567_v22 }
 0xa9c   :  { %2637 = vmatpush.bf16.xpose.msrb.mxu3 %v2558_v18 }
 0xa9d   :  { %2651 = vmatpush.bf16.xpose.msrb.mxu0 %v2566_v51 }
 0xaa4   :  { %2638 = vmatpush.bf16.xpose.msrb.mxu3 %v2557_v43 }
 0xaa5   :  { %2652 = vmatpush.bf16.xpose.msrb.mxu0 %v2565_v8  ;;  %v6823_v8 = vld [vmem:[#allocation20_spill] sm:$0xff] }
 0xaac   :  { %2639 = vmatpush.bf16.xpose.msrb.mxu3 %v2556_v3 }
 0xaad   :  { %2653 = vmatpush.bf16.xpose.msrb.mxu0 %v2564_v24 }
 0xaf1   :  { %v2153_v37 = vpop.f32.mrf.mxu0 }
 0xaf2   :  { %v2154_v19 = vadd.f32 %v2153_v37, %v1984_v32 }
 0xaf4   :  { %v2159_v1 = vpack.c.bf16 %v2154_v19, %v2154_v19 }
 0xaf6   :  { %v2125_v29 = vpop.f32.mrf.mxu2  ;;  %v2139_v53 = vpop.f32.mrf.mxu3  ;;  %v2196_v44 = vunpack.c.l.b16 %v2159_v1 }
 0xaf7   :  { %v2126_v25 = vadd.f32 %v2125_v29, %v1982_v35  ;;  %v2140_v54 = vadd.f32 %v2139_v53, %v1983_v48 }
 0xaf9   :  { %v2155_v0 = vpop.f32.mrf.mxu0  ;;  %v2158_v14 = vpack.c.bf16 %v2140_v54, %v2126_v25 }
 0xafa   :  { %v2156_v52 = vadd.f32 %v2155_v0, %v1984_v32  ;;  %v6825_v32 = vld [vmem:[#allocation35_spill] sm:$0xff]  ;;  %v6827_v0 = vld [vmem:[#allocation37_spill] sm:$0xff] }
 0xafb   :  { %v2164_v5 = vunpack.c.h.b16 %v2158_v14  ;;  %v2226_v34 = vunpack.c.l.b16 %v2158_v14 }
 0xafc   :  { %v2161_v12 = vpack.c.bf16 %v2156_v52, %v2156_v52 }
 0xafe   :  { %v2197_v15 = vunpack.c.l.b16 %v2161_v12  ;;  %v2127_v50 = vpop.f32.mrf.mxu2  ;;  %v2141_v16 = vpop.f32.mrf.mxu3  ;;  %v6829_v12 = vld [vmem:[#allocation41_spill] sm:$0xff] }
 0xaff   :  { %v2128_v39 = vadd.f32 %v2127_v50, %v1982_v35  ;;  %v2142_v58 = vadd.f32 %v2141_v16, %v1983_v48  ;;  %v6826_v35 = vld [vmem:[#allocation36_spill] sm:$0xff] }
 0xb00   :  { %v2198_v61 = vpack.c.b16 %v2197_v15, %v2196_v44  ;;  %v6830_v16 = vld [vmem:[#allocation44_spill] sm:$0xff] }
 0xb01   :  { %v2160_v30 = vpack.c.bf16 %v2142_v58, %v2128_v39  ;;  %v6831_v39 = vld [vmem:[#allocation45_spill] sm:$0xff] }
 0xb02   :  { %v2200_v33 = vunpack.c.l.bf16 %v2198_v61  ;;  %v2201_v22 = vunpack.c.h.bf16 %v2198_v61 }
 0xb03   :  { %v2165_v60 = vunpack.c.h.b16 %v2160_v30  ;;  %v2227_v45 = vunpack.c.l.b16 %v2160_v30 }
 0xb04   :  { %v2216_v18 = vmul.f32 %v2200_v33, %v5402_v38  ;;  %v2217_v51 = vmul.f32 %v2201_v22, %v5412_v13  ;;  %v2214_v43 = vmul.f32 %v2200_v33, %v6822_v55  ;;  %v2215_v49 = vmul.f32 %v2201_v22, %v6823_v8 }
 0xb05   :  { %v2166_v2 = vpack.c.b16 %v2165_v60, %v2164_v5  ;;  %v6316_v62 = vpack.c.b16 %v2227_v45, %v2226_v34  ;;  %v2212_v37 = vmul.f32 %v2200_v33, %v6824_v36  ;;  %v2213_v19 = vmul.f32 %v2201_v22, %v6825_v32  ;;  %v6832_v34 = vld [vmem:[#allocation46_spill] sm:$0xff]  ;;  %v6833_v45 = vld [vmem:[#allocation47_spill] sm:$0xff] }
 0xb06   :  { %v2225_v9 = vpack.c.bf16 %v2217_v51, %v2216_v18  ;;  %v2224_v24 = vpack.c.bf16 %v2215_v49, %v2214_v43  ;;  %v2210_v48 = vmul.f32 %v2200_v33, %v6826_v35  ;;  %v2211_v1 = vmul.f32 %v2201_v22, %v6827_v0  ;;  %v6835_v43 = vld [vmem:[#allocation49_spill] sm:$0xff] }
 0xb07   :  { %v2168_v47 = vunpack.c.l.bf16 %v2166_v2  ;;  %v2169_v23 = vunpack.c.h.bf16 %v2166_v2  ;;  %v2223_v53 = vpack.c.bf16 %v2213_v19, %v2212_v37  ;;  %v2209_v44 = vmul.f32 %v2201_v22, %v6829_v12 }
 0xb08   :  { %2255 = vmatpush.bf16.msra.mxu2 %v2225_v9  ;;  %v2206_v14 = vmul.f32 %v2200_v33, %v6830_v16  ;;  %v2207_v58 = vmul.f32 %v2201_v22, %v6831_v39  ;;  %v2204_v60 = vmul.f32 %v2200_v33, %v6832_v34  ;;  %v2205_v18 = vmul.f32 %v2201_v22, %v6833_v45  ;;  %v6834_v9 = vld [vmem:[#allocation48_spill] sm:$0xff] }
 0xb09   :  { %v2184_v59 = vmul.f32 %v2168_v47, %v5402_v38  ;;  %v2185_v3 = vmul.f32 %v2169_v23, %v5412_v13  ;;  %v2182_v52 = vmul.f32 %v2168_v47, %v6822_v55  ;;  %v2183_v25 = vmul.f32 %v2169_v23, %v6823_v8  ;;  %v6828_v13 = vld [vmem:[#allocation40_spill] sm:$0xff] }
 0xb0a   :  { %v2222_v38 = vpack.c.bf16 %v2211_v1, %v2210_v48  ;;  %v2208_v54 = vmul.f32 %v2200_v33, %v6828_v13  ;;  %v2180_v61 = vmul.f32 %v2168_v47, %v6824_v36  ;;  %v2181_v30 = vmul.f32 %v2169_v23, %v6825_v32  ;;  %v6836_v1 = vld [vmem:[#allocation52_spill] sm:$0xff] }
 0xb0b   :  { %v2193_v29 = vpack.c.bf16 %v2185_v3, %v2184_v59  ;;  %v2192_v15 = vpack.c.bf16 %v2183_v25, %v2182_v52  ;;  %v2220_v5 = vpack.c.bf16 %v2207_v58, %v2206_v14  ;;  %v2219_v2 = vpack.c.bf16 %v2205_v18, %v2204_v60  ;;  %v6837_v25 = vld [vmem:[#allocation53_spill] sm:$0xff] }
 0xb0c   :  { %2256 = vmatpush.bf16.msra.mxu2 %v2224_v24  ;;  %v2221_v50 = vpack.c.bf16 %v2209_v44, %v2208_v54  ;;  %v2191_v51 = vpack.c.bf16 %v2181_v30, %v2180_v61  ;;  %v2202_v55 = vmul.f32 %v2200_v33, %v6834_v9  ;;  %v2203_v8 = vmul.f32 %v2201_v22, %v6835_v43  ;;  %v4620_v30 = vld [vmem:[%s6728_s18 + $0x10] sm:$0xff]  ;;  %v4472_v60 = vld [vmem:[%s6606_s10 + $0x78] sm:$0xff] }
 0xb0d   :  { %2230 = vmatpush.bf16.xpose.msra.mxu1 %v2193_v29  ;;  %v2178_v49 = vmul.f32 %v2168_v47, %v6826_v35  ;;  %v2179_v59 = vmul.f32 %v2169_v23, %v6827_v0  ;;  %v2176_v36 = vmul.f32 %v2168_v47, %v6828_v13  ;;  %v2177_v37 = vmul.f32 %v2169_v23, %v6829_v12  ;;  %v6838_v12 = vld [vmem:[#allocation50_spill] sm:$0xff] }
 0xb0e   :  { %v2218_v3 = vpack.c.bf16 %v2203_v8, %v2202_v55  ;;  %v2174_v19 = vmul.f32 %v2168_v47, %v6830_v16  ;;  %v2175_v33 = vmul.f32 %v2169_v23, %v6831_v39  ;;  %v2172_v29 = vmul.f32 %v2168_v47, %v6832_v34  ;;  %v4622_v34 = vld [vmem:[%s6728_s18] sm:$0xff]  ;;  %v4624_v55 = vld [vmem:[%s6768_s25 + $0x8] sm:$0xff] }
 0xb0f   :  { %v2190_v24 = vpack.c.bf16 %v2179_v59, %v2178_v49  ;;  %v2189_v32 = vpack.c.bf16 %v2177_v37, %v2176_v36  ;;  %v2170_v48 = vmul.f32 %v2168_v47, %v6834_v9  ;;  %v2171_v0 = vmul.f32 %v2169_v23, %v6835_v43  ;;  %v4470_v8 = vld [vmem:[%s6606_s10 + $0x68] sm:$0xff]  ;;  %v4469_v49 = vld [vmem:[%s6606_s10 + $0x60] sm:$0xff]  ;;  %v4468_v59 = vld [vmem:[%s6606_s10 + $0x58] sm:$0xff] }
 0xb10   :  { %2257 = vmatpush.bf16.msra.mxu2 %v2223_v53  ;;  %v2188_v22 = vpack.c.bf16 %v2175_v33, %v2174_v19  ;;  %v2173_v53 = vmul.f32 %v2169_v23, %v6833_v45  ;;  %v2598_v52 = vmul.f32 %v6836_v1, %v5318_v41  ;;  %v2596_v44 = vmul.f32 %v6838_v12, %v5340_v56  ;;  %v4471_v45 = vld [vmem:[%s6606_s10 + $0x70] sm:$0xff]  ;;  %v4465_v36 = vld [vmem:[%s6606_s10 + $0x40] sm:$0xff] }
 0xb11   :  { %v2186_v13 = vpack.c.bf16 %v2171_v0, %v2170_v48  ;;  %v2594_v47 = vmul.f32 %v6836_v1, %v5388_v26  ;;  %v2595_v41 = vmul.f32 %v6837_v25, %v5390_v27  ;;  %v2592_v23 = vmul.f32 %v6838_v12, %v5377_v20  ;;  %v6840_v0 = vld [vmem:[#allocation58_spill] sm:$0xff] }
 0xb12   :  { %v2187_v35 = vpack.c.bf16 %v2173_v53, %v2172_v29  ;;  %v2590_v14 = vmul.f32 %v6836_v1, %v5547_v4  ;;  %v2591_v26 = vmul.f32 %v6837_v25, %v5559_v57  ;;  %v2587_v58 = vmul.f32 %v6837_v25, %v6819_v40  ;;  %v4617_v40 = vld [vmem:[%s6728_s18 + $0x28] sm:$0xff] }
 0xb13   :  { %v2584_v57 = vmul.f32 %v6838_v12, %v6820_v7  ;;  %v4618_v7 = vld [vmem:[%s6728_s18 + $0x20] sm:$0xff] }
 0xb14   :  { %2258 = vmatpush.bf16.msra.mxu2 %v2222_v38  ;;  %v2599_v38 = vmul.f32 %v6837_v25, %v5320_v42  ;;  %v2621_v42 = vpack.c.bf16 %v2595_v41, %v2594_v47  ;;  %v2619_v27 = vpack.c.bf16 %v2591_v26, %v2590_v14  ;;  %v6843_v25 = vld [vmem:[#allocation55_spill] sm:$0xff]  ;;  %v6852_v47 = vld [vmem:[#allocation18_spill] sm:$0xff]  ;;  %v6853_v41 = vld [vmem:[#allocation61_spill] sm:$0xff] }
 0xb15   :  { %2231 = vmatpush.bf16.xpose.msra.mxu1 %v2192_v15  ;;  %v6839_v15 = vld [vmem:[#allocation51_spill] sm:$0xff]  ;;  %v6859_v26 = vld [vmem:[#allocation62_spill] sm:$0xff] }
 0xb16   :  { %v2623_v54 = vpack.c.bf16 %v2599_v38, %v2598_v52  ;;  %v2593_v56 = vmul.f32 %v6839_v15, %v5379_v21  ;;  %v2589_v39 = vmul.f32 %v6839_v15, %v5591_v28  ;;  %v2586_v21 = vmul.f32 %v6836_v1, %v6818_v11  ;;  %v4615_v28 = vld [vmem:[%s6728_s18 + $0x38] sm:$0xff]  ;;  %v4616_v11 = vld [vmem:[%s6728_s18 + $0x30] sm:$0xff]  ;;  %v6844_v38 = vld [vmem:[#allocation54_spill] sm:$0xff] }
 0xb17   :  { %v2585_v61 = vmul.f32 %v6839_v15, %v6821_v46  ;;  %v4619_v46 = vld [vmem:[%s6728_s18 + $0x18] sm:$0xff]  ;;  %v6858_v14 = vld [vmem:[#allocation63_spill] sm:$0xff] }
 0xb18   :  { %2259 = vmatpush.bf16.msra.mxu2 %v2221_v50  ;;  %v2597_v50 = vmul.f32 %v6839_v15, %v5352_v63  ;;  %v2620_v63 = vpack.c.bf16 %v2593_v56, %v2592_v23  ;;  %v2617_v4 = vpack.c.bf16 %v2587_v58, %v2586_v21  ;;  %v6841_v1 = vld [vmem:[#allocation57_spill] sm:$0xff]  ;;  %v6849_v15 = vld [vmem:[#allocation14_spill] sm:$0xff] }
 0xb19   :  { %v6842_v52 = vpack.c.bf16 %v6840_v0, %v6841_v1  ;;  %v6855_v23 = vld [vmem:[#allocation25_spill] sm:$0xff] }
 0xb1a   :  { %v2622_v16 = vpack.c.bf16 %v2597_v50, %v2596_v44  ;;  %v6850_v50 = vld [vmem:[#allocation56_spill] sm:$0xff]  ;;  %v6856_v56 = vld [vmem:[#allocation17_spill] sm:$0xff] }
 0xb1c   :  { %2260 = vmatpush.bf16.msra.mxu2 %v2220_v5  ;;  %v4621_v5 = vld [vmem:[%s6728_s18 + $0x8] sm:$0xff] }
 0xb1d   :  { %2232 = vmatpush.bf16.xpose.msra.mxu1 %v2191_v51  ;;  %v4623_v51 = vld [vmem:[%s6768_s25] sm:$0xff] }
 0xb20   :  { %2261 = vmatpush.bf16.msra.mxu2 %v2219_v2 }
 0xb24   :  { %2262 = vmatpush.bf16.msra.mxu2 %v2218_v3  ;;  %v4467_v3 = vld [vmem:[%s6606_s10 + $0x50] sm:$0xff] }
 0xb25   :  { %2233 = vmatpush.bf16.xpose.msra.mxu1 %v2190_v24  ;;  %v4466_v24 = vld [vmem:[%s6606_s10 + $0x48] sm:$0xff] }
 0xb28   :  { %2493 = vmatpush.bf16.msrb.mxu2 %v4472_v60 }
 0xb2c   :  { %2494 = vmatpush.bf16.msrb.mxu2 %v4471_v45 }
 0xb2d   :  { %2234 = vmatpush.bf16.xpose.msra.mxu1 %v2189_v32 }
 0xb30   :  { %2495 = vmatpush.bf16.msrb.mxu2 %v4470_v8 }
 0xb34   :  { %2496 = vmatpush.bf16.msrb.mxu2 %v4469_v49 }
 0xb35   :  { %2235 = vmatpush.bf16.xpose.msra.mxu1 %v2188_v22 }
 0xb38   :  { %2497 = vmatpush.bf16.msrb.mxu2 %v4468_v59 }
 0xb3c   :  { %2498 = vmatpush.bf16.msrb.mxu2 %v4467_v3 }
 0xb3d   :  { %2236 = vmatpush.bf16.xpose.msra.mxu1 %v2187_v35 }
 0xb40   :  { %2499 = vmatpush.bf16.msrb.mxu2 %v4466_v24 }
 0xb44   :  { %2500 = vmatpush.bf16.msrb.mxu2 %v4465_v36 }
 0xb45   :  { %2237 = vmatpush.bf16.xpose.msra.mxu1 %v2186_v13  ;;  %v6845_v13 = vpack.c.bf16 %v6843_v25, %v6844_v38  ;;  %v6471_v38 = vld [vmem:[%s6616_s20 + $0x4] sm:$0x7] }
 0xb4c   :  { %2238 = vmatmul.bf16.vlgmr.msra.gmra.mxu1 %v6316_v62  ;;  %v2588_v62 = vmul.f32 %v6838_v12, %v5589_v17  ;;  %v2616_v17 = vpack.c.bf16 %v2585_v61, %v2584_v57  ;;  %v6847_v12 = vld [vmem:[#allocation59_spill] sm:$0xff] }
 0xb4d   :  { %2680 = vmatpush.bf16.msrb.mxu1 %v2623_v54  ;;  %v6846_v54 = vld [vmem:[#allocation60_spill] sm:$0xff] }
 0xb4e   :  { %v2618_v20 = vpack.c.bf16 %v2589_v39, %v2588_v62  ;;  %v6848_v44 = vpack.c.bf16 %v6846_v54, %v6847_v12  ;;  %v6861_v62 = vld [vmem:[#allocation65_spill] sm:$0xff]  ;;  %v6862_v39 = vld [vmem:[#allocation64_spill] sm:$0xff]  ;;  %v2416_v12 = vperm.slane %v6471_v38, 0 }
 0xb51   :  { %2681 = vmatpush.bf16.msrb.mxu1 %v2622_v16  ;;  %v6851_v16 = vpack.c.bf16 %v6849_v15, %v6850_v50  ;;  %v6477_v15 = vld [vmem:[%s6617_s21 + $0x4] sm:$0x7]  ;;  %s3313_s21 = sshll.u32 %s4747_s1, 4  ;;  %s3314_s21 = int_to_ptr.vmem [resolvable:$true] %s3313_s21 }
 0xb55   :  { %2682 = vmatpush.bf16.msrb.mxu1 %v2621_v42  ;;  %v6854_v42 = vpack.c.bf16 %v6852_v47, %v6853_v41  ;;  %v2419_v41 = vperm.slane %v6477_v15, 0 }
 0xb59   :  { %2683 = vmatpush.bf16.msrb.mxu1 %v2620_v63  ;;  %v6857_v63 = vpack.c.bf16 %v6855_v23, %v6856_v56 }
 0xb5d   :  { %2684 = vmatpush.bf16.msrb.mxu1 %v2619_v27  ;;  %v6860_v27 = vpack.c.bf16 %v6858_v14, %v6859_v26  ;;  %v4625_v14 = vld [vmem:[%s6728_s18 + $0x78] sm:$0xff]  ;;  %v4626_v26 = vld [vmem:[%s6728_s18 + $0x70] sm:$0xff] }
 0xb61   :  { %2685 = vmatpush.bf16.msrb.mxu1 %v2618_v20  ;;  %v6863_v20 = vpack.c.bf16 %v6861_v62, %v6862_v39  ;;  %v4628_v62 = vld [vmem:[%s6728_s18 + $0x60] sm:$0xff]  ;;  %v4629_v39 = vld [vmem:[%s6728_s18 + $0x58] sm:$0xff] }
 0xb65   :  { %2686 = vmatpush.bf16.msrb.mxu1 %v2617_v4 }
 0xb69   :  { %2687 = vmatpush.bf16.msrb.mxu1 %v2616_v17 }
 0xb6d   :  { %2708 = vmatpush.bf16.msra.mxu1 %v4615_v28 }
 0xb71   :  { %2709 = vmatpush.bf16.msra.mxu1 %v4616_v11 }
 0xb75   :  { %2710 = vmatpush.bf16.msra.mxu1 %v4617_v40 }
 0xb79   :  { %2711 = vmatpush.bf16.msra.mxu1 %v4618_v7 }
 0xb7d   :  { %2712 = vmatpush.bf16.msra.mxu1 %v4619_v46 }
 0xb81   :  { %2713 = vmatpush.bf16.msra.mxu1 %v4620_v30  ;;  %v4534_v30 = vld [vmem:[%s6605_s9 + $0x1] ss:$0 sm:$0xff] }
 0xb85   :  { %2714 = vmatpush.bf16.msra.mxu1 %v4621_v5 }
 0xb89   :  { %2715 = vmatpush.bf16.msra.mxu1 %v4622_v34 }
 0xbc9   :  { %v2239_v18 = vpop.f32.mrf.mxu1 }
 0xbca   :  { %v2240_v2 = vadd.f32 %v4623_v51, %v2239_v18 }
 0xbcc   :  { %2244 = vmax.xlane.f32.xlu1 %v2240_v2 }
 0xbd1   :  { %v2241_v9 = vpop.f32.mrf.mxu1 }
 0xbd2   :  { %v2242_v43 = vadd.f32 %v4624_v55, %v2241_v9 }
 0xbd4   :  { %2246 = vmax.xlane.f32.xlu2 %v2242_v43 }
 0xc3f   :  { %v2245_v37 = vpop.xlane.xlu1 %2244 }
 0xc40   :  { %v2248_v32 = vsub.f32 %v2240_v2, %v2245_v37 }
 0xc42   :  { %v2250_v19 = vmul.f32 1.442695, %v2248_v32 }
 0xc44   :  { %4573 = vpow2.f32 %v2250_v19 }
 0xc47   :  { %v2247_v33 = vpop.xlane.xlu2 %2246 }
 0xc48   :  { %v2249_v22 = vsub.f32 %v2242_v43, %v2247_v33 }
 0xc4a   :  { %v2252_v29 = vmul.f32 1.442695, %v2249_v22  ;;  %v4574_v53 = vpop.eup %4573 }
 0xc4c   :  { %4575 = vpow2.f32 %v2252_v29 }
 0xc52   :  { %v4576_v35 = vpop.eup %4575 }
 0xc53   :  { %v2254_v48 = vpack.c.bf16 %v4576_v35, %v4574_v53 }
 0xc55   :  { %2263 = vmatmul.bf16.vlgmr.msra.gmra.mxu2 %v2254_v48  ;;  %2277 = vmatmul.bf16.vlgmr.msra.gmra.mxu3 %v2254_v48 }
 0xc56   :  { %2694 = vmatpush.bf16.msra.mxu2 %v6842_v52 }
 0xc5a   :  { %2695 = vmatpush.bf16.msra.mxu2 %v6845_v13 }
 0xc5e   :  { %2696 = vmatpush.bf16.msra.mxu2 %v6848_v44 }
 0xc62   :  { %2697 = vmatpush.bf16.msra.mxu2 %v6851_v16 }
 0xc66   :  { %2698 = vmatpush.bf16.msra.mxu2 %v6854_v42 }
 0xc6a   :  { %2699 = vmatpush.bf16.msra.mxu2 %v6857_v63 }
 0xc6e   :  { %2700 = vmatpush.bf16.msra.mxu2 %v6860_v27  ;;  %v4627_v27 = vld [vmem:[%s6728_s18 + $0x68] sm:$0xff] }
 0xc72   :  { %2701 = vmatpush.bf16.msra.mxu2 %v6863_v20  ;;  %v4630_v20 = vld [vmem:[%s6728_s18 + $0x50] sm:$0xff] }
 0xcd8   :  { %v2278_v21 = vpop.f32.mrf.mxu3  ;;  %v2264_v4 = vpop.f32.mrf.mxu2 }
 0xcd9   :  { %v2283_v58 = vmax.f32 %v2278_v21, 1e-30  ;;  %v4631_v21 = vld [vmem:[%s6728_s18 + $0x48] sm:$0xff] }
 0xcdb   :  { %4577 = vrcp.f32 %v2283_v58  ;;  %v4632_v58 = vld [vmem:[%s6728_s18 + $0x40] sm:$0xff] }
 0xce0   :  { %v2280_v57 = vpop.f32.mrf.mxu3  ;;  %v2266_v11 = vpop.f32.mrf.mxu2 }
 0xce1   :  { %v2284_v61 = vmax.f32 %v2280_v57, 1e-30  ;;  %v4578_v17 = vpop.eup %4577  ;;  %v4535_v57 = vld [vmem:[%s6607_s11 + $0x1] ss:$0 sm:$0xff] }
 0xce2   :  { %v2287_v40 = vmul.f32 %v4578_v17, %v2264_v4 }
 0xce3   :  { %4579 = vrcp.f32 %v2284_v61 }
 0xce9   :  { %v4580_v28 = vpop.eup %4579 }
 0xcea   :  { %v2288_v7 = vmul.f32 %v4580_v28, %v2266_v11 }
 0xcec   :  { %v2289_v46 = vpack.c.bf16 %v2288_v7, %v2287_v40 }
 0xcee   :  { %2368 = vmatmul.bf16.vlgmr.msra.gmra.mxu0 %v2289_v46  ;;  %v4633_v46 = vld [vmem:[%s6817_s12 + $0x8] sm:$0xff] }
 0xd6b   :  { %v2369_v5 = vpop.f32.mrf.mxu0 }
 0xd6c   :  { %v2370_v34 = vadd.f32 %v4534_v30, %v2369_v5  ;;  %v4634_v5 = vld [vmem:[%s6817_s12] sm:$0xff] }
 0xd6e   :  { %v2374_v60 = vadd.f32 %v2370_v34, %v6259_v6 }
 0xd70   :  { %2376 = vadd.xlane.f32.xlu0 %v2374_v60 }
 0xd73   :  { %v2371_v45 = vpop.f32.mrf.mxu0 }
 0xd74   :  { %v2372_v18 = vadd.f32 %v4534_v30, %v2371_v45 }
 0xd76   :  { %v2375_v51 = vadd.f32 %v2372_v18, %v6261_v10 }
 0xd78   :  { %2378 = vadd.xlane.f32.xlu1 %v2375_v51 }
 0xde3   :  { %v2377_v2 = vpop.xlane.xlu0 %2376 }
 0xde4   :  { %v2380_v9 = vmul.f32 %v2377_v2, %v5922_v31 }
 0xde6   :  { %v2382_v55 = vsub.f32 %v2374_v60, %v2380_v9  ;;  %v4636_v9 = vld [vmem:[%s6817_s12 + $0x10] sm:$0xff] }
 0xde8   :  { %v2384_v43 = vmul.f32 %v2382_v55, %v2382_v55 }
 0xdea   :  { %2386 = vadd.xlane.f32.xlu2 %v2384_v43 }
 0xdeb   :  { %v2379_v8 = vpop.xlane.xlu1 %2378 }
 0xdec   :  { %v2381_v49 = vmul.f32 %v2379_v8, %v5922_v31 }
 0xdee   :  { %v2383_v59 = vsub.f32 %v2375_v51, %v2381_v49  ;;  %v4635_v51 = vld [vmem:[%s6817_s12 + $0x18] sm:$0xff] }
 0xdf0   :  { %v2385_v3 = vmul.f32 %v2383_v59, %v2383_v59 }
 0xdf2   :  { %2388 = vadd.xlane.f32.xlu0 %v2385_v3 }
 0xe5d   :  { %v2387_v24 = vpop.xlane.xlu2 %2386 }
 0xe5e   :  { %v2390_v6 = vmul.f32 %v2387_v24, %v5922_v31 }
 0xe60   :  { %v2392_v36 = vadd.f32 1e-05, %v2390_v6 }
 0xe62   :  { %4581 = vrsqrt.f32 %v2392_v36  ;;  %vm2400_vm4 = vweird.f32 %v2392_v36 }
 0xe65   :  { %v2389_v37 = vpop.xlane.xlu0 %2388 }
 0xe66   :  { %v2391_v10 = vmul.f32 %v2389_v37, %v5922_v31 }
 0xe68   :  { %v4582_v32 = vpop.eup %4581  ;;  %v2393_v19 = vadd.f32 1e-05, %v2391_v10 }
 0xe69   :  { %v2395_v33 = vmul.f32 %v4582_v32, %v2392_v36  ;;  %vm2401_vm3 = vweird.f32 %v4582_v32 }
 0xe6a   :  { %4583 = vrsqrt.f32 %v2393_v19  ;;  %vm2402_vm5 = vmor %vm2400_vm4, %vm2401_vm3  ;;  %vm2410_vm7 = vweird.f32 %v2393_v19 }
 0xe6b   :  { %v2396_v22 = vmul.f32 %v4582_v32, %v2395_v33 }
 0xe6d   :  { %v2397_v29 = vmul.f32 0.5, %v2396_v22 }
 0xe6f   :  { %v2398_v53 = vsub.f32 1.5, %v2397_v29 }
 0xe70   :  { %v4584_v35 = vpop.eup %4583 }
 0xe71   :  { %v2399_v48 = vmul.f32 %v4582_v32, %v2398_v53  ;;  %v2405_v0 = vmul.f32 %v4584_v35, %v2393_v19  ;;  %vm2411_vm6 = vweird.f32 %v4584_v35 }
 0xe72   :  { %vm2412_vm8 = vmor %vm2410_vm7, %vm2411_vm6 }
 0xe73   :  { %v2406_v1 = vmul.f32 %v4584_v35, %v2405_v0  ;;  %v2403_v52 = vsel %vm2402_vm5, %v4582_v32, %v2399_v48  ;;  %v4480_v48 = vld [vmem:[#allocation2 + $0x78] sm:$0xff]  ;;  %v4479_v0 = vld [vmem:[#allocation2 + $0x70] sm:$0xff] }
 0xe74   :  { %v2414_v54 = vmul.f32 %v2403_v52, %v2382_v55  ;;  %2813 = vmatpush.bf16.msra.mxu3 %v4480_v48  ;;  %v4478_v52 = vld [vmem:[#allocation2 + $0x68] sm:$0xff] }
 0xe75   :  { %v2407_v25 = vmul.f32 0.5, %v2406_v1 }
 0xe76   :  { %v2417_v47 = vmul.f32 %v2416_v12, %v2414_v54 }
 0xe77   :  { %v2408_v13 = vsub.f32 1.5, %v2407_v25  ;;  %v4477_v25 = vld [vmem:[#allocation2 + $0x60] sm:$0xff] }
 0xe78   :  { %v6480_v23 = vadd.f32 %v2419_v41, %v2417_v47  ;;  %2814 = vmatpush.bf16.msra.mxu3 %v4479_v0 }
 0xe79   :  { %v2409_v44 = vmul.f32 %v4584_v35, %v2408_v13 }
 0xe7b   :  { %v2413_v50 = vsel %vm2412_vm8, %v4584_v35, %v2409_v44  ;;  %v4475_v44 = vld [vmem:[#allocation2 + $0x50] sm:$0xff] }
 0xe7c   :  { %v2415_v16 = vmul.f32 %v2413_v50, %v2383_v59  ;;  %2815 = vmatpush.bf16.msra.mxu3 %v4478_v52  ;;  %v4490_v52 = vld [vmem:[#allocation5 + $0xc4] sm:$0xf0] }
 0xe7e   :  { %v2418_v42 = vmul.f32 %v2416_v12, %v2415_v16  ;;  %v4476_v12 = vld [vmem:[#allocation2 + $0x58] sm:$0xff]  ;;  %v4474_v16 = vld [vmem:[#allocation2 + $0x48] sm:$0xff] }
 0xe80   :  { %v6482_v56 = vadd.f32 %v2419_v41, %v2418_v42  ;;  %2816 = vmatpush.bf16.msra.mxu3 %v4477_v25  ;;  %v4473_v41 = vld [vmem:[#allocation2 + $0x40] sm:$0xff] }
 0xe81   :  { %v4489_v25 = vld [vmem:[#allocation5 + $0xc4] sm:$0xf] }
 0xe82   :  { %v2422_v63 = vpack.c.bf16 %v6482_v56, %v6480_v23 }
 0xe84   :  { %2501 = vmatmul.bf16.vlgmr.msrb.gmra.mxu2 %v2422_v63  ;;  %2817 = vmatpush.bf16.msra.mxu3 %v4476_v12 }
 0xe85   :  { %2722 = vmatpush.bf16.msrb.mxu2 %v4625_v14 }
 0xe88   :  { %2818 = vmatpush.bf16.msra.mxu3 %v4475_v44  ;;  %v4162_v44 = vld [vmem:[#allocation5 + $0xb0] sm:$0xf] }
 0xe89   :  { %2723 = vmatpush.bf16.msrb.mxu2 %v4626_v26 }
 0xe8c   :  { %2819 = vmatpush.bf16.msra.mxu3 %v4474_v16 }
 0xe8d   :  { %2724 = vmatpush.bf16.msrb.mxu2 %v4627_v27 }
 0xe90   :  { %2820 = vmatpush.bf16.msra.mxu3 %v4473_v41  ;;  %v4164_v41 = vld [vmem:[#allocation5 + $0xb8] sm:$0xf0] }
 0xe91   :  { %2725 = vmatpush.bf16.msrb.mxu2 %v4628_v62 }
 0xe95   :  { %2726 = vmatpush.bf16.msrb.mxu2 %v4629_v39 }
 0xe99   :  { %2727 = vmatpush.bf16.msrb.mxu2 %v4630_v20 }
 0xe9d   :  { %2728 = vmatpush.bf16.msrb.mxu2 %v4631_v21 }
 0xea1   :  { %2729 = vmatpush.bf16.msrb.mxu2 %v4632_v58 }
 0xf07   :  { %v2502_v4 = vpop.f32.mrf.mxu2 }
 0xf08   :  { %v2503_v17 = vadd.f32 %v4535_v57, %v2502_v4 }
 0xf0f   :  { %v2504_v61 = vpop.f32.mrf.mxu2 }
 0xf10   :  { %v2505_v28 = vadd.f32 %v4535_v57, %v2504_v61 }
 0xf12   :  { %v2507_v11 = vpack.c.bf16 %v2505_v28, %v2503_v17  ;;  %v4536_v28 = vld [vmem:[%s6611_s15 + $0x1] ss:$0 sm:$0xff] }
 0xf14   :  { %2640 = vmatmul.bf16.vlgmr.msrb.gmra.mxu3 %v2507_v11  ;;  %2654 = vmatmul.bf16.vlgmr.msrb.gmra.mxu0 %v2507_v11 }
 0xf91   :  { %v2655_v40 = vpop.f32.mrf.mxu0 }
 0xf92   :  { %v2656_v30 = vadd.f32 %v4633_v46, %v2655_v40 }
 0xf97   :  { %v2641_v7 = vpop.f32.mrf.mxu3 }
 0xf98   :  { %v2642_v34 = vadd.f32 %v4634_v5, %v2641_v7 }
 0xf99   :  { %v2657_v45 = vpop.f32.mrf.mxu0 }
 0xf9a   :  { %v2660_v60 = vmax.f32 %v2642_v34, %v2656_v30  ;;  %v2658_v2 = vadd.f32 %v4635_v51, %v2657_v45 }
 0xf9c   :  { %2661 = vmax.xlane.f32.xlu1 %v2660_v60 }
 0xf9f   :  { %v2643_v18 = vpop.f32.mrf.mxu3 }
 0xfa0   :  { %v2644_v55 = vadd.f32 %v4636_v9, %v2643_v18 }
 0xfa2   :  { %v2663_v43 = vmax.f32 %v2644_v55, %v2658_v2 }
 0xfa4   :  { %2664 = vmax.xlane.f32.xlu2 %v2663_v43  ;;  %v4495_v43 = vld [vmem:[#allocation5 + $0xf4] sm:$0xf] }
0x100f   :  { %v2662_v8 = vpop.xlane.xlu1 %2661 }
0x1010   :  { %v2666_v49 = vsub.f32 %v2642_v34, %v2662_v8  ;;  %v2667_v59 = vsub.f32 %v2656_v30, %v2662_v8 }
0x1012   :  { %v2670_v3 = vmul.f32 1.442695, %v2666_v49  ;;  %v2672_v24 = vmul.f32 1.442695, %v2667_v59  ;;  %v4196_v49 = vld [vmem:[#allocation5 + $0xf8] sm:$0xf0] }
0x1013   :  { %v4199_v59 = vor.u32 %v4495_v43, %v4196_v49  ;;  %v4482_v43 = vld [vmem:[#allocation5 + $0x84] sm:$0xf0] }
0x1014   :  { %4585 = vpow2.f32 %v2670_v3  ;;  %v4186_v3 = vld [vmem:[#allocation5 + $0xe0] sm:$0xf] }
0x1015   :  { %4587 = vpow2.f32 %v2672_v24  ;;  %v4494_v24 = vld [vmem:[#allocation5 + $0xe4] sm:$0xf0] }
0x1017   :  { %v2665_v6 = vpop.xlane.xlu2 %2664 }
0x1018   :  { %v2668_v36 = vsub.f32 %v2644_v55, %v2665_v6  ;;  %v2669_v37 = vsub.f32 %v2658_v2, %v2665_v6  ;;  %v4496_v55 = vld [vmem:[#allocation5 + $0xf4] sm:$0xf0]  ;;  %v4493_v6 = vld [vmem:[#allocation5 + $0xe4] sm:$0xf] }
0x101a   :  { %v2674_v10 = vmul.f32 1.442695, %v2668_v36  ;;  %v2676_v32 = vmul.f32 1.442695, %v2669_v37  ;;  %v4586_v19 = vpop.eup %4585  ;;  %v4187_v37 = vor.u32 %v4494_v24, %v4186_v3  ;;  %v4481_v3 = vld [vmem:[#allocation5 + $0x84] sm:$0xf] }
0x101b   :  { %v4588_v33 = vpop.eup %4587  ;;  %v4140_v24 = vld [vmem:[#allocation5 + $0x88] sm:$0xf0] }
0x101c   :  { %4589 = vpow2.f32 %v2674_v10  ;;  %v4188_v10 = vld [vmem:[#allocation5 + $0xe8] sm:$0xf0] }
0x101d   :  { %4591 = vpow2.f32 %v2676_v32  ;;  %v4178_v32 = vld [vmem:[#allocation5 + $0xd0] sm:$0xf] }
0x1022   :  { %v4590_v22 = vpop.eup %4589 }
0x1023   :  { %v4592_v29 = vpop.eup %4591  ;;  %v2678_v53 = vpack.c.bf16 %v4590_v22, %v4586_v19  ;;  %v4492_v19 = vld [vmem:[#allocation5 + $0xd4] sm:$0xf0]  ;;  %v4191_v22 = vor.u32 %v4493_v6, %v4188_v10  ;;  %v4509_v6 = vld [vmem:[#allocation7 + $0xe0] sm:$0xff]  ;;  %v4143_v10 = vor.u32 %v4481_v3, %v4140_v24 }
0x1024   :  { %v2679_v35 = vpack.c.bf16 %v4592_v29, %v4588_v33  ;;  %v4491_v29 = vld [vmem:[#allocation5 + $0xd4] sm:$0xf] }
0x1025   :  { %2688 = vmatmul.bf16.vlgmr.msrb.gmra.mxu1 %v2678_v53 }
0x1026   :  { %2702 = vmatmul.bf16.vlgmr.msra.gmra.mxu2 %v2679_v35  ;;  %2994 = vmatpush.bf16.msrb.mxu1 %v4199_v59 }
0x102a   :  { %2995 = vmatpush.bf16.msrb.mxu1 %v4191_v22 }
0x1035   :  { %2716 = vmatmul.bf16.vlgmr.msra.gmra.mxu1 %v2678_v53  ;;  %v4180_v53 = vld [vmem:[#allocation5 + $0xd8] sm:$0xf0] }
0x1036   :  { %2730 = vmatmul.bf16.vlgmr.msrb.gmra.mxu2 %v2679_v35  ;;  %v4179_v35 = vor.u32 %v4492_v19, %v4178_v32  ;;  %v4183_v0 = vor.u32 %v4491_v29, %v4180_v53  ;;  %v2869_v29 = vperm.slane %v6471_v38, 1 }
0x1038   :  { %2996 = vmatpush.bf16.msrb.mxu1 %v4183_v0 }
0x10a2   :  { %v2689_v1 = vpop.f32.mrf.mxu1 }
0x10a9   :  { %v2703_v13 = vpop.f32.mrf.mxu2 }
0x10aa   :  { %v2691_v54 = vpop.f32.mrf.mxu1  ;;  %v2704_v21 = vadd.f32 %v2703_v13, %v2689_v1  ;;  %v4170_v1 = vld [vmem:[#allocation5 + $0xc0] sm:$0xf]  ;;  %v4172_v13 = vld [vmem:[#allocation5 + $0xc8] sm:$0xf0] }
0x10ab   :  { %v4175_v12 = vor.u32 %v4489_v25, %v4172_v13 }
0x10ad   :  { %2997 = vmatpush.bf16.msrb.mxu1 %v4175_v12  ;;  %v4500_v12 = vld [vmem:[#allocation7 + $0x98] sm:$0xff] }
0x10b1   :  { %v2705_v50 = vpop.f32.mrf.mxu2 }
0x10b2   :  { %v2717_v47 = vpop.f32.mrf.mxu1  ;;  %v2706_v58 = vadd.f32 %v2705_v50, %v2691_v54  ;;  %v4171_v54 = vor.u32 %v4490_v52, %v4170_v1  ;;  %v4488_v50 = vld [vmem:[#allocation5 + $0xb4] sm:$0xf0]  ;;  %v2872_v1 = vperm.slane %v6477_v15, 1 }
0x10b9   :  { %v2731_v42 = vpop.f32.mrf.mxu2 }
0x10ba   :  { %v2732_v63 = vadd.f32 %v2731_v42, %v2717_v47  ;;  %v2719_v26 = vpop.f32.mrf.mxu1  ;;  %v4487_v47 = vld [vmem:[#allocation5 + $0xb4] sm:$0xf] }
0x10bc   :  { %v2736_v14 = vmax.f32 %v2732_v63, 1e-30  ;;  %v4504_v63 = vld [vmem:[#allocation7 + $0xb8] sm:$0xff] }
0x10bd   :  { %3148 = vmatpush.bf16.msra.mxu2 %v4504_v63 }
0x10be   :  { %4593 = vrcp.f32 %v2736_v14  ;;  %v4512_v14 = vld [vmem:[#allocation7 + $0xf8] sm:$0xff] }
0x10bf   :  { %3162 = vmatpush.bf16.msrb.mxu3 %v4512_v14 }
0x10c1   :  { %v2733_v27 = vpop.f32.mrf.mxu2 }
0x10c2   :  { %v2734_v62 = vadd.f32 %v2733_v27, %v2719_v26  ;;  %v4163_v26 = vor.u32 %v4488_v50, %v4162_v44  ;;  %v4154_v27 = vld [vmem:[#allocation5 + $0xa0] sm:$0xf]  ;;  %v4499_v44 = vld [vmem:[#allocation7 + $0x90] sm:$0xff] }
0x10c3   :  { %v4507_v50 = vld [vmem:[#allocation7 + $0xd0] sm:$0xff] }
0x10c4   :  { %v2737_v39 = vmax.f32 %v2734_v62, 1e-30  ;;  %v4594_v20 = vpop.eup %4593 }
0x10c5   :  { %v2740_v57 = vmul.f32 %v4594_v20, %v2704_v21  ;;  %v4167_v20 = vor.u32 %v4487_v47, %v4164_v41  ;;  %v4486_v21 = vld [vmem:[#allocation5 + $0xa4] sm:$0xf0]  ;;  %v4505_v41 = vld [vmem:[#allocation7 + $0xc0] sm:$0xff] }
0x10c6   :  { %4595 = vrcp.f32 %v2737_v39  ;;  %v4506_v47 = vld [vmem:[#allocation7 + $0xc8] sm:$0xff] }
0x10c7   :  { %2998 = vmatpush.bf16.msrb.mxu1 %v4167_v20 }
0x10cc   :  { %v4596_v4 = vpop.eup %4595 }
0x10cd   :  { %v2741_v61 = vmul.f32 %v4596_v4, %v2706_v58  ;;  %v4503_v58 = vld [vmem:[#allocation7 + $0xb0] sm:$0xff] }
0x10ce   :  { %3149 = vmatpush.bf16.msra.mxu2 %v4503_v58 }
0x10cf   :  { %v2742_v17 = vpack.c.bf16 %v2741_v61, %v2740_v57  ;;  %v4485_v57 = vld [vmem:[#allocation5 + $0xa4] sm:$0xf]  ;;  %v4156_v61 = vld [vmem:[#allocation5 + $0xa8] sm:$0xf0] }
0x10d1   :  { %2821 = vmatmul.bf16.vlgmr.msra.gmra.mxu3 %v2742_v17  ;;  %v4511_v17 = vld [vmem:[#allocation7 + $0xf0] sm:$0xff] }
0x10d2   :  { %3163 = vmatpush.bf16.msrb.mxu3 %v4511_v17 }
0x1154   :  { %v2822_v11 = vpop.f32.mrf.mxu3 }
0x1155   :  { %v2823_v40 = vadd.f32 %v4536_v28, %v2822_v11  ;;  %v4155_v11 = vor.u32 %v4486_v21, %v4154_v27 }
0x1157   :  { %v2827_v7 = vadd.f32 %v2823_v40, %v6480_v23  ;;  %v4159_v40 = vor.u32 %v4485_v57, %v4156_v61 }
0x1159   :  { %2829 = vadd.xlane.f32.xlu0 %v2827_v7  ;;  %2999 = vmatpush.bf16.msrb.mxu1 %v4159_v40 }
0x115c   :  { %v2824_v46 = vpop.f32.mrf.mxu3 }
0x115d   :  { %v2825_v30 = vadd.f32 %v4536_v28, %v2824_v46  ;;  %v4484_v46 = vld [vmem:[#allocation5 + $0x94] sm:$0xf0] }
0x115f   :  { %v2828_v5 = vadd.f32 %v2825_v30, %v6482_v56  ;;  %v4194_v56 = vld [vmem:[#allocation5 + $0xf0] sm:$0xf]  ;;  %v4502_v30 = vld [vmem:[#allocation7 + $0xa8] sm:$0xff] }
0x1160   :  { %v4195_v8 = vor.u32 %v4496_v55, %v4194_v56  ;;  %v4138_v55 = vld [vmem:[#allocation5 + $0x80] sm:$0xf]  ;;  %3150 = vmatpush.bf16.msra.mxu2 %v4502_v30 }
0x1161   :  { %2831 = vadd.xlane.f32.xlu1 %v2828_v5 }
0x1162   :  { %2980 = vmatpush.bf16.msra.mxu0 %v4195_v8  ;;  %v4501_v8 = vld [vmem:[#allocation7 + $0xa0] sm:$0xff] }
0x1164   :  { %3151 = vmatpush.bf16.msra.mxu2 %v4501_v8 }
0x1166   :  { %2981 = vmatpush.bf16.msra.mxu0 %v4187_v37  ;;  %v4139_v37 = vor.u32 %v4482_v43, %v4138_v55 }
0x1168   :  { %3152 = vmatpush.bf16.msra.mxu2 %v4500_v12 }
0x116a   :  { %2982 = vmatpush.bf16.msra.mxu0 %v4179_v35 }
0x116c   :  { %3153 = vmatpush.bf16.msra.mxu2 %v4499_v44  ;;  %v4514_v44 = vld [vmem:[%s6618_s22 + $0x8] sm:$0xff] }
0x116e   :  { %2983 = vmatpush.bf16.msra.mxu0 %v4171_v54 }
0x1172   :  { %2984 = vmatpush.bf16.msra.mxu0 %v4163_v26 }
0x1176   :  { %2985 = vmatpush.bf16.msra.mxu0 %v4155_v11 }
0x11cc   :  { %v2830_v34 = vpop.xlane.xlu0 %2829 }
0x11cd   :  { %v2833_v60 = vmul.f32 %v2830_v34, %v5922_v31  ;;  %v4483_v34 = vld [vmem:[#allocation5 + $0x94] sm:$0xf] }
0x11cf   :  { %v6531_v45 = vsub.f32 %v2827_v7, %v2833_v60  ;;  %v4146_v7 = vld [vmem:[#allocation5 + $0x90] sm:$0xf]  ;;  %v4148_v60 = vld [vmem:[#allocation5 + $0x98] sm:$0xf0] }
0x11d0   :  { %v4151_v56 = vor.u32 %v4483_v34, %v4148_v60 }
0x11d1   :  { %v2837_v18 = vmul.f32 %v6531_v45, %v6531_v45 }
0x11d2   :  { %3000 = vmatpush.bf16.msrb.mxu1 %v4151_v56 }
0x11d3   :  { %2839 = vadd.xlane.f32.xlu2 %v2837_v18  ;;  %v4510_v18 = vld [vmem:[#allocation7 + $0xe8] sm:$0xff] }
0x11d4   :  { %v2832_v51 = vpop.xlane.xlu1 %2831  ;;  %3164 = vmatpush.bf16.msrb.mxu3 %v4510_v18 }
0x11d5   :  { %v2834_v2 = vmul.f32 %v2832_v51, %v5922_v31 }
0x11d6   :  { %3001 = vmatpush.bf16.msrb.mxu1 %v4143_v10 }
0x11d7   :  { %v6536_v9 = vsub.f32 %v2828_v5, %v2834_v2  ;;  %v4147_v2 = vor.u32 %v4484_v46, %v4146_v7  ;;  %v4537_v7 = vld [vmem:[%s6615_s19 + $0x1] ss:$0 sm:$0xff] }
0x11d8   :  { %3165 = vmatpush.bf16.msrb.mxu3 %v4509_v6 }
0x11d9   :  { %v2838_v23 = vmul.f32 %v6536_v9, %v6536_v9  ;;  %2986 = vmatpush.bf16.msra.mxu0 %v4147_v2 }
0x11db   :  { %2841 = vadd.xlane.f32.xlu0 %v2838_v23 }
0x11dd   :  { %2987 = vmatpush.bf16.msra.mxu0 %v4139_v37 }
0x1246   :  { %v2840_v36 = vpop.xlane.xlu2 %2839 }
0x1247   :  { %v2843_v33 = vmul.f32 %v2840_v36, %v5922_v31 }
0x1249   :  { %v6541_v48 = vadd.f32 1e-05, %v2843_v33 }
0x124b   :  { %4597 = vrsqrt.f32 %v6541_v48  ;;  %vm2853_vm10 = vweird.f32 %v6541_v48 }
0x124e   :  { %v2842_v16 = vpop.xlane.xlu0 %2841 }
0x124f   :  { %v2844_v42 = vmul.f32 %v2842_v16, %v5922_v31  ;;  %v4498_v16 = vld [vmem:[#allocation7 + $0x88] sm:$0xff] }
0x1250   :  { %3154 = vmatpush.bf16.msra.mxu2 %v4498_v16 }
0x1251   :  { %v4598_v62 = vpop.eup %4597  ;;  %v2846_v39 = vadd.f32 1e-05, %v2844_v42  ;;  %v4135_v42 = vld [vmem:[%s6613_s17 + $0x2] sm:$0x3] }
0x1252   :  { %v2848_v4 = vmul.f32 %v4598_v62, %v6541_v48  ;;  %vm2854_vm9 = vweird.f32 %v4598_v62  ;;  %v2896_v26 = vperm.slane %v4135_v42, 0  ;;  %v2897_v27 = vperm.slane %v4135_v42, 1 }
0x1253   :  { %4599 = vrsqrt.f32 %v2846_v39  ;;  %vm2855_vm11 = vmor %vm2853_vm10, %vm2854_vm9  ;;  %vm2863_vm13 = vweird.f32 %v2846_v39  ;;  %v3218_v42 = vperm.slane %v6471_v38, 2 }
0x1254   :  { %v2849_v28 = vmul.f32 %v4598_v62, %v2848_v4 }
0x1256   :  { %v2850_v5 = vmul.f32 0.5, %v2849_v28 }
0x1258   :  { %v2851_v51 = vsub.f32 1.5, %v2850_v5 }
0x1259   :  { %v4600_v23 = vpop.eup %4599 }
0x125a   :  { %v2852_v49 = vmul.f32 %v4598_v62, %v2851_v51  ;;  %v2858_v59 = vmul.f32 %v4600_v23, %v2846_v39  ;;  %vm2864_vm12 = vweird.f32 %v4600_v23 }
0x125b   :  { %vm2865_vm14 = vmor %vm2863_vm13, %vm2864_vm12 }
0x125c   :  { %v2859_v36 = vmul.f32 %v4600_v23, %v2858_v59  ;;  %v2856_v32 = vsel %vm2855_vm11, %v4598_v62, %v2852_v49 }
0x125d   :  { %v2867_v22 = vmul.f32 %v2856_v32, %v6531_v45  ;;  %v4508_v45 = vld [vmem:[#allocation7 + $0xd8] sm:$0xff] }
0x125e   :  { %v2860_v19 = vmul.f32 0.5, %v2859_v36  ;;  %3166 = vmatpush.bf16.msrb.mxu3 %v4508_v45  ;;  %v4520_v36 = vld [vmem:[%s6618_s22 + $0x38] sm:$0xff] }
0x125f   :  { %v2870_v0 = vmul.f32 %v2869_v29, %v2867_v22  ;;  %3293 = vmatpush.bf16.msrb.mxu0 %v4520_v36 }
0x1260   :  { %v2861_v33 = vsub.f32 1.5, %v2860_v19  ;;  %v4519_v19 = vld [vmem:[%s6618_s22 + $0x30] sm:$0xff] }
0x1261   :  { %v2873_v25 = vadd.f32 %v2872_v1, %v2870_v0 }
0x1262   :  { %v2862_v53 = vmul.f32 %v4600_v23, %v2861_v33  ;;  %3167 = vmatpush.bf16.msrb.mxu3 %v4507_v50  ;;  %v4518_v33 = vld [vmem:[%s6618_s22 + $0x28] sm:$0xff] }
0x1263   :  { %3294 = vmatpush.bf16.msrb.mxu0 %v4519_v19 }
0x1264   :  { %v2866_v35 = vsel %vm2865_vm14, %v4600_v23, %v2862_v53  ;;  %v4517_v53 = vld [vmem:[%s6618_s22 + $0x20] sm:$0xff] }
0x1265   :  { %v2868_v48 = vmul.f32 %v2866_v35, %v6536_v9  ;;  %v4497_v9 = vld [vmem:[#allocation7 + $0x80] sm:$0xff] }
0x1266   :  { %3168 = vmatpush.bf16.msrb.mxu3 %v4506_v47  ;;  %3155 = vmatpush.bf16.msra.mxu2 %v4497_v9  ;;  %v4513_v9 = vld [vmem:[%s6618_s22] sm:$0xff] }
0x1267   :  { %v2871_v52 = vmul.f32 %v2869_v29, %v2868_v48  ;;  %3295 = vmatpush.bf16.msrb.mxu0 %v4518_v33 }
0x1269   :  { %v2874_v13 = vadd.f32 %v2872_v1, %v2871_v52  ;;  %v4516_v1 = vld [vmem:[%s6618_s22 + $0x18] sm:$0xff] }
0x126a   :  { %3169 = vmatpush.bf16.msrb.mxu3 %v4505_v41 }
0x126b   :  { %v2875_v54 = vpack.c.bf16 %v2874_v13, %v2873_v25  ;;  %3296 = vmatpush.bf16.msrb.mxu0 %v4517_v53 }
0x126d   :  { %2988 = vmatmul.bf16.vlgmr.msra.gmra.mxu0 %v2875_v54  ;;  %3002 = vmatmul.bf16.vlgmr.msrb.gmra.mxu1 %v2875_v54 }
0x126f   :  { %3297 = vmatpush.bf16.msrb.mxu0 %v4516_v1 }
0x12ea   :  { %v2989_v63 = vpop.f32.mrf.mxu0  ;;  %v3003_v14 = vpop.f32.mrf.mxu1 }
0x12eb   :  { %v2990_v62 = vadd.f32 %v2989_v63, %v2896_v26  ;;  %v3004_v39 = vadd.f32 %v3003_v14, %v2897_v27 }
0x12ed   :  { %v3008_v57 = vmax.f32 %v2990_v62, 0.0  ;;  %v3009_v61 = vmax.f32 %v3004_v39, 0.0 }
0x12f2   :  { %v2991_v20 = vpop.f32.mrf.mxu0  ;;  %v3005_v21 = vpop.f32.mrf.mxu1 }
0x12f3   :  { %v2992_v58 = vadd.f32 %v2991_v20, %v2896_v26  ;;  %v3006_v4 = vadd.f32 %v3005_v21, %v2897_v27  ;;  %v3221_v27 = vperm.slane %v6477_v15, 2 }
0x12f5   :  { %v3010_v17 = vmax.f32 %v2992_v58, 0.0  ;;  %v3011_v28 = vmax.f32 %v3006_v4, 0.0 }
0x12f7   :  { %v3012_v11 = vpack.c.bf16 %v3010_v17, %v3008_v57  ;;  %v3013_v40 = vpack.c.bf16 %v3011_v28, %v3009_v61  ;;  %v4538_v57 = vld [vmem:[%s6619_s23] ss:$0 sm:$0xff] }
0x12f9   :  { %3156 = vmatmul.bf16.vlgmr.msra.gmra.mxu2 %v3012_v11  ;;  %3170 = vmatmul.bf16.vlgmr.msrb.gmra.mxu3 %v3013_v40 }
0x137c   :  { %v3157_v46 = vpop.f32.mrf.mxu2  ;;  %v3171_v30 = vpop.f32.mrf.mxu3 }
0x137d   :  { %v3158_v5 = vadd.f32 %v4537_v7, %v3157_v46 }
0x137f   :  { %v3172_v34 = vadd.f32 %v3171_v30, %v3158_v5 }
0x1381   :  { %v3176_v60 = vadd.f32 %v3172_v34, %v2873_v25 }
0x1383   :  { %3178 = vadd.xlane.f32.xlu1 %v3176_v60 }
0x1384   :  { %v3159_v18 = vpop.f32.mrf.mxu2  ;;  %v3173_v2 = vpop.f32.mrf.mxu3 }
0x1385   :  { %v3160_v51 = vadd.f32 %v4537_v7, %v3159_v18 }
0x1387   :  { %v3174_v23 = vadd.f32 %v3173_v2, %v3160_v51 }
0x1389   :  { %v3177_v56 = vadd.f32 %v3174_v23, %v2874_v13 }
0x138b   :  { %3180 = vadd.xlane.f32.xlu2 %v3177_v56 }
0x13f6   :  { %v3179_v55 = vpop.xlane.xlu1 %3178 }
0x13f7   :  { %v3182_v43 = vmul.f32 %v3179_v55, %v5922_v31 }
0x13f9   :  { %v3184_v8 = vsub.f32 %v3176_v60, %v3182_v43 }
0x13fb   :  { %v3186_v49 = vmul.f32 %v3184_v8, %v3184_v8 }
0x13fd   :  { %3188 = vadd.xlane.f32.xlu0 %v3186_v49 }
0x13fe   :  { %v3181_v59 = vpop.xlane.xlu2 %3180 }
0x13ff   :  { %v3183_v3 = vmul.f32 %v3181_v59, %v5922_v31 }
0x1401   :  { %v3185_v24 = vsub.f32 %v3177_v56, %v3183_v3 }
0x1403   :  { %v3187_v6 = vmul.f32 %v3185_v24, %v3185_v24 }
0x1405   :  { %3190 = vadd.xlane.f32.xlu1 %v3187_v6 }
0x1470   :  { %v3189_v37 = vpop.xlane.xlu0 %3188 }
0x1471   :  { %v3192_v10 = vmul.f32 %v3189_v37, %v5922_v31 }
0x1473   :  { %v3194_v32 = vadd.f32 1e-05, %v3192_v10 }
0x1475   :  { %4601 = vrsqrt.f32 %v3194_v32  ;;  %vm3202_vm0 = vweird.f32 %v3194_v32 }
0x1478   :  { %v3191_v22 = vpop.xlane.xlu1 %3190 }
0x1479   :  { %v3193_v29 = vmul.f32 %v3191_v22, %v5922_v31  ;;  %v4515_v31 = vld [vmem:[%s6618_s22 + $0x10] sm:$0xff] }
0x147a   :  { %3298 = vmatpush.bf16.msrb.mxu0 %v4515_v31 }
0x147b   :  { %v4602_v35 = vpop.eup %4601  ;;  %v3195_v48 = vadd.f32 1e-05, %v3193_v29 }
0x147c   :  { %v3197_v0 = vmul.f32 %v4602_v35, %v3194_v32  ;;  %vm3203_vm15 = vweird.f32 %v4602_v35 }
0x147d   :  { %4603 = vrsqrt.f32 %v3195_v48  ;;  %vm3204_vm1 = vmor %vm3202_vm0, %vm3203_vm15  ;;  %vm3212_vm3 = vweird.f32 %v3195_v48 }
0x147e   :  { %v3198_v52 = vmul.f32 %v4602_v35, %v3197_v0  ;;  %3299 = vmatpush.bf16.msrb.mxu0 %v4514_v44 }
0x1480   :  { %v3199_v25 = vmul.f32 0.5, %v3198_v52 }
0x1482   :  { %v3200_v13 = vsub.f32 1.5, %v3199_v25  ;;  %3300 = vmatpush.bf16.msrb.mxu0 %v4513_v9 }
0x1483   :  { %v4604_v54 = vpop.eup %4603 }
0x1484   :  { %v3201_v12 = vmul.f32 %v4602_v35, %v3200_v13  ;;  %v3207_v45 = vmul.f32 %v4604_v54, %v3195_v48  ;;  %vm3213_vm2 = vweird.f32 %v4604_v54 }
0x1485   :  { %vm3214_vm4 = vmor %vm3212_vm3, %vm3213_vm2 }
0x1486   :  { %v3208_v50 = vmul.f32 %v4604_v54, %v3207_v45  ;;  %v3205_v16 = vsel %vm3204_vm1, %v4602_v35, %v3201_v12 }
0x1487   :  { %v3216_v63 = vmul.f32 %v3205_v16, %v3184_v8 }
0x1488   :  { %v3209_v47 = vmul.f32 0.5, %v3208_v50 }
0x1489   :  { %v3219_v62 = vmul.f32 %v3218_v42, %v3216_v63 }
0x148a   :  { %v3210_v41 = vsub.f32 1.5, %v3209_v47 }
0x148b   :  { %v3222_v21 = vadd.f32 %v3221_v27, %v3219_v62 }
0x148c   :  { %v3211_v14 = vmul.f32 %v4604_v54, %v3210_v41 }
0x148e   :  { %v3215_v26 = vsel %vm3214_vm4, %v4604_v54, %v3211_v14 }
0x148f   :  { %v3217_v39 = vmul.f32 %v3215_v26, %v3185_v24 }
0x1491   :  { %v3220_v20 = vmul.f32 %v3218_v42, %v3217_v39 }
0x1493   :  { %v3223_v58 = vadd.f32 %v3221_v27, %v3220_v20 }
0x1495   :  { %v3224_v4 = vpack.c.bf16 %v3223_v58, %v3222_v21 }
0x1497   :  { %3301 = vmatmul.bf16.vlgmr.msrb.gmra.mxu0 %v3224_v4 }
0x1514   :  { %v3302_v38 = vpop.f32.mrf.mxu0 }
0x1515   :  { %v3303_v61 = vadd.f32 %v4538_v57, %v3302_v38 }
0x1517   :  { %3307 = vst [vmem:[#allocation8] sm:$0xff] %v3303_v61 }
0x151c   :  { %v3304_v15 = vpop.f32.mrf.mxu0 }
0x151d   :  { %v3305_v17 = vadd.f32 %v4538_v57, %v3304_v15 }
0x151f   :  { %3308 = vst [vmem:[#allocation8 + $0x8] sm:$0xff] %v3305_v17 }
0x1520   :  { %3321 = dma.vmem_to_hbm [thread:$0]  %s3314_s21, 256, %s3316_s5, [#allocation4], %s4740_s7, %s4740_s7, %s4741_s30  }
0x1521   :  { %4737 = dma.done.wait [#allocation4], 256  }
0x1522   :  { %4738 = vsyncadd [#allocation4], 4294967040 }
0x1523   :  { %3326 = vsyncpa [#allocation3], 1 }
0x1524   :  { %3327 = vsyncpa [#allocation6], 1 }
0x1525   :  { %3328 = vsyncpa [#allocation4], 1 }

</bundles_post_ra>
